<compile_context>
chip_gen: v5e
topology: v5e:2x2
jax: 0.10.0
libtpu: 0.0.40
codegen_flags: <defaults>
</compile_context>

<pallas_src>
import math

import jax
import jax.numpy as jnp
from jax import lax
from jax.experimental import pallas as pl
from jax.experimental.pallas import tpu as pltpu


# ----------------------------- in-kernel helpers -----------------------------

def _layernorm(x, w, b, eps=1e-5):
    # PyTorch nn.LayerNorm: biased variance, eps inside rsqrt.  f32 math.
    mu = jnp.mean(x, axis=-1, keepdims=True)
    xc = x - mu
    var = jnp.mean(xc * xc, axis=-1, keepdims=True)
    return xc * lax.rsqrt(var + eps) * w + b


def _erf(x):
    # Abramowitz & Stegun 7.1.26 polynomial erf (|err| < 1.5e-7), f32.
    # (Kept as explicit VPU/EUP ops for guaranteed Mosaic lowering.)
    a1, a2, a3, a4, a5 = (0.254829592, -0.284496736, 1.421413741,
                          -1.453152027, 1.061405429)
    p = 0.3275911
    sgn = jnp.where(x >= 0.0, 1.0, -1.0)
    ax = jnp.abs(x)
    t = 1.0 / (1.0 + p * ax)
    poly = ((((a5 * t + a4) * t + a3) * t + a2) * t + a1) * t
    return sgn * (1.0 - poly * jnp.exp(-ax * ax))


def _gelu_exact(x):
    # nn.GELU() default: 0.5 * x * (1 + erf(x / sqrt(2)))
    return 0.5 * x * (1.0 + _erf(x * 0.7071067811865476))


# ------------------------------- kernel builder -------------------------------

def _build_kernel(*, b, b_pad, n_p, n_tok, S, d, heads, ppc, n_layers):
    hd = d // heads
    npb = n_p * b_pad
    patch_row0 = b_pad            # cls slot occupies rows [0, b_pad)
    bf16 = jnp.bfloat16

    def kernel(patches_hbm, pw_ref, pb_ref, cls_ref, posp_ref,
               ln1w_ref, ln1b_ref, wqkv_ref, bqkv_ref, wo_ref, bo_ref,
               ln2w_ref, ln2b_ref, w1_ref, b1_ref, w2_ref, b2_ref,
               lnhw_ref, lnhb_ref, wh_ref, bh_ref,
               out_ref, x_ref):
        l = pl.program_id(0)

        # ---- grid step 0: patch embedding + cls token + positional embedding
        @pl.when(l == 0)
        def _init():
            def body(pbuf):
                # patches never sit in resident VMEM: DMA'd once into a scoped
                # buffer, consumed, and released.
                pltpu.sync_copy(patches_hbm, pbuf)
                pe = jnp.dot(pbuf[...], pw_ref[...],
                             preferred_element_type=jnp.float32) + pb_ref[...]
                # expand (n_p, 1, d) pos table to one row per padded batch slot
                pos_rep = jnp.broadcast_to(
                    posp_ref[...], (n_p, b_pad, d)).reshape(npb, d)
                x_ref[0:b_pad, :] = jnp.broadcast_to(cls_ref[...], (b_pad, d))
                x_ref[patch_row0:patch_row0 + npb, :] = pe + pos_rep
            pl.run_scoped(body, pltpu.VMEM((npb, ppc), bf16))

        # ---- one transformer block per grid step -----------------------------
        x = x_ref[...]                                           # (S, d) f32

        # ResidualAdd(PreNorm(Attention)) -- block-diagonal over token slots
        y = _layernorm(x, ln1w_ref[0], ln1b_ref[0])
        qkv = jnp.dot(y.astype(bf16), wqkv_ref[0],
                      preferred_element_type=jnp.float32) + bqkv_ref[0]  # (S,3d)
        qkv3 = qkv.reshape(n_tok, b_pad, 3 * d)      # 8-aligned per-slot groups

        if b_pad > b:
            # mask pad rows (as keys) inside every token slot; generated
            # in-kernel (no HBM mask), scores stay f32 so -1e30 is safe.
            kmask = jnp.where(
                lax.broadcasted_iota(jnp.int32, (1, 1, b_pad), 2) < b,
                0.0, -1e30)
        else:
            kmask = None

        head_outs = []
        for h in range(heads):
            q3 = qkv3[:, :, h * hd:(h + 1) * hd].astype(bf16)
            k3 = qkv3[:, :, d + h * hd:d + (h + 1) * hd].astype(bf16)
            v3 = qkv3[:, :, 2 * d + h * hd:2 * d + (h + 1) * hd].astype(bf16)
            # (n_tok, b_pad, b_pad) scores: attention over the batch entries
            # of the same token slot (1/sqrt(hd) already folded into wqkv).
            s = jnp.einsum('tqc,tkc->tqk', q3, k3,
                           preferred_element_type=jnp.float32)
            if kmask is not None:
                s = s + kmask
            m = jnp.max(s, axis=-1, keepdims=True)
            e = jnp.exp(s - m)
            den = jnp.sum(e, axis=-1, keepdims=True)
            pr = (e * pl.reciprocal(den, approx=True)).astype(bf16)
            head_outs.append(jnp.einsum('tqk,tkc->tqc', pr, v3,
                                        preferred_element_type=jnp.float32))
        # single full-depth out-projection (concat heads, one (S,d)@(d,d))
        cat = jnp.concatenate(head_outs, axis=-1).reshape(S, d)
        attn = jnp.dot(cat.astype(bf16), wo_ref[0],
                       preferred_element_type=jnp.float32) + bo_ref[0]
        x = x + attn                                             # residual

        # ResidualAdd(PreNorm(FeedForward))   (dropout = identity in eval mode)
        y = _layernorm(x, ln2w_ref[0], ln2b_ref[0])
        h1 = jnp.dot(y.astype(bf16), w1_ref[0],
                     preferred_element_type=jnp.float32) + b1_ref[0]
        h1 = _gelu_exact(h1)
        ff = jnp.dot(h1.astype(bf16), w2_ref[0],
                     preferred_element_type=jnp.float32) + b2_ref[0]
        x = x + ff                                               # residual
        x_ref[...] = x

        # ---- last grid step: classification head on the CLS rows -------------
        @pl.when(l == n_layers - 1)
        def _head():
            z = _layernorm(x[0:b, :], lnhw_ref[...], lnhb_ref[...])
            out_ref[...] = jnp.dot(z.astype(bf16), wh_ref[...],
                                   preferred_element_type=jnp.float32) + bh_ref[...]

    return kernel


# ------------------------------- wrapper ---------------------------------------

def vit_forward(img, params, cfg):
    b, ch, H, W = img.shape
    p = cfg["patch_size"]
    d = cfg["emb_dim"]
    L = cfg["n_layers"]
    heads = cfg["heads"]
    out_dim = cfg["out_dim"]
    assert d % heads == 0
    hcnt, wcnt = H // p, W // p
    n_p = hcnt * wcnt
    ppc = p * p * ch
    n_tok = n_p + 1

    # slot geometry: each token slot owns b_pad sublane-aligned rows.
    b_pad = ((b + 7) // 8) * 8
    S = n_tok * b_pad

    # 'b c (h p1) (w p2) -> b (h w) (p1 p2 c)', then token-major padded rows.
    x = img.reshape(b, ch, hcnt, p, wcnt, p)
    x = jnp.transpose(x, (0, 2, 4, 3, 5, 1))                 # (b, h, w, p1, p2, c)
    patches = x.reshape(b, n_p, ppc)                         # (b, n_p, ppc)
    patches_tm = jnp.transpose(patches, (1, 0, 2))           # (n_p, b, ppc)
    if b_pad == b:
        patches_pad = patches_tm
    else:
        patches_pad = jnp.zeros((n_p, b_pad, ppc), patches_tm.dtype)
        patches_pad = patches_pad.at[:, :b, :].set(patches_tm)
    patches_pad = patches_pad.reshape(n_p * b_pad, ppc).astype(jnp.bfloat16)

    (pw, pb, cls, pos,
     ln1w, ln1b,
     wq, bq, wk, bk, wv, bv,
     wiq, biq, wik, bik, wiv, biv,
     wo, bo,
     ln2w, ln2b, w1, b1, w2, b2,
     lnhw, lnhb, wh, bh) = params

    # fold self.q/k/v Linear into the MHA in_proj chunks, fuse into one QKV,
    # and fold the 1/sqrt(hd) softmax scale into the q chunk.
    def fold(wx, bx, wi, bi):
        w_eff = jnp.einsum('lij,ljk->lik', wx, wi)               # (L, d, d)
        b_eff = jnp.einsum('lij,ljk->lik', bx, wi) + bi          # (L, 1, d)
        return w_eff, b_eff

    scale = 1.0 / math.sqrt(d // heads)
    wq_e, bq_e = fold(wq, bq, wiq, biq)
    wq_e, bq_e = wq_e * scale, bq_e * scale
    wk_e, bk_e = fold(wk, bk, wik, bik)
    wv_e, bv_e = fold(wv, bv, wiv, biv)
    wqkv = jnp.concatenate([wq_e, wk_e, wv_e], axis=-1)          # (L, d, 3d)
    bqkv = jnp.concatenate([bq_e, bk_e, bv_e], axis=-1)          # (L, 1, 3d)

    cls_plus = cls + pos[0:1, :]                  # cls token + its pos row
    pos_patch = pos[1:n_tok, :].reshape(n_p, 1, d)

    hidden = w1.shape[-1]
    bf = lambda a: a.astype(jnp.bfloat16)

    inputs, in_specs = [], []

    def add_any(a):
        inputs.append(a)
        in_specs.append(pl.BlockSpec(memory_space=pl.ANY))

    def add_const(a):
        nd = a.ndim
        inputs.append(a)
        in_specs.append(pl.BlockSpec(a.shape, lambda l, nd=nd: (0,) * nd))

    def add_layer(a):
        rest = a.shape[1:]
        inputs.append(a)
        in_specs.append(
            pl.BlockSpec((1,) + rest, lambda l, k=len(rest): (l,) + (0,) * k))

    add_any(patches_pad)                                      # step-0 only, HBM
    add_const(bf(pw)); add_const(pb); add_const(cls_plus); add_const(pos_patch)
    add_layer(ln1w); add_layer(ln1b)
    add_layer(bf(wqkv)); add_layer(bqkv)
    add_layer(bf(wo)); add_layer(bo)
    add_layer(ln2w); add_layer(ln2b)
    add_layer(bf(w1)); add_layer(b1)
    add_layer(bf(w2)); add_layer(b2)
    add_const(lnhw); add_const(lnhb)
    add_const(bf(wh)); add_const(bh)

    kernel = _build_kernel(b=b, b_pad=b_pad, n_p=n_p, n_tok=n_tok, S=S, d=d,
                           heads=heads, ppc=ppc, n_layers=L)

    # explicit VMEM budget: double-buffered bf16 layer weights + the f32 slab +
    # f32 intermediates + the step-0 patch staging buffer, with headroom.
    wbytes_layer = 2 * (3 * d * d + d * d + 2 * d * hidden)      # bf16 bytes
    budget = (4 * wbytes_layer
              + 8 * S * d * 4
              + n_p * b_pad * (2 * ppc + 4 * d)
              + (8 << 20))
    vmem_limit = int(min(max(budget, 32 << 20), 100 << 20))

    out = pl.pallas_call(
        kernel,
        out_shape=jax.ShapeDtypeStruct((b, out_dim), jnp.float32),
        grid_spec=pltpu.PrefetchScalarGridSpec(
            num_scalar_prefetch=0,
            grid=(L,),
            in_specs=in_specs,
            out_specs=pl.BlockSpec((b, out_dim), lambda l: (0, 0)),
            scratch_shapes=[pltpu.VMEM((S, d), jnp.float32)],
        ),
        compiler_params=pltpu.CompilerParams(
            dimension_semantics=("arbitrary",),
            vmem_limit_bytes=vmem_limit),
    )(*inputs)
    return out


# ------------------------------- params ----------------------------------------

def make_params(key, cfg):
    ch, img_size, p = cfg["ch"], cfg["img_size"], cfg["patch_size"]
    d, L, out_dim = cfg["emb_dim"], cfg["n_layers"], cfg["out_dim"]
    ppc = p * p * ch
    n = (img_size // p) ** 2 + 1
    hidden = d  # FeedForward(emb_dim, emb_dim) in the ViT constructor

    keys = iter(jax.random.split(key, 64))

    def w(shape, s=0.05):
        return (s * jax.random.normal(next(keys), shape)).astype(jnp.float32)

    ones = lambda s: jnp.ones(s, jnp.float32)
    zeros = lambda s: jnp.zeros(s, jnp.float32)

    # All Linear weights are stored transposed (in, out) so the kernel does x @ W.
    params = [
        w((ppc, d)), w((1, d), 0.02),                       # patch Linear
        w((1, d)),                                          # cls token
        w((n, d)),                                          # pos embedding
        ones((L, 1, d)), zeros((L, 1, d)),                  # ln1 (PreNorm)
        w((L, d, d)), w((L, 1, d), 0.02),                   # self.q
        w((L, d, d)), w((L, 1, d), 0.02),                   # self.k
        w((L, d, d)), w((L, 1, d), 0.02),                   # self.v
        w((L, d, d)), w((L, 1, d), 0.02),                   # MHA in_proj (q chunk)
        w((L, d, d)), w((L, 1, d), 0.02),                   # MHA in_proj (k chunk)
        w((L, d, d)), w((L, 1, d), 0.02),                   # MHA in_proj (v chunk)
        w((L, d, d)), w((L, 1, d), 0.02),                   # MHA out_proj
        ones((L, 1, d)), zeros((L, 1, d)),                  # ln2 (PreNorm)
        w((L, d, hidden)), w((L, 1, hidden), 0.02),         # FF Linear 1
        w((L, hidden, d)), w((L, 1, d), 0.02),              # FF Linear 2
        ones((1, d)), zeros((1, d)),                        # head LayerNorm
        w((d, out_dim)), w((1, out_dim), 0.02),             # head Linear
    ]
    return params


# ------------------------------- main -------------------------------------------

if __name__ == "__main__":
    cfg = dict(ch=3, img_size=16, patch_size=4, emb_dim=32,
               n_layers=2, out_dim=8, heads=2, batch=2)

    key = jax.random.PRNGKey(0)
    k_img, k_par = jax.random.split(key)

    img = jax.random.normal(
        k_img, (cfg["batch"], cfg["ch"], cfg["img_size"], cfg["img_size"]),
        dtype=jnp.float32)
    params = make_params(k_par, cfg)

    out = vit_forward(img, params, cfg)
    out = jax.block_until_ready(out)
    assert out.shape == (cfg["batch"], cfg["out_dim"])
    # TODO(synk): nn.Dropout paths are identity (eval mode); training-mode dropout
    # would need pltpu.prng_* and is intentionally not emulated here.
    print("KERNEL_OK")
</pallas_src>

<mosaic_0001>
module attributes {stable_mosaic.version = 11 : i64} {
  func.func @kernel(%arg0: i32, %arg1: memref<128x48xbf16, #tpu.memory_space<any>>, %arg2: memref<48x32xbf16, #tpu.memory_space<vmem>>, %arg3: memref<1x32xf32, #tpu.memory_space<vmem>>, %arg4: memref<1x32xf32, #tpu.memory_space<vmem>>, %arg5: memref<16x1x32xf32, #tpu.memory_space<vmem>>, %arg6: memref<1x1x32xf32, #tpu.memory_space<vmem>>, %arg7: memref<1x1x32xf32, #tpu.memory_space<vmem>>, %arg8: memref<1x32x96xbf16, #tpu.memory_space<vmem>>, %arg9: memref<1x1x96xf32, #tpu.memory_space<vmem>>, %arg10: memref<1x32x32xbf16, #tpu.memory_space<vmem>>, %arg11: memref<1x1x32xf32, #tpu.memory_space<vmem>>, %arg12: memref<1x1x32xf32, #tpu.memory_space<vmem>>, %arg13: memref<1x1x32xf32, #tpu.memory_space<vmem>>, %arg14: memref<1x32x32xbf16, #tpu.memory_space<vmem>>, %arg15: memref<1x1x32xf32, #tpu.memory_space<vmem>>, %arg16: memref<1x32x32xbf16, #tpu.memory_space<vmem>>, %arg17: memref<1x1x32xf32, #tpu.memory_space<vmem>>, %arg18: memref<1x32xf32, #tpu.memory_space<vmem>>, %arg19: memref<1x32xf32, #tpu.memory_space<vmem>>, %arg20: memref<32x8xbf16, #tpu.memory_space<vmem>>, %arg21: memref<1x8xf32, #tpu.memory_space<vmem>>, %arg22: memref<2x8xf32, #tpu.memory_space<vmem>>, %arg23: memref<136x32xf32, #tpu.memory_space<vmem>>) attributes {dimension_semantics = [#tpu.dimension_semantics<arbitrary>], iteration_bounds = array<i64: 2>, scalar_prefetch = 0 : i64, scratch_operands = 1 : i64, tpu.core_type = #tpu.core_type<tc>, window_params = [{}, {pipeline_mode = #tpu.pipeline_mode<synchronous>, transform_indices = @transform_1, window_bounds = array<i64: 48, 32>}, {pipeline_mode = #tpu.pipeline_mode<synchronous>, transform_indices = @transform_2, window_bounds = array<i64: 1, 32>}, {pipeline_mode = #tpu.pipeline_mode<synchronous>, transform_indices = @transform_3, window_bounds = array<i64: 1, 32>}, {pipeline_mode = #tpu.pipeline_mode<synchronous>, transform_indices = @transform_4, window_bounds = array<i64: 16, 1, 32>}, {transform_indices = @transform_5, window_bounds = array<i64: 1, 1, 32>}, {transform_indices = @transform_6, window_bounds = array<i64: 1, 1, 32>}, {transform_indices = @transform_7, window_bounds = array<i64: 1, 32, 96>}, {transform_indices = @transform_8, window_bounds = array<i64: 1, 1, 96>}, {transform_indices = @transform_9, window_bounds = array<i64: 1, 32, 32>}, {transform_indices = @transform_10, window_bounds = array<i64: 1, 1, 32>}, {transform_indices = @transform_11, window_bounds = array<i64: 1, 1, 32>}, {transform_indices = @transform_12, window_bounds = array<i64: 1, 1, 32>}, {transform_indices = @transform_13, window_bounds = array<i64: 1, 32, 32>}, {transform_indices = @transform_14, window_bounds = array<i64: 1, 1, 32>}, {transform_indices = @transform_15, window_bounds = array<i64: 1, 32, 32>}, {transform_indices = @transform_16, window_bounds = array<i64: 1, 1, 32>}, {pipeline_mode = #tpu.pipeline_mode<synchronous>, transform_indices = @transform_17, window_bounds = array<i64: 1, 32>}, {pipeline_mode = #tpu.pipeline_mode<synchronous>, transform_indices = @transform_18, window_bounds = array<i64: 1, 32>}, {pipeline_mode = #tpu.pipeline_mode<synchronous>, transform_indices = @transform_19, window_bounds = array<i64: 32, 8>}, {pipeline_mode = #tpu.pipeline_mode<synchronous>, transform_indices = @transform_20, window_bounds = array<i64: 1, 8>}, {pipeline_mode = #tpu.pipeline_mode<synchronous>, transform_indices = @transform_21, window_bounds = array<i64: 2, 8>}]} {
    %c0_i32 = arith.constant 0 : i32
    %0 = arith.cmpi eq, %arg0, %c0_i32 : i32
    %1 = arith.extui %0 : i1 to i32
    %c0_i32_0 = arith.constant 0 : i32
    %2 = arith.cmpi ne, %1, %c0_i32_0 : i32
    scf.if %2 {
      "tpu.region"() ({
        %alloca = memref.alloca() : memref<128x48xbf16, #tpu.memory_space<vmem>>
        "tpu.region"() ({
          %198 = tpu.sem_alloc : memref<!tpu.dma_semaphore, #tpu.memory_space<semaphore_mem>>
          tpu.enqueue_dma source(%arg1 : memref<128x48xbf16, #tpu.memory_space<any>>) target(%alloca : memref<128x48xbf16, #tpu.memory_space<vmem>>) target_semaphore(%198 : memref<!tpu.dma_semaphore, #tpu.memory_space<semaphore_mem>>)
          tpu.wait_dma2 semaphore(%198 : memref<!tpu.dma_semaphore, #tpu.memory_space<semaphore_mem>>) src(%arg1 : memref<128x48xbf16, #tpu.memory_space<any>>) dst(%alloca : memref<128x48xbf16, #tpu.memory_space<vmem>>)
          tpu.yield
        }) : () -> ()
        %c0_80 = arith.constant 0 : index
        %c0_81 = arith.constant 0 : index
        %182 = vector.load %alloca[%c0_80, %c0_81] : memref<128x48xbf16, #tpu.memory_space<vmem>>, vector<128x48xbf16>
        %c0_82 = arith.constant 0 : index
        %c0_83 = arith.constant 0 : index
        %183 = vector.load %arg2[%c0_82, %c0_83] : memref<48x32xbf16, #tpu.memory_space<vmem>>, vector<48x32xbf16>
        %cst_84 = arith.constant dense<0.000000e+00> : vector<128x32xf32>
        %184 = tpu.matmul %182, %183, %cst_84 {dimension_numbers = #tpu.dot_dimension_numbers<[1], [0], [0], [1], [0, 0, 1, 1], [], []>} : vector<128x48xbf16>, vector<48x32xbf16>, vector<128x32xf32> -> vector<128x32xf32>
        %c0_85 = arith.constant 0 : index
        %c0_86 = arith.constant 0 : index
        %185 = vector.load %arg3[%c0_85, %c0_86] : memref<1x32xf32, #tpu.memory_space<vmem>>, vector<1x32xf32>
        %186 = vector.broadcast %185 : vector<1x32xf32> to vector<128x32xf32>
        %187 = arith.addf %184, %186 : vector<128x32xf32>
        %c0_87 = arith.constant 0 : index
        %c0_88 = arith.constant 0 : index
        %c0_89 = arith.constant 0 : index
        %188 = vector.load %arg5[%c0_87, %c0_88, %c0_89] : memref<16x1x32xf32, #tpu.memory_space<vmem>>, vector<16x1x32xf32>
        %189 = vector.shape_cast %188 : vector<16x1x32xf32> to vector<16x1x32xf32>
        %190 = vector.broadcast %189 : vector<16x1x32xf32> to vector<16x8x32xf32>
        %191 = vector.shape_cast %190 : vector<16x8x32xf32> to vector<128x32xf32>
        %c0_90 = arith.constant 0 : index
        %c0_91 = arith.constant 0 : index
        %192 = vector.load %arg4[%c0_90, %c0_91] : memref<1x32xf32, #tpu.memory_space<vmem>>, vector<1x32xf32>
        %193 = vector.shape_cast %192 : vector<1x32xf32> to vector<1x32xf32>
        %194 = vector.broadcast %193 : vector<1x32xf32> to vector<8x32xf32>
        %c0_92 = arith.constant 0 : index
        %c0_93 = arith.constant 0 : index
        %195 = vector.load %arg23[%c0_92, %c0_93] : memref<136x32xf32, #tpu.memory_space<vmem>>, vector<8x32xf32>
        tpu.vector_store %arg23[%c0_92, %c0_93], %194 {strides = array<i32>} : memref<136x32xf32, #tpu.memory_space<vmem>>, vector<8x32xf32>,
        %196 = arith.addf %187, %191 : vector<128x32xf32>
        %c8 = arith.constant 8 : index
        %c0_94 = arith.constant 0 : index
        %197 = vector.load %arg23[%c8, %c0_94] : memref<136x32xf32, #tpu.memory_space<vmem>>, vector<128x32xf32>
        tpu.vector_store %arg23[%c8, %c0_94], %196 {strides = array<i32>} : memref<136x32xf32, #tpu.memory_space<vmem>>, vector<128x32xf32>,
        tpu.yield
      }) : () -> ()
    } else {
    }
    %c0 = arith.constant 0 : index
    %c0_1 = arith.constant 0 : index
    %3 = vector.load %arg23[%c0, %c0_1] : memref<136x32xf32, #tpu.memory_space<vmem>>, vector<136x32xf32>
    %c0_2 = arith.constant 0 : index
    %c0_3 = arith.constant 0 : index
    %c0_4 = arith.constant 0 : index
    %4 = vector.load %arg6[%c0_2, %c0_3, %c0_4] : memref<1x1x32xf32, #tpu.memory_space<vmem>>, vector<1x1x32xf32>
    %5 = vector.shape_cast %4 : vector<1x1x32xf32> to vector<1x32xf32>
    %c0_5 = arith.constant 0 : index
    %c0_6 = arith.constant 0 : index
    %c0_7 = arith.constant 0 : index
    %6 = vector.load %arg7[%c0_5, %c0_6, %c0_7] : memref<1x1x32xf32, #tpu.memory_space<vmem>>, vector<1x1x32xf32>
    %7 = vector.shape_cast %6 : vector<1x1x32xf32> to vector<1x32xf32>
    %cst = arith.constant dense<0.000000e+00> : vector<136xf32>
    %8 = vector.multi_reduction <add>, %3, %cst [1] : vector<136x32xf32> to vector<136xf32>
    %9 = vector.shape_cast %8 : vector<136xf32> to vector<136x1xf32>
    %cst_8 = arith.constant 3.200000e+01 : f32
    %10 = vector.broadcast %cst_8 : f32 to vector<136x1xf32>
    %11 = arith.divf %9, %10 : vector<136x1xf32>
    %12 = vector.broadcast %11 : vector<136x1xf32> to vector<136x32xf32>
    %13 = arith.subf %3, %12 : vector<136x32xf32>
    %14 = arith.mulf %13, %13 : vector<136x32xf32>
    %cst_9 = arith.constant dense<0.000000e+00> : vector<136xf32>
    %15 = vector.multi_reduction <add>, %14, %cst_9 [1] : vector<136x32xf32> to vector<136xf32>
    %16 = vector.shape_cast %15 : vector<136xf32> to vector<136x1xf32>
    %cst_10 = arith.constant 3.200000e+01 : f32
    %17 = vector.broadcast %cst_10 : f32 to vector<136x1xf32>
    %18 = arith.divf %16, %17 : vector<136x1xf32>
    %cst_11 = arith.constant 9.99999974E-6 : f32
    %19 = vector.broadcast %cst_11 : f32 to vector<136x1xf32>
    %20 = arith.addf %18, %19 : vector<136x1xf32>
    %21 = math.rsqrt %20 : vector<136x1xf32>
    %22 = vector.broadcast %21 : vector<136x1xf32> to vector<136x32xf32>
    %23 = arith.mulf %13, %22 : vector<136x32xf32>
    %24 = vector.broadcast %5 : vector<1x32xf32> to vector<136x32xf32>
    %25 = arith.mulf %23, %24 : vector<136x32xf32>
    %26 = vector.broadcast %7 : vector<1x32xf32> to vector<136x32xf32>
    %27 = arith.addf %25, %26 : vector<136x32xf32>
    %28 = arith.truncf %27 : vector<136x32xf32> to vector<136x32xbf16>
    %c0_12 = arith.constant 0 : index
    %c0_13 = arith.constant 0 : index
    %c0_14 = arith.constant 0 : index
    %29 = vector.load %arg8[%c0_12, %c0_13, %c0_14] : memref<1x32x96xbf16, #tpu.memory_space<vmem>>, vector<1x32x96xbf16>
    %30 = vector.shape_cast %29 : vector<1x32x96xbf16> to vector<32x96xbf16>
    %cst_15 = arith.constant dense<0.000000e+00> : vector<136x96xf32>
    %31 = tpu.matmul %28, %30, %cst_15 {dimension_numbers = #tpu.dot_dimension_numbers<[1], [0], [0], [1], [0, 0, 1, 1], [], []>} : vector<136x32xbf16>, vector<32x96xbf16>, vector<136x96xf32> -> vector<136x96xf32>
    %c0_16 = arith.constant 0 : index
    %c0_17 = arith.constant 0 : index
    %c0_18 = arith.constant 0 : index
    %32 = vector.load %arg9[%c0_16, %c0_17, %c0_18] : memref<1x1x96xf32, #tpu.memory_space<vmem>>, vector<1x1x96xf32>
    %33 = vector.shape_cast %32 : vector<1x1x96xf32> to vector<1x96xf32>
    %34 = vector.broadcast %33 : vector<1x96xf32> to vector<136x96xf32>
    %35 = arith.addf %31, %34 : vector<136x96xf32>
    %36 = vector.shape_cast %35 : vector<136x96xf32> to vector<17x8x96xf32>
    %37 = tpu.iota {dimensions = array<i32: 2>} : vector<1x1x8xi32>
    %c2_i32 = arith.constant 2 : i32
    %38 = vector.broadcast %c2_i32 : i32 to vector<1x1x8xi32>
    %39 = arith.cmpi slt, %37, %38 : vector<1x1x8xi32>
    %cst_19 = arith.constant 0.000000e+00 : f32
    %cst_20 = arith.constant -1.000000e+30 : f32
    %40 = vector.broadcast %cst_19 : f32 to vector<1x1x8xf32>
    %41 = vector.broadcast %cst_20 : f32 to vector<1x1x8xf32>
    %42 = arith.select %39, %40, %41 : vector<1x1x8xi1>, vector<1x1x8xf32>
    %43 = vector.extract_strided_slice %36 {offsets = [0, 0, 0], sizes = [17, 8, 16], strides = [1, 1, 1]} : vector<17x8x96xf32> to vector<17x8x16xf32>
    %44 = arith.truncf %43 : vector<17x8x16xf32> to vector<17x8x16xbf16>
    %45 = vector.extract_strided_slice %36 {offsets = [0, 0, 32], sizes = [17, 8, 16], strides = [1, 1, 1]} : vector<17x8x96xf32> to vector<17x8x16xf32>
    %46 = arith.truncf %45 : vector<17x8x16xf32> to vector<17x8x16xbf16>
    %47 = vector.extract_strided_slice %36 {offsets = [0, 0, 64], sizes = [17, 8, 16], strides = [1, 1, 1]} : vector<17x8x96xf32> to vector<17x8x16xf32>
    %48 = arith.truncf %47 : vector<17x8x16xf32> to vector<17x8x16xbf16>
    "tpu.trace_start"() <{level = 10 : i32, message = "tqc,tkc->tqk"}> : () -> ()
    %cst_21 = arith.constant dense<0.000000e+00> : vector<17x8x8xf32>
    %49 = tpu.matmul %44, %46, %cst_21 {dimension_numbers = #tpu.dot_dimension_numbers<[2], [2], [1], [1], [0, 0, 0, 1, 1, 1], [0], [0]>} : vector<17x8x16xbf16>, vector<17x8x16xbf16>, vector<17x8x8xf32> -> vector<17x8x8xf32>
    "tpu.trace_stop"() : () -> ()
    %50 = vector.broadcast %42 : vector<1x1x8xf32> to vector<17x8x8xf32>
    %51 = arith.addf %49, %50 : vector<17x8x8xf32>
    %cst_22 = arith.constant dense<0xFF800000> : vector<17x8xf32>
    %52 = vector.multi_reduction <maximumf>, %51, %cst_22 [2] : vector<17x8x8xf32> to vector<17x8xf32>
    %53 = vector.shape_cast %52 : vector<17x8xf32> to vector<17x8x1xf32>
    %54 = vector.broadcast %53 : vector<17x8x1xf32> to vector<17x8x8xf32>
    %55 = arith.subf %51, %54 : vector<17x8x8xf32>
    %56 = math.exp %55 : vector<17x8x8xf32>
    %cst_23 = arith.constant dense<0.000000e+00> : vector<17x8xf32>
    %57 = vector.multi_reduction <add>, %56, %cst_23 [2] : vector<17x8x8xf32> to vector<17x8xf32>
    %58 = vector.shape_cast %57 : vector<17x8xf32> to vector<17x8x1xf32>
    %59 = tpu.reciprocal %58 {approx = true} : vector<17x8x1xf32> -> vector<17x8x1xf32>
    %60 = vector.broadcast %59 : vector<17x8x1xf32> to vector<17x8x8xf32>
    %61 = arith.mulf %56, %60 : vector<17x8x8xf32>
    %62 = arith.truncf %61 : vector<17x8x8xf32> to vector<17x8x8xbf16>
    "tpu.trace_start"() <{level = 10 : i32, message = "tqk,tkc->tqc"}> : () -> ()
    %cst_24 = arith.constant dense<0.000000e+00> : vector<17x8x16xf32>
    %63 = tpu.matmul %62, %48, %cst_24 {dimension_numbers = #tpu.dot_dimension_numbers<[2], [1], [1], [2], [0, 0, 0, 1, 1, 2], [0], [0]>} : vector<17x8x8xbf16>, vector<17x8x16xbf16>, vector<17x8x16xf32> -> vector<17x8x16xf32>
    "tpu.trace_stop"() : () -> ()
    %64 = vector.extract_strided_slice %36 {offsets = [0, 0, 16], sizes = [17, 8, 16], strides = [1, 1, 1]} : vector<17x8x96xf32> to vector<17x8x16xf32>
    %65 = arith.truncf %64 : vector<17x8x16xf32> to vector<17x8x16xbf16>
    %66 = vector.extract_strided_slice %36 {offsets = [0, 0, 48], sizes = [17, 8, 16], strides = [1, 1, 1]} : vector<17x8x96xf32> to vector<17x8x16xf32>
    %67 = arith.truncf %66 : vector<17x8x16xf32> to vector<17x8x16xbf16>
    %68 = vector.extract_strided_slice %36 {offsets = [0, 0, 80], sizes = [17, 8, 16], strides = [1, 1, 1]} : vector<17x8x96xf32> to vector<17x8x16xf32>
    %69 = arith.truncf %68 : vector<17x8x16xf32> to vector<17x8x16xbf16>
    "tpu.trace_start"() <{level = 10 : i32, message = "tqc,tkc->tqk"}> : () -> ()
    %cst_25 = arith.constant dense<0.000000e+00> : vector<17x8x8xf32>
    %70 = tpu.matmul %65, %67, %cst_25 {dimension_numbers = #tpu.dot_dimension_numbers<[2], [2], [1], [1], [0, 0, 0, 1, 1, 1], [0], [0]>} : vector<17x8x16xbf16>, vector<17x8x16xbf16>, vector<17x8x8xf32> -> vector<17x8x8xf32>
    "tpu.trace_stop"() : () -> ()
    %71 = vector.broadcast %42 : vector<1x1x8xf32> to vector<17x8x8xf32>
    %72 = arith.addf %70, %71 : vector<17x8x8xf32>
    %cst_26 = arith.constant dense<0xFF800000> : vector<17x8xf32>
    %73 = vector.multi_reduction <maximumf>, %72, %cst_26 [2] : vector<17x8x8xf32> to vector<17x8xf32>
    %74 = vector.shape_cast %73 : vector<17x8xf32> to vector<17x8x1xf32>
    %75 = vector.broadcast %74 : vector<17x8x1xf32> to vector<17x8x8xf32>
    %76 = arith.subf %72, %75 : vector<17x8x8xf32>
    %77 = math.exp %76 : vector<17x8x8xf32>
    %cst_27 = arith.constant dense<0.000000e+00> : vector<17x8xf32>
    %78 = vector.multi_reduction <add>, %77, %cst_27 [2] : vector<17x8x8xf32> to vector<17x8xf32>
    %79 = vector.shape_cast %78 : vector<17x8xf32> to vector<17x8x1xf32>
    %80 = tpu.reciprocal %79 {approx = true} : vector<17x8x1xf32> -> vector<17x8x1xf32>
    %81 = vector.broadcast %80 : vector<17x8x1xf32> to vector<17x8x8xf32>
    %82 = arith.mulf %77, %81 : vector<17x8x8xf32>
    %83 = arith.truncf %82 : vector<17x8x8xf32> to vector<17x8x8xbf16>
    "tpu.trace_start"() <{level = 10 : i32, message = "tqk,tkc->tqc"}> : () -> ()
    %cst_28 = arith.constant dense<0.000000e+00> : vector<17x8x16xf32>
    %84 = tpu.matmul %83, %69, %cst_28 {dimension_numbers = #tpu.dot_dimension_numbers<[2], [1], [1], [2], [0, 0, 0, 1, 1, 2], [0], [0]>} : vector<17x8x8xbf16>, vector<17x8x16xbf16>, vector<17x8x16xf32> -> vector<17x8x16xf32>
    "tpu.trace_stop"() : () -> ()
    %85 = tpu.concatenate %63, %84 in 2 : vector<17x8x16xf32>, vector<17x8x16xf32> -> vector<17x8x32xf32>
    %86 = vector.shape_cast %85 : vector<17x8x32xf32> to vector<136x32xf32>
    %87 = arith.truncf %86 : vector<136x32xf32> to vector<136x32xbf16>
    %c0_29 = arith.constant 0 : index
    %c0_30 = arith.constant 0 : index
    %c0_31 = arith.constant 0 : index
    %88 = vector.load %arg10[%c0_29, %c0_30, %c0_31] : memref<1x32x32xbf16, #tpu.memory_space<vmem>>, vector<1x32x32xbf16>
    %89 = vector.shape_cast %88 : vector<1x32x32xbf16> to vector<32x32xbf16>
    %cst_32 = arith.constant dense<0.000000e+00> : vector<136x32xf32>
    %90 = tpu.matmul %87, %89, %cst_32 {dimension_numbers = #tpu.dot_dimension_numbers<[1], [0], [0], [1], [0, 0, 1, 1], [], []>} : vector<136x32xbf16>, vector<32x32xbf16>, vector<136x32xf32> -> vector<136x32xf32>
    %c0_33 = arith.constant 0 : index
    %c0_34 = arith.constant 0 : index
    %c0_35 = arith.constant 0 : index
    %91 = vector.load %arg11[%c0_33, %c0_34, %c0_35] : memref<1x1x32xf32, #tpu.memory_space<vmem>>, vector<1x1x32xf32>
    %92 = vector.shape_cast %91 : vector<1x1x32xf32> to vector<1x32xf32>
    %93 = vector.broadcast %92 : vector<1x32xf32> to vector<136x32xf32>
    %94 = arith.addf %90, %93 : vector<136x32xf32>
    %95 = arith.addf %3, %94 : vector<136x32xf32>
    %c0_36 = arith.constant 0 : index
    %c0_37 = arith.constant 0 : index
    %c0_38 = arith.constant 0 : index
    %96 = vector.load %arg12[%c0_36, %c0_37, %c0_38] : memref<1x1x32xf32, #tpu.memory_space<vmem>>, vector<1x1x32xf32>
    %97 = vector.shape_cast %96 : vector<1x1x32xf32> to vector<1x32xf32>
    %c0_39 = arith.constant 0 : index
    %c0_40 = arith.constant 0 : index
    %c0_41 = arith.constant 0 : index
    %98 = vector.load %arg13[%c0_39, %c0_40, %c0_41] : memref<1x1x32xf32, #tpu.memory_space<vmem>>, vector<1x1x32xf32>
    %99 = vector.shape_cast %98 : vector<1x1x32xf32> to vector<1x32xf32>
    %cst_42 = arith.constant dense<0.000000e+00> : vector<136xf32>
    %100 = vector.multi_reduction <add>, %95, %cst_42 [1] : vector<136x32xf32> to vector<136xf32>
    %101 = vector.shape_cast %100 : vector<136xf32> to vector<136x1xf32>
    %cst_43 = arith.constant 3.200000e+01 : f32
    %102 = vector.broadcast %cst_43 : f32 to vector<136x1xf32>
    %103 = arith.divf %101, %102 : vector<136x1xf32>
    %104 = vector.broadcast %103 : vector<136x1xf32> to vector<136x32xf32>
    %105 = arith.subf %95, %104 : vector<136x32xf32>
    %106 = arith.mulf %105, %105 : vector<136x32xf32>
    %cst_44 = arith.constant dense<0.000000e+00> : vector<136xf32>
    %107 = vector.multi_reduction <add>, %106, %cst_44 [1] : vector<136x32xf32> to vector<136xf32>
    %108 = vector.shape_cast %107 : vector<136xf32> to vector<136x1xf32>
    %cst_45 = arith.constant 3.200000e+01 : f32
    %109 = vector.broadcast %cst_45 : f32 to vector<136x1xf32>
    %110 = arith.divf %108, %109 : vector<136x1xf32>
    %cst_46 = arith.constant 9.99999974E-6 : f32
    %111 = vector.broadcast %cst_46 : f32 to vector<136x1xf32>
    %112 = arith.addf %110, %111 : vector<136x1xf32>
    %113 = math.rsqrt %112 : vector<136x1xf32>
    %114 = vector.broadcast %113 : vector<136x1xf32> to vector<136x32xf32>
    %115 = arith.mulf %105, %114 : vector<136x32xf32>
    %116 = vector.broadcast %97 : vector<1x32xf32> to vector<136x32xf32>
    %117 = arith.mulf %115, %116 : vector<136x32xf32>
    %118 = vector.broadcast %99 : vector<1x32xf32> to vector<136x32xf32>
    %119 = arith.addf %117, %118 : vector<136x32xf32>
    %120 = arith.truncf %119 : vector<136x32xf32> to vector<136x32xbf16>
    %c0_47 = arith.constant 0 : index
    %c0_48 = arith.constant 0 : index
    %c0_49 = arith.constant 0 : index
    %121 = vector.load %arg14[%c0_47, %c0_48, %c0_49] : memref<1x32x32xbf16, #tpu.memory_space<vmem>>, vector<1x32x32xbf16>
    %122 = vector.shape_cast %121 : vector<1x32x32xbf16> to vector<32x32xbf16>
    %cst_50 = arith.constant dense<0.000000e+00> : vector<136x32xf32>
    %123 = tpu.matmul %120, %122, %cst_50 {dimension_numbers = #tpu.dot_dimension_numbers<[1], [0], [0], [1], [0, 0, 1, 1], [], []>} : vector<136x32xbf16>, vector<32x32xbf16>, vector<136x32xf32> -> vector<136x32xf32>
    %c0_51 = arith.constant 0 : index
    %c0_52 = arith.constant 0 : index
    %c0_53 = arith.constant 0 : index
    %124 = vector.load %arg15[%c0_51, %c0_52, %c0_53] : memref<1x1x32xf32, #tpu.memory_space<vmem>>, vector<1x1x32xf32>
    %125 = vector.shape_cast %124 : vector<1x1x32xf32> to vector<1x32xf32>
    %126 = vector.broadcast %125 : vector<1x32xf32> to vector<136x32xf32>
    %127 = arith.addf %123, %126 : vector<136x32xf32>
    %cst_54 = arith.constant 5.000000e-01 : f32
    %128 = vector.broadcast %cst_54 : f32 to vector<136x32xf32>
    %129 = arith.mulf %128, %127 : vector<136x32xf32>
    %cst_55 = arith.constant 0.707106769 : f32
    %130 = vector.broadcast %cst_55 : f32 to vector<136x32xf32>
    %131 = arith.mulf %127, %130 : vector<136x32xf32>
    %cst_56 = arith.constant 0.000000e+00 : f32
    %132 = vector.broadcast %cst_56 : f32 to vector<136x32xf32>
    %133 = arith.cmpf oge, %131, %132 : vector<136x32xf32>
    %cst_57 = arith.constant 1.000000e+00 : f32
    %cst_58 = arith.constant -1.000000e+00 : f32
    %134 = vector.broadcast %cst_57 : f32 to vector<136x32xf32>
    %135 = vector.broadcast %cst_58 : f32 to vector<136x32xf32>
    %136 = arith.select %133, %134, %135 : vector<136x32xi1>, vector<136x32xf32>
    %137 = math.absf %131 : vector<136x32xf32>
    %cst_59 = arith.constant 0.327591091 : f32
    %138 = vector.broadcast %cst_59 : f32 to vector<136x32xf32>
    %139 = arith.mulf %138, %137 : vector<136x32xf32>
    %cst_60 = arith.constant 1.000000e+00 : f32
    %140 = vector.broadcast %cst_60 : f32 to vector<136x32xf32>
    %141 = arith.addf %140, %139 : vector<136x32xf32>
    %cst_61 = arith.constant 1.000000e+00 : f32
    %142 = vector.broadcast %cst_61 : f32 to vector<136x32xf32>
    %143 = arith.divf %142, %141 : vector<136x32xf32>
    %cst_62 = arith.constant 1.06140542 : f32
    %144 = vector.broadcast %cst_62 : f32 to vector<136x32xf32>
    %145 = arith.mulf %144, %143 : vector<136x32xf32>
    %cst_63 = arith.constant -1.45315206 : f32
    %146 = vector.broadcast %cst_63 : f32 to vector<136x32xf32>
    %147 = arith.addf %145, %146 : vector<136x32xf32>
    %148 = arith.mulf %147, %143 : vector<136x32xf32>
    %cst_64 = arith.constant 1.42141378 : f32
    %149 = vector.broadcast %cst_64 : f32 to vector<136x32xf32>
    %150 = arith.addf %148, %149 : vector<136x32xf32>
    %151 = arith.mulf %150, %143 : vector<136x32xf32>
    %cst_65 = arith.constant -0.284496725 : f32
    %152 = vector.broadcast %cst_65 : f32 to vector<136x32xf32>
    %153 = arith.addf %151, %152 : vector<136x32xf32>
    %154 = arith.mulf %153, %143 : vector<136x32xf32>
    %cst_66 = arith.constant 0.254829586 : f32
    %155 = vector.broadcast %cst_66 : f32 to vector<136x32xf32>
    %156 = arith.addf %154, %155 : vector<136x32xf32>
    %157 = arith.mulf %156, %143 : vector<136x32xf32>
    %cst_67 = arith.constant 0.000000e+00 : f32
    %158 = vector.broadcast %cst_67 : f32 to vector<136x32xf32>
    %159 = arith.subf %158, %137 : vector<136x32xf32>
    %160 = arith.mulf %159, %137 : vector<136x32xf32>
    %161 = math.exp %160 : vector<136x32xf32>
    %162 = arith.mulf %157, %161 : vector<136x32xf32>
    %cst_68 = arith.constant 1.000000e+00 : f32
    %163 = vector.broadcast %cst_68 : f32 to vector<136x32xf32>
    %164 = arith.subf %163, %162 : vector<136x32xf32>
    %165 = arith.mulf %136, %164 : vector<136x32xf32>
    %cst_69 = arith.constant 1.000000e+00 : f32
    %166 = vector.broadcast %cst_69 : f32 to vector<136x32xf32>
    %167 = arith.addf %166, %165 : vector<136x32xf32>
    %168 = arith.mulf %129, %167 : vector<136x32xf32>
    %169 = arith.truncf %168 : vector<136x32xf32> to vector<136x32xbf16>
    %c0_70 = arith.constant 0 : index
    %c0_71 = arith.constant 0 : index
    %c0_72 = arith.constant 0 : index
    %170 = vector.load %arg16[%c0_70, %c0_71, %c0_72] : memref<1x32x32xbf16, #tpu.memory_space<vmem>>, vector<1x32x32xbf16>
    %171 = vector.shape_cast %170 : vector<1x32x32xbf16> to vector<32x32xbf16>
    %cst_73 = arith.constant dense<0.000000e+00> : vector<136x32xf32>
    %172 = tpu.matmul %169, %171, %cst_73 {dimension_numbers = #tpu.dot_dimension_numbers<[1], [0], [0], [1], [0, 0, 1, 1], [], []>} : vector<136x32xbf16>, vector<32x32xbf16>, vector<136x32xf32> -> vector<136x32xf32>
    %c0_74 = arith.constant 0 : index
    %c0_75 = arith.constant 0 : index
    %c0_76 = arith.constant 0 : index
    %173 = vector.load %arg17[%c0_74, %c0_75, %c0_76] : memref<1x1x32xf32, #tpu.memory_space<vmem>>, vector<1x1x32xf32>
    %174 = vector.shape_cast %173 : vector<1x1x32xf32> to vector<1x32xf32>
    %175 = vector.broadcast %174 : vector<1x32xf32> to vector<136x32xf32>
    %176 = arith.addf %172, %175 : vector<136x32xf32>
    %177 = arith.addf %95, %176 : vector<136x32xf32>
    %c0_77 = arith.constant 0 : index
    %c0_78 = arith.constant 0 : index
    %178 = vector.load %arg23[%c0_77, %c0_78] : memref<136x32xf32, #tpu.memory_space<vmem>>, vector<136x32xf32>
    tpu.vector_store %arg23[%c0_77, %c0_78], %177 {strides = array<i32>} : memref<136x32xf32, #tpu.memory_space<vmem>>, vector<136x32xf32>,
    %c1_i32 = arith.constant 1 : i32
    %179 = arith.cmpi eq, %arg0, %c1_i32 : i32
    %180 = arith.extui %179 : i1 to i32
    %c0_i32_79 = arith.constant 0 : i32
    %181 = arith.cmpi ne, %180, %c0_i32_79 : i32
    scf.if %181 {
      %182 = vector.extract_strided_slice %177 {offsets = [0, 0], sizes = [2, 32], strides = [1, 1]} : vector<136x32xf32> to vector<2x32xf32>
      %c0_80 = arith.constant 0 : index
      %c0_81 = arith.constant 0 : index
      %183 = vector.load %arg18[%c0_80, %c0_81] : memref<1x32xf32, #tpu.memory_space<vmem>>, vector<1x32xf32>
      %c0_82 = arith.constant 0 : index
      %c0_83 = arith.constant 0 : index
      %184 = vector.load %arg19[%c0_82, %c0_83] : memref<1x32xf32, #tpu.memory_space<vmem>>, vector<1x32xf32>
      %cst_84 = arith.constant dense<0.000000e+00> : vector<2xf32>
      %185 = vector.multi_reduction <add>, %182, %cst_84 [1] : vector<2x32xf32> to vector<2xf32>
      %186 = vector.shape_cast %185 : vector<2xf32> to vector<2x1xf32>
      %cst_85 = arith.constant 3.200000e+01 : f32
      %187 = vector.broadcast %cst_85 : f32 to vector<2x1xf32>
      %188 = arith.divf %186, %187 : vector<2x1xf32>
      %189 = vector.broadcast %188 : vector<2x1xf32> to vector<2x32xf32>
      %190 = arith.subf %182, %189 : vector<2x32xf32>
      %191 = arith.mulf %190, %190 : vector<2x32xf32>
      %cst_86 = arith.constant dense<0.000000e+00> : vector<2xf32>
      %192 = vector.multi_reduction <add>, %191, %cst_86 [1] : vector<2x32xf32> to vector<2xf32>
      %193 = vector.shape_cast %192 : vector<2xf32> to vector<2x1xf32>
      %cst_87 = arith.constant 3.200000e+01 : f32
      %194 = vector.broadcast %cst_87 : f32 to vector<2x1xf32>
      %195 = arith.divf %193, %194 : vector<2x1xf32>
      %cst_88 = arith.constant 9.99999974E-6 : f32
      %196 = vector.broadcast %cst_88 : f32 to vector<2x1xf32>
      %197 = arith.addf %195, %196 : vector<2x1xf32>
      %198 = math.rsqrt %197 : vector<2x1xf32>
      %199 = vector.broadcast %198 : vector<2x1xf32> to vector<2x32xf32>
      %200 = arith.mulf %190, %199 : vector<2x32xf32>
      %201 = vector.broadcast %183 : vector<1x32xf32> to vector<2x32xf32>
      %202 = arith.mulf %200, %201 : vector<2x32xf32>
      %203 = vector.broadcast %184 : vector<1x32xf32> to vector<2x32xf32>
      %204 = arith.addf %202, %203 : vector<2x32xf32>
      %205 = arith.truncf %204 : vector<2x32xf32> to vector<2x32xbf16>
      %c0_89 = arith.constant 0 : index
      %c0_90 = arith.constant 0 : index
      %206 = vector.load %arg20[%c0_89, %c0_90] : memref<32x8xbf16, #tpu.memory_space<vmem>>, vector<32x8xbf16>
      %cst_91 = arith.constant dense<0.000000e+00> : vector<2x8xf32>
      %207 = tpu.matmul %205, %206, %cst_91 {dimension_numbers = #tpu.dot_dimension_numbers<[1], [0], [0], [1], [0, 0, 1, 1], [], []>} : vector<2x32xbf16>, vector<32x8xbf16>, vector<2x8xf32> -> vector<2x8xf32>
      %c0_92 = arith.constant 0 : index
      %c0_93 = arith.constant 0 : index
      %208 = vector.load %arg21[%c0_92, %c0_93] : memref<1x8xf32, #tpu.memory_space<vmem>>, vector<1x8xf32>
      %209 = vector.broadcast %208 : vector<1x8xf32> to vector<2x8xf32>
      %210 = arith.addf %207, %209 : vector<2x8xf32>
      %c0_94 = arith.constant 0 : index
      %c0_95 = arith.constant 0 : index
      %211 = vector.load %arg22[%c0_94, %c0_95] : memref<2x8xf32, #tpu.memory_space<vmem>>, vector<2x8xf32>
      tpu.vector_store %arg22[%c0_94, %c0_95], %210 {strides = array<i32>} : memref<2x8xf32, #tpu.memory_space<vmem>>, vector<2x8xf32>,
    } else {
    }
    return
  }
  func.func @transform_1(%arg0: i32) -> (i32, i32) {
    %c0_i32 = arith.constant 0 : i32
    %c0_i32_0 = arith.constant 0 : i32
    %c0_i32_1 = arith.constant 0 : i32
    return %c0_i32, %c0_i32_0 : i32, i32
  }
  func.func @transform_2(%arg0: i32) -> (i32, i32) {
    %c0_i32 = arith.constant 0 : i32
    %c0_i32_0 = arith.constant 0 : i32
    %c0_i32_1 = arith.constant 0 : i32
    return %c0_i32, %c0_i32_0 : i32, i32
  }
  func.func @transform_3(%arg0: i32) -> (i32, i32) {
    %c0_i32 = arith.constant 0 : i32
    %c0_i32_0 = arith.constant 0 : i32
    %c0_i32_1 = arith.constant 0 : i32
    return %c0_i32, %c0_i32_0 : i32, i32
  }
  func.func @transform_4(%arg0: i32) -> (i32, i32, i32) {
    %c0_i32 = arith.constant 0 : i32
    %c0_i32_0 = arith.constant 0 : i32
    %c0_i32_1 = arith.constant 0 : i32
    %c0_i32_2 = arith.constant 0 : i32
    return %c0_i32, %c0_i32_0, %c0_i32_1 : i32, i32, i32
  }
  func.func @transform_5(%arg0: i32) -> (i32, i32, i32) {
    %c0_i32 = arith.constant 0 : i32
    %c0_i32_0 = arith.constant 0 : i32
    %c0_i32_1 = arith.constant 0 : i32
    return %arg0, %c0_i32, %c0_i32_0 : i32, i32, i32
  }
  func.func @transform_6(%arg0: i32) -> (i32, i32, i32) {
    %c0_i32 = arith.constant 0 : i32
    %c0_i32_0 = arith.constant 0 : i32
    %c0_i32_1 = arith.constant 0 : i32
    return %arg0, %c0_i32, %c0_i32_0 : i32, i32, i32
  }
  func.func @transform_7(%arg0: i32) -> (i32, i32, i32) {
    %c0_i32 = arith.constant 0 : i32
    %c0_i32_0 = arith.constant 0 : i32
    %c0_i32_1 = arith.constant 0 : i32
    return %arg0, %c0_i32, %c0_i32_0 : i32, i32, i32
  }
  func.func @transform_8(%arg0: i32) -> (i32, i32, i32) {
    %c0_i32 = arith.constant 0 : i32
    %c0_i32_0 = arith.constant 0 : i32
    %c0_i32_1 = arith.constant 0 : i32
    return %arg0, %c0_i32, %c0_i32_0 : i32, i32, i32
  }
  func.func @transform_9(%arg0: i32) -> (i32, i32, i32) {
    %c0_i32 = arith.constant 0 : i32
    %c0_i32_0 = arith.constant 0 : i32
    %c0_i32_1 = arith.constant 0 : i32
    return %arg0, %c0_i32, %c0_i32_0 : i32, i32, i32
  }
  func.func @transform_10(%arg0: i32) -> (i32, i32, i32) {
    %c0_i32 = arith.constant 0 : i32
    %c0_i32_0 = arith.constant 0 : i32
    %c0_i32_1 = arith.constant 0 : i32
    return %arg0, %c0_i32, %c0_i32_0 : i32, i32, i32
  }
  func.func @transform_11(%arg0: i32) -> (i32, i32, i32) {
    %c0_i32 = arith.constant 0 : i32
    %c0_i32_0 = arith.constant 0 : i32
    %c0_i32_1 = arith.constant 0 : i32
    return %arg0, %c0_i32, %c0_i32_0 : i32, i32, i32
  }
  func.func @transform_12(%arg0: i32) -> (i32, i32, i32) {
    %c0_i32 = arith.constant 0 : i32
    %c0_i32_0 = arith.constant 0 : i32
    %c0_i32_1 = arith.constant 0 : i32
    return %arg0, %c0_i32, %c0_i32_0 : i32, i32, i32
  }
  func.func @transform_13(%arg0: i32) -> (i32, i32, i32) {
    %c0_i32 = arith.constant 0 : i32
    %c0_i32_0 = arith.constant 0 : i32
    %c0_i32_1 = arith.constant 0 : i32
    return %arg0, %c0_i32, %c0_i32_0 : i32, i32, i32
  }
  func.func @transform_14(%arg0: i32) -> (i32, i32, i32) {
    %c0_i32 = arith.constant 0 : i32
    %c0_i32_0 = arith.constant 0 : i32
    %c0_i32_1 = arith.constant 0 : i32
    return %arg0, %c0_i32, %c0_i32_0 : i32, i32, i32
  }
  func.func @transform_15(%arg0: i32) -> (i32, i32, i32) {
    %c0_i32 = arith.constant 0 : i32
    %c0_i32_0 = arith.constant 0 : i32
    %c0_i32_1 = arith.constant 0 : i32
    return %arg0, %c0_i32, %c0_i32_0 : i32, i32, i32
  }
  func.func @transform_16(%arg0: i32) -> (i32, i32, i32) {
    %c0_i32 = arith.constant 0 : i32
    %c0_i32_0 = arith.constant 0 : i32
    %c0_i32_1 = arith.constant 0 : i32
    return %arg0, %c0_i32, %c0_i32_0 : i32, i32, i32
  }
  func.func @transform_17(%arg0: i32) -> (i32, i32) {
    %c0_i32 = arith.constant 0 : i32
    %c0_i32_0 = arith.constant 0 : i32
    %c0_i32_1 = arith.constant 0 : i32
    return %c0_i32, %c0_i32_0 : i32, i32
  }
  func.func @transform_18(%arg0: i32) -> (i32, i32) {
    %c0_i32 = arith.constant 0 : i32
    %c0_i32_0 = arith.constant 0 : i32
    %c0_i32_1 = arith.constant 0 : i32
    return %c0_i32, %c0_i32_0 : i32, i32
  }
  func.func @transform_19(%arg0: i32) -> (i32, i32) {
    %c0_i32 = arith.constant 0 : i32
    %c0_i32_0 = arith.constant 0 : i32
    %c0_i32_1 = arith.constant 0 : i32
    return %c0_i32, %c0_i32_0 : i32, i32
  }
  func.func @transform_20(%arg0: i32) -> (i32, i32) {
    %c0_i32 = arith.constant 0 : i32
    %c0_i32_0 = arith.constant 0 : i32
    %c0_i32_1 = arith.constant 0 : i32
    return %c0_i32, %c0_i32_0 : i32, i32
  }
  func.func @transform_21(%arg0: i32) -> (i32, i32) {
    %c0_i32 = arith.constant 0 : i32
    %c0_i32_0 = arith.constant 0 : i32
    %c0_i32_1 = arith.constant 0 : i32
    return %c0_i32, %c0_i32_0 : i32, i32
  }
}

</mosaic_0001>

<bundles_post_ra>
// kernel: tpu_custom_call.1
= control target key start
LH: loop header
LB: loop body
LE: loop exit
PB: predicated region body
PF: predicated region fallthrough
CT: control target
= control target key end

     0   :  { %s9095_s0 = inlined_call_operand.vmem [shape: bf16[128,48], index: 0, kind: input, shape index: {}]   ;;  %s9096_s1 = inlined_call_operand.vmem [shape: bf16[48,32], index: 1, kind: input, shape index: {}]   ;;  %s9097_s2 = inlined_call_operand.vmem [shape: f32[1,32], index: 2, kind: input, shape index: {}]   ;;  %s9098_s3 = inlined_call_operand.hbm [shape: f32[1,32], index: 3, kind: input, shape index: {}]   ;;  %s9099_s4 = inlined_call_operand.hbm [shape: f32[16,1,32], index: 4, kind: input, shape index: {}]   ;;  %s9100_s5 = inlined_call_operand.vmem [shape: f32[2,1,32], index: 5, kind: input, shape index: {}]   ;;  %s9101_s6 = inlined_call_operand.vmem [shape: f32[2,1,32], index: 6, kind: input, shape index: {}]   ;;  %s9102_s7 = inlined_call_operand.vmem [shape: bf16[2,32,96], index: 7, kind: input, shape index: {}]   ;;  %s9103_s8 = inlined_call_operand.vmem [shape: f32[2,1,96], index: 8, kind: input, shape index: {}]   ;;  %s9104_s9 = inlined_call_operand.vmem [shape: bf16[2,32,32], index: 9, kind: input, shape index: {}]   ;;  %s9105_s10 = inlined_call_operand.vmem [shape: f32[2,1,32], index: 10, kind: input, shape index: {}]   ;;  %s9106_s11 = inlined_call_operand.vmem [shape: f32[2,1,32], index: 11, kind: input, shape index: {}]   ;;  %s9107_s12 = inlined_call_operand.vmem [shape: f32[2,1,32], index: 12, kind: input, shape index: {}]   ;;  %s9108_s13 = inlined_call_operand.vmem [shape: bf16[2,32,32], index: 13, kind: input, shape index: {}]   ;;  %s9109_s14 = inlined_call_operand.vmem [shape: f32[2,1,32], index: 14, kind: input, shape index: {}]   ;;  %s9110_s15 = inlined_call_operand.hbm [shape: bf16[2,32,32], index: 15, kind: input, shape index: {}]   ;;  %s9111_s16 = inlined_call_operand.vmem [shape: f32[2,1,32], index: 16, kind: input, shape index: {}]   ;;  %s9112_s17 = inlined_call_operand.vmem [shape: f32[1,32], index: 17, kind: input, shape index: {}]   ;;  %s9113_s18 = inlined_call_operand.vmem [shape: f32[1,32], index: 18, kind: input, shape index: {}]   ;;  %s9114_s19 = inlined_call_operand.vmem [shape: bf16[32,8], index: 19, kind: input, shape index: {}]   ;;  %s9115_s20 = inlined_call_operand.vmem [shape: f32[1,8], index: 20, kind: input, shape index: {}]   ;;  %s9116_s21 = inlined_call_operand.hbm [shape: f32[2,8], index: 21, kind: output, shape index: {}]  }
   0x1   :  { %9122 = sst [smem:[#allocation20_spill]] %s9095_s0 }
   0x2   :  { %9123 = sst [smem:[#allocation21_spill]] %s9096_s1 }
   0x3   :  { %9124 = sst [smem:[#allocation22_spill]] %s9097_s2 }
   0x4   :  { %9125 = sst [smem:[#allocation23_spill]] %s9098_s3 }
   0x5   :  { %9126 = sst [smem:[#allocation24_spill]] %s9099_s4 }
   0x6   :  { %9127 = sst [smem:[#allocation25_spill]] %s9100_s5 }
   0x7   :  { %9128 = sst [smem:[#allocation26_spill]] %s9102_s7 }
   0x8   :  { %9129 = sst [smem:[#allocation27_spill]] %s9104_s9 }
   0x9   :  { %9130 = sst [smem:[#allocation28_spill]] %s9107_s12 }
   0xa   :  { %9131 = sst [smem:[#allocation29_spill]] %s9108_s13 }
   0xb   :  { %9132 = sst [smem:[#allocation30_spill]] %s9109_s14 }
   0xc   :  { %9133 = sst [smem:[#allocation31_spill]] %s9111_s16 }
   0xd   :  { %9134 = sst [smem:[#allocation32_spill]] %s9112_s17 }
   0xe   :  { %9135 = sst [smem:[#allocation33_spill]] %s9113_s18 }
   0xf   :  { %9136 = sst [smem:[#allocation34_spill]] %s9114_s19 }
  0x10   :  { %9137 = sst [smem:[#allocation35_spill]] %s9115_s20 }
  0x11   :  { %9138 = sst [smem:[#allocation36_spill]] %s9116_s21 }
  0x12   :  { %26 = vsyncpa [#allocation4], 0 }
  0x13   :  { %27 = vsyncpa [#allocation7], 0 }
  0x14   :  { %28 = vsyncpa [#allocation5], 0  ;;  %s6461_s2 = smov 0   ;;  %s6463_s25 = smov 0  }
  0x15   :  { %s6465_s26 = smov 0   ;;  %s6467_s27 = smov 0  }
  0x16 LB: > { %s6480_s3 = sadd.s32 4294967295, %s6333_s27   ;;  %s6483_s28 = sadd.s32 1, %s6333_s27   ;;  %s6333_s27 = sphi %s6467_s27, %s9202_s27   ;;  %s6329_s26 = sphi %s6465_s26, %s9206_s26   ;;  %s6325_s25 = sphi %s6463_s25, %s9205_s25   ;;  %s6321_s2 = sphi %s6461_s2, %s9204_s2  }
  0x17   : > { %9139 = sst [smem:[#allocation18_spill]] %s6483_s28  ;;  %s382_s29 = ssub.s32 %s6333_s27, %s6483_s28 }
  0x18   : > { %s385_s0 = sadd.s32 1, %s6329_s26  ;;  %p383_p0 = scmp.eq.s32.totalorder %s382_s29, 0 }
  0x19   : > { %p392_p1 = scmp.ne.s32.totalorder %s6329_s26, %s6325_s25  ;;  %p393_p2 = scmp.eq.s32.totalorder %s6333_s27, 0 }
  0x1a   : > { %p398_p3 = scmp.ne.s32.totalorder %s6325_s25, %s6321_s2  ;;  %p399_p5 = scmp.eq.s32.totalorder %s6480_s3, 0 }
  0x1b   : > { %s6493_s4 = scalar_select %p383_p0, %s6329_s26, %s385_s0  }
  0x1c   : > { %p6495_p4 = por %p393_p2, %p392_p1  ;;  %p5462_p6 = scmp.ge.s32.totalorder %s6333_s27, 1 }
  0x1d   : > { %9140 = sst [smem:[#allocation19_spill]] %s6493_s4  ;;  %p540_p7 = scmp.lt.s32.totalorder %s6333_s27, 3 }
  0x1e   : > { %p6504_p8 = por %p399_p5, %p398_p3  ;;  %p5463_p9 = scmp.ne.s32.totalorder %s6480_s3, 0 }
  0x1f   : > { %p6509_p10 = pnand %p5462_p6, %p540_p7  ;;  %s9144_s24 = sld [smem:[#allocation23_spill]] }
  0x20   : > { %s6335_s29 = smov [#allocation3]   ;;  %p5749_p13 = scmp.lt.s32.totalorder %s6333_s27, 2 }
  0x21   : > { %p5736_p11 = pneg %p6509_p10  ;;  %s560_s0 = sshll.u32 %s6335_s29, 4  ;;  %s561_s0 = int_to_ptr.vmem [resolvable:$true] %s560_s0 }
  0x22   : > { %s9145_s21 = sld [smem:[#allocation24_spill]]  ;;  %p6526_p0 = pnand %p5749_p13, %p6495_p4 }
  0x23   : > { %p5737_p12 = pnand %p5736_p11, %p399_p5  ;;  %s6336_s1 = smov [#allocation6]  }
  0x24   : > { %s6337_s29 = smov 16   ;;  %s6338_s18 = smov 1  }
  0x25   : > { %s558_s2 = sshll.u32 %s9144_s24, 4  ;;  %s571_s24 = sshll.u32 %s6336_s1, 4  ;;  %s559_s2 = int_to_ptr.hbm [resolvable:$true] %s558_s2  ;;  %s572_s24 = int_to_ptr.vmem [resolvable:$true] %s571_s24 }
  0x26   : > { %5739 = dma.hbm_to_vmem [thread:$0]  (!%p5737_p12), %s559_s2, 16, %s561_s0, [#allocation4]  }
  0x27   : > { %s663_s17 = sand.u32 1, %s6333_s27   ;;  %s665_s19 = sand.u32 1, %s6329_s26  }
  0x28   : > { %s569_s20 = sshll.u32 %s9145_s21, 4  ;;  %s5466_s16 = sshll.u32 %s665_s19, 4  ;;  %s570_s20 = int_to_ptr.hbm [resolvable:$true] %s569_s20 }
  0x29   : > { %5742 = dma.hbm_to_vmem [thread:$0]  (!%p5737_p12), %s570_s20, 256, %s572_s24, [#allocation7], %s6337_s29, %s6337_s29, %s6338_s18  }
  0x2a   : > { %s5682_s14 = sshll.u32 %s6333_s27, 4  ;;  %s667_s30 = scalar_lea.vmem [#allocation8], %s5466_s16 }
  0x2b   : > { %s672_s4 = scalar_lea.hbm %s9110_s15, %s5682_s14  ;;  %s675_s13 = sshll.u32 %s667_s30, 4  ;;  %s676_s13 = int_to_ptr.vmem [resolvable:$true] %s675_s13 }
  0x2c   : > { %s673_s12 = sshll.u32 %s672_s4, 4  ;;  %s664_s2 = scalar_lea.sflag [#allocation4], %s663_s17  ;;  %s674_s12 = int_to_ptr.hbm [resolvable:$true] %s673_s12 }
  0x2d   : > { %s6227_s0 = sshra.s32 %s674_s12, 4  ;;  %p6231_p2 = pneg %p6526_p0  ;;  %s6228_s0 = int_to_ptr.hbm [resolvable:$true] %s6227_s0 }
  0x2e   : > { %s6229_s1 = scalar_lea.hbm %s6228_s0, 16  ;;  %s6234_s20 = scalar_lea.hbm %s9110_s15, 32 }
  0x2f   : > { %p6230_p1 = scmp.ne.s32.totalorder %s6228_s0, %s6229_s1  ;;  %p6235_p6 = scmp.lt.s32.totalorder %s6228_s0, %s9110_s15 }
  0x30   : > { %p6236_p7 = scmp.lt.s32.totalorder %s6234_s20, %s6229_s1 }
  0x31   : > { %p6232_p3 = pnand %p6231_p2, %p6230_p1 }
  0x32   : > { %p6237_p11 = por %p6236_p7, %p6235_p6 }
  0x33   : > { %p6233_p4 = pneg %p6232_p3 }
  0x35   : > { %p6238_p12 = pnand %p6237_p11, %p6233_p4 }
  0x37   : > { %6241 = shalt.err (!%p6238_p12)
}
  0x38   : > { %s6339_s16 = smov 64   ;;  %s6340_s17 = smov 4  }
  0x39   : > { %5746 = dma.hbm_to_vmem [thread:$0]  (!%p6526_p0), %s674_s12, 256, %s676_s13, %s664_s2, %s6339_s16, %s6339_s16, %s6340_s17  }
  0x3a   : > { %693 = sbr.rel (%p6509_p10) target bundleno = 3573 (0xdf5), region = 100 }
  0x3f   : > { %6302 = dma.done.wait (%p399_p5), [#allocation4], 16  }
  0x40   : > { %6304 = vsyncadd (%p399_p5), [#allocation4], 4294967280 }
  0x41   : > { %6306 = dma.done.wait (%p399_p5), [#allocation7], 256  }
  0x42   : > { %6308 = vsyncadd (%p399_p5), [#allocation7], 4294967040  ;;  %s705_s23 = sand.u32 1, %s6480_s3   ;;  %s707_s12 = sand.u32 1, %s6325_s25  }
  0x43   : > { %s6558_s13 = sshll.u32 %s707_s12, 4  ;;  %s706_s22 = scalar_lea.sflag [#allocation4], %s705_s23 }
  0x44   : > { %6310 = dma.done.wait (%p6504_p8), %s706_s22, 256  }
  0x45   : > { %6312 = vsyncadd (%p6504_p8), %s706_s22, 4294967040  ;;  %p801_p10 = scmp.lt.s32.totalorder %s6480_s3, 1  ;;  %s9148_s7 = sld [smem:[#allocation26_spill]] }
  0x46   : > { %s9149_s9 = sld [smem:[#allocation27_spill]] }
  0x47   : > { %s6567_s29 = scalar_select %p801_p10, %s6480_s3, 1 }
  0x48   : > { %s9150_s24 = sld [smem:[#allocation28_spill]] }
  0x49   : > { %s5683_s1 = sshll.u32 %s6567_s29, 4  ;;  %s6600_s2 = scalar_lea.vmem %s9106_s11, %s6567_s29 }
  0x4a   : > { %s9151_s0 = sld [smem:[#allocation29_spill]] }
  0x4b   : > { %s6585_s16 = scalar_lea.vmem %s9148_s7, %s5683_s1  ;;  %s9152_s7 = sld [smem:[#allocation30_spill]] }
  0x4c   : > { %s6590_s12 = scalar_lea.vmem %s9149_s9, %s5683_s1  ;;  %s9153_s4 = sld [smem:[#allocation31_spill]] }
  0x4e   : > { %s6606_s27 = scalar_lea.vmem %s9150_s24, %s6567_s29  ;;  %844 = sbr.rel (%p5463_p9) target bundleno = 281 (0x119), region = 116 }
  0x50   : > { %s6611_s17 = scalar_lea.vmem %s9151_s0, %s5683_s1 }
  0x51   : > { %s6617_s22 = scalar_lea.vmem %s9152_s7, %s6567_s29 }
  0x52   : > { %s839_s5 = scalar_lea.vmem %s9153_s4, %s6567_s29 }
  0x53   : > { %s9154_s19 = sld [smem:[#allocation20_spill]] }
  0x59   : > { %v855_v0 = vld [vmem:[%s9154_s19] sm:$0xff]  ;;  %v857_v1 = vld [vmem:[%s9154_s19 + $0x8] sm:$0xff]  ;;  %v859_v2 = vld [vmem:[%s9154_s19 + $0x10] sm:$0xff] }
  0x5a   : > { %856 = vst [vmem:[#allocation10 + $0x30] sm:$0xff] %v855_v0  ;;  %v861_v3 = vld [vmem:[%s9154_s19 + $0x18] sm:$0xff]  ;;  %v863_v4 = vld [vmem:[%s9154_s19 + $0x20] sm:$0xff]  ;;  %v865_v5 = vld [vmem:[%s9154_s19 + $0x28] sm:$0xff] }
  0x5b   : > { %858 = vst [vmem:[#allocation10] sm:$0xff] %v857_v1  ;;  %v867_v6 = vld [vmem:[%s9154_s19 + $0x30] sm:$0xff]  ;;  %v869_v7 = vld [vmem:[%s9154_s19 + $0x38] sm:$0xff] }
  0x5c   : > { %860 = vst [vmem:[#allocation10 + $0x18] sm:$0xff] %v859_v2 }
  0x5d   : > { %862 = vst [vmem:[#allocation10 + $0x10] sm:$0xff] %v861_v3 }
  0x5e   : > { %864 = vst [vmem:[#allocation10 + $0x8] sm:$0xff] %v863_v4 }
  0x5f   : > { %866 = vst [vmem:[#allocation10 + $0x20] sm:$0xff] %v865_v5 }
  0x60   : > { %868 = vst [vmem:[#allocation10 + $0x28] sm:$0xff] %v867_v6 }
  0x61   : > { %870 = vst [vmem:[#allocation10 + $0x38] sm:$0xff] %v869_v7 }
  0x62   : > { %876 = vsyncadd [#allocation11], 1024 }
  0x63   : > { %6313 = dma.done.wait [#allocation11], 1024 }
  0x64   : > { %6314 = vsyncadd [#allocation11], 4294966272  ;;  %s9155_s1 = sld [smem:[#allocation21_spill]]  ;;  %v5686_v11 = vld [vmem:[#allocation10 + $0x30] sm:$0xff]  ;;  %v5688_v12 = vld [vmem:[#allocation10 + $0x18] sm:$0xff]  ;;  %vm965_vm0 = vcmask 392192  }
  0x65   : > { %v5690_v13 = vld [vmem:[#allocation10 + $0x8] sm:$0xff]  ;;  %v5687_v15 = vld [vmem:[#allocation10] sm:$0xff]  ;;  %v5689_v16 = vld [vmem:[#allocation10 + $0x10] sm:$0xff]  ;;  %vm1107_vm1 = vcmask 261120   ;;  %s9156_s9 = sld [smem:[#allocation22_spill]] }
  0x66   : > { %v5691_v17 = vld [vmem:[#allocation10 + $0x20] sm:$0xff]  ;;  %v5804_v19 = vld [vmem:[#allocation3] ss:$0 sm:$0xff]  ;;  %v5803_v21 = vld [vmem:[#allocation6] ss:$0 sm:$0xff] }
  0x67   : > { %v5692_v14 = vld [vmem:[#allocation10 + $0x28] sm:$0xff]  ;;  %1108 = vst.msk [vmem:[#allocation2] sm:$0xff] %vm1107_vm1, %v5804_v19  ;;  %v5805_v22 = vld [vmem:[#allocation6 + $0x4] ss:$0 sm:$0xff]  ;;  %v5806_v29 = vld [vmem:[#allocation6 + $0x8] ss:$0 sm:$0xff] }
  0x68   : > { %v5693_v18 = vld [vmem:[#allocation10 + $0x38] sm:$0xff]  ;;  %v5808_v33 = vld [vmem:[#allocation6 + $0x1] ss:$0 sm:$0xff]  ;;  %v5809_v34 = vld [vmem:[#allocation6 + $0x5] ss:$0 sm:$0xff] }
  0x69   : > { %v5807_v30 = vld [vmem:[#allocation6 + $0xc] ss:$0 sm:$0xff]  ;;  %v5810_v45 = vld [vmem:[#allocation6 + $0x9] ss:$0 sm:$0xff]  ;;  %v5811_v46 = vld [vmem:[#allocation6 + $0xd] ss:$0 sm:$0xff] }
  0x6a   : > { %v5696_v8 = vld [vmem:[%s9155_s1 + $0x10] sm:$0xff]  ;;  %v5695_v9 = vld [vmem:[%s9155_s1 + $0x8] sm:$0xff]  ;;  %v5694_v10 = vld [vmem:[%s9155_s1] sm:$0xff] }
  0x6b   : > { %995 = vmatpush.bf16.msra.mxu0 %v5696_v8  ;;  %5707 = vmatpush.bf16.msra.mxu1 %v5696_v8  ;;  %v6670_v20 = vld [vmem:[%s9156_s9] ss:$0 sm:$0xff]  ;;  %v5812_v49 = vld [vmem:[#allocation6 + $0x2] ss:$0 sm:$0xff]  ;;  %v5813_v50 = vld [vmem:[#allocation6 + $0x6] ss:$0 sm:$0xff] }
  0x6c   : > { %5708 = vmatpush.bf16.msra.mxu2 %v5696_v8  ;;  %5709 = vmatpush.bf16.msra.mxu3 %v5696_v8  ;;  %v5814_v61 = vld [vmem:[#allocation6 + $0xa] ss:$0 sm:$0xff]  ;;  %v5815_v62 = vld [vmem:[#allocation6 + $0xe] ss:$0 sm:$0xff]  ;;  %v5816_v1 = vld [vmem:[#allocation6 + $0x3] ss:$0 sm:$0xff] }
  0x6d   : > { %v5817_v2 = vld [vmem:[#allocation6 + $0x7] ss:$0 sm:$0xff] }
  0x6f   : > { %996 = vmatpush.bf16.msra.mxu0 %v5695_v9  ;;  %5710 = vmatpush.bf16.msra.mxu1 %v5695_v9 }
  0x70   : > { %5711 = vmatpush.bf16.msra.mxu2 %v5695_v9  ;;  %5712 = vmatpush.bf16.msra.mxu3 %v5695_v9 }
  0x73   : > { %997 = vmatpush.bf16.msra.mxu0 %v5694_v10  ;;  %5713 = vmatpush.bf16.msra.mxu1 %v5694_v10 }
  0x74   : > { %5714 = vmatpush.bf16.msra.mxu2 %v5694_v10  ;;  %5715 = vmatpush.bf16.msra.mxu3 %v5694_v10 }
  0x76   : > { %5524 = vmatmul.msk.bf16.vlgmr.msra.gmra.mxu0 %vm965_vm0, %v5686_v11  ;;  %5526 = vmatmul.msk.bf16.vlgmr.msra.gmra.mxu1 %vm965_vm0, %v5688_v12 }
  0x77   : > { %5528 = vmatmul.msk.bf16.vlgmr.msra.gmra.mxu2 %vm965_vm0, %v5690_v13  ;;  %5530 = vmatmul.msk.bf16.vlgmr.msra.gmra.mxu3 %vm965_vm0, %v5692_v14  ;;  %v5818_v13 = vld [vmem:[#allocation6 + $0xb] ss:$0 sm:$0xff]  ;;  %v5819_v14 = vld [vmem:[#allocation6 + $0xf] ss:$0 sm:$0xff] }
  0x86   : > { %5525 = vmatmul.msk.bf16.gmra.mxu0 %vm965_vm0, %v5687_v15  ;;  %5527 = vmatmul.msk.bf16.gmra.mxu1 %vm965_vm0, %v5689_v16 }
  0x87   : > { %5529 = vmatmul.msk.bf16.gmra.mxu2 %vm965_vm0, %v5691_v17  ;;  %5531 = vmatmul.msk.bf16.gmra.mxu3 %vm965_vm0, %v5693_v18 }
  0xf3   : > { %v999_v23 = vpop.f32.mrf.mxu0  ;;  %v1009_v24 = vpop.f32.mrf.mxu1 }
  0xf4   : > { %v1000_v25 = vadd.f32 %v6670_v20, %v999_v23  ;;  %v1010_v26 = vadd.f32 %v6670_v20, %v1009_v24 }
  0xf6   : > { %v1109_v27 = vadd.f32 %v5803_v21, %v1000_v25  ;;  %v1113_v28 = vadd.f32 %v5805_v22, %v1010_v26 }
  0xf8   : > { %1125 = vst.msk [vmem:[#allocation2 + $0x8] sm:$0xff] %vm1107_vm1, %v1109_v27 }
  0xf9   : > { %1129 = vst.msk [vmem:[#allocation2 + $0x28] sm:$0xff] %vm1107_vm1, %v1113_v28 }
  0xfa   : > { %v1019_v31 = vpop.f32.mrf.mxu2  ;;  %v1029_v32 = vpop.f32.mrf.mxu3 }
  0xfb   : > { %v1020_v35 = vadd.f32 %v6670_v20, %v1019_v31  ;;  %v1030_v36 = vadd.f32 %v6670_v20, %v1029_v32  ;;  %v1001_v37 = vpop.f32.mrf.mxu0  ;;  %v1011_v38 = vpop.f32.mrf.mxu1 }
  0xfc   : > { %v1002_v39 = vadd.f32 %v6670_v20, %v1001_v37  ;;  %v1012_v40 = vadd.f32 %v6670_v20, %v1011_v38 }
  0xfd   : > { %v1117_v41 = vadd.f32 %v5806_v29, %v1020_v35  ;;  %v1121_v42 = vadd.f32 %v5807_v30, %v1030_v36 }
  0xfe   : > { %v1110_v43 = vadd.f32 %v5808_v33, %v1002_v39  ;;  %v1114_v44 = vadd.f32 %v5809_v34, %v1012_v40 }
  0xff   : > { %1133 = vst.msk [vmem:[#allocation2 + $0x48] sm:$0xff] %vm1107_vm1, %v1117_v41 }
 0x100   : > { %1137 = vst.msk [vmem:[#allocation2 + $0x68] sm:$0xff] %vm1107_vm1, %v1121_v42 }
 0x101   : > { %1126 = vst.msk [vmem:[#allocation2 + $0x10] sm:$0xff] %vm1107_vm1, %v1110_v43 }
 0x102   : > { %1130 = vst.msk [vmem:[#allocation2 + $0x30] sm:$0xff] %vm1107_vm1, %v1114_v44  ;;  %v1021_v47 = vpop.f32.mrf.mxu2  ;;  %v1031_v48 = vpop.f32.mrf.mxu3 }
 0x103   : > { %v1022_v51 = vadd.f32 %v6670_v20, %v1021_v47  ;;  %v1032_v52 = vadd.f32 %v6670_v20, %v1031_v48  ;;  %v1004_v53 = vpop.f32.mrf.mxu0  ;;  %v1014_v54 = vpop.f32.mrf.mxu1 }
 0x104   : > { %v1005_v55 = vadd.f32 %v6670_v20, %v1004_v53  ;;  %v1015_v56 = vadd.f32 %v6670_v20, %v1014_v54 }
 0x105   : > { %v1118_v57 = vadd.f32 %v5810_v45, %v1022_v51  ;;  %v1122_v58 = vadd.f32 %v5811_v46, %v1032_v52 }
 0x106   : > { %v1111_v59 = vadd.f32 %v5812_v49, %v1005_v55  ;;  %v1115_v60 = vadd.f32 %v5813_v50, %v1015_v56 }
 0x107   : > { %1134 = vst.msk [vmem:[#allocation2 + $0x50] sm:$0xff] %vm1107_vm1, %v1118_v57 }
 0x108   : > { %1138 = vst.msk [vmem:[#allocation2 + $0x70] sm:$0xff] %vm1107_vm1, %v1122_v58 }
 0x109   : > { %1127 = vst.msk [vmem:[#allocation2 + $0x18] sm:$0xff] %vm1107_vm1, %v1111_v59 }
 0x10a   : > { %1131 = vst.msk [vmem:[#allocation2 + $0x38] sm:$0xff] %vm1107_vm1, %v1115_v60  ;;  %v1024_v63 = vpop.f32.mrf.mxu2  ;;  %v1034_v0 = vpop.f32.mrf.mxu3 }
 0x10b   : > { %v1025_v3 = vadd.f32 %v6670_v20, %v1024_v63  ;;  %v1035_v4 = vadd.f32 %v6670_v20, %v1034_v0  ;;  %v1006_v5 = vpop.f32.mrf.mxu0  ;;  %v1016_v6 = vpop.f32.mrf.mxu1 }
 0x10c   : > { %v1007_v7 = vadd.f32 %v6670_v20, %v1006_v5  ;;  %v1017_v8 = vadd.f32 %v6670_v20, %v1016_v6 }
 0x10d   : > { %v1119_v9 = vadd.f32 %v5814_v61, %v1025_v3  ;;  %v1123_v10 = vadd.f32 %v5815_v62, %v1035_v4 }
 0x10e   : > { %v1112_v11 = vadd.f32 %v5816_v1, %v1007_v7  ;;  %v1116_v12 = vadd.f32 %v5817_v2, %v1017_v8 }
 0x10f   : > { %1135 = vst.msk [vmem:[#allocation2 + $0x58] sm:$0xff] %vm1107_vm1, %v1119_v9 }
 0x110   : > { %1139 = vst.msk [vmem:[#allocation2 + $0x78] sm:$0xff] %vm1107_vm1, %v1123_v10 }
 0x111   : > { %1128 = vst.msk [vmem:[#allocation2 + $0x20] sm:$0xff] %vm1107_vm1, %v1112_v11 }
 0x112   : > { %1132 = vst.msk [vmem:[#allocation2 + $0x40] sm:$0xff] %vm1107_vm1, %v1116_v12  ;;  %v1026_v15 = vpop.f32.mrf.mxu2  ;;  %v1036_v16 = vpop.f32.mrf.mxu3 }
 0x113   : > { %v1027_v17 = vadd.f32 %v6670_v20, %v1026_v15  ;;  %v1037_v18 = vadd.f32 %v6670_v20, %v1036_v16 }
 0x115   : > { %v1120_v19 = vadd.f32 %v5818_v13, %v1027_v17  ;;  %v1124_v21 = vadd.f32 %v5819_v14, %v1037_v18 }
 0x117   : > { %1136 = vst.msk [vmem:[#allocation2 + $0x60] sm:$0xff] %vm1107_vm1, %v1120_v19 }
 0x118   : > { %1140 = vst.msk [vmem:[#allocation2 + $0x80] sm:$0xff] %vm1107_vm1, %v1124_v21 }
 0x119 PF: > { %v1143_v22 = vld [vmem:[#allocation2 + $0x10] sm:$0xff]  ;;  %vm1160_vm2 = vcmask 261120   ;;  %v1141_v23 = vld [vmem:[#allocation2] sm:$0xff]  ;;  %v1144_v27 = vld [vmem:[#allocation2 + $0x18] sm:$0xff]  ;;  %v6341_v35 = vmov 32.0   ;;  %s9161_s18 = sld [smem:[#allocation25_spill]]  ;;  %s9163_s7 = scalar_lea.vmem %s9101_s6, %s6567_s29 }
 0x11a   : > { %v1167_v24 = vsel %vm1160_vm2, %v1143_v22, 0.0  ;;  %v1161_v25 = vsel %vm1160_vm2, %v1141_v23, 0.0  ;;  %v1145_v26 = vld [vmem:[#allocation2 + $0x20] sm:$0xff]  ;;  %v1142_v28 = vld [vmem:[#allocation2 + $0x8] sm:$0xff]  ;;  %v1170_v30 = vsel %vm1160_vm2, %v1144_v27, 0.0  ;;  %v1147_v33 = vld [vmem:[#allocation2 + $0x30] sm:$0xff]  ;;  %5868 = vrcp.f32 %v6341_v35  ;;  %s9170_s14 = scalar_lea.vmem %s9103_s8, %s6567_s29  ;;  %s9177_s20 = scalar_lea.vmem %s9105_s10, %s6567_s29 }
 0x11b   : > { %1168 = vadd.xlane.f32.xlu1 %v1167_v24  ;;  %1162 = vadd.xlane.f32.xlu0 %v1161_v25  ;;  %v1173_v20 = vsel %vm1160_vm2, %v1145_v26, 0.0  ;;  %v1146_v29 = vld [vmem:[#allocation2 + $0x28] sm:$0xff]  ;;  %v1164_v31 = vsel %vm1160_vm2, %v1142_v28, 0.0  ;;  %v1179_v34 = vsel %vm1160_vm2, %v1147_v33, 0.0  ;;  %v6723_v55 = vld [vmem:[#allocation2 + $0x38] sm:$0xff]  ;;  %v6744_v4 = vld [vmem:[#allocation2 + $0x40] sm:$0xff] }
 0x11c   : > { %1174 = vadd.xlane.f32.xlu2 %v1173_v20  ;;  %v1176_v32 = vsel %vm1160_vm2, %v1146_v29, 0.0  ;;  %v1182_v61 = vsel %vm1160_vm2, %v6723_v55, 0.0  ;;  %v1185_v8 = vsel %vm1160_vm2, %v6744_v4, 0.0  ;;  %v6757_v13 = vld [vmem:[#allocation2 + $0x58] sm:$0xff]  ;;  %v6759_v14 = vld [vmem:[#allocation2 + $0x48] sm:$0xff]  ;;  %v6783_v20 = vld [vmem:[#allocation2 + $0x70] sm:$0xff] }
 0x11d   : > { %v1194_v16 = vsel %vm1160_vm2, %v6757_v13, 0.0  ;;  %v1188_v18 = vsel %vm1160_vm2, %v6759_v14, 0.0  ;;  %s6342_s23 = smov 96   ;;  %s6343_s28 = smov 64  }
 0x11e   : > { %v6770_v21 = vld [vmem:[#allocation2 + $0x60] sm:$0xff]  ;;  %s6344_s9 = smov 80   ;;  %s6347_s4 = smov 48  }
 0x11f   : > { %v1197_v24 = vsel %vm1160_vm2, %v6770_v21, 0.0  ;;  %s9162_s24 = scalar_lea.vmem %s9161_s18, %s6567_s29  ;;  %s6348_s18 = smov 16  }
 0x120   : > { %v5869_v36 = vpop.eup %5868  ;;  %p5668_p5 = scmp.ne.s32.totalorder %s6480_s3, 1 }
 0x121   : > { %v1213_v37 = vmul.f32 32.0, %v5869_v36  ;;  %vm1217_vm3 = vweird.f32 %v5869_v36 }
 0x123   : > { %1171 = vadd.xlane.f32.xlu1 %v1170_v30  ;;  %1165 = vadd.xlane.f32.xlu0 %v1164_v31  ;;  %v1214_v38 = vsub.f32 1.0, %v1213_v37  ;;  %v5698_v30 = vld [vmem:[%s6585_s16 + $0x8] sm:$0xff] }
 0x124   : > { %1177 = vadd.xlane.f32.xlu2 %v1176_v32  ;;  %1644 = vmatpush.bf16.msra.mxu0 %v5698_v30 }
 0x125   : > { %v1215_v39 = vmul.f32 %v5869_v36, %v1214_v38 }
 0x127   : > { %v1216_v40 = vadd.f32 %v5869_v36, %v1215_v39 }
 0x129   : > { %v6711_v41 = vsel %vm1217_vm3, %v5869_v36, %v1216_v40 }
 0x12c   : > { %1180 = vadd.xlane.f32.xlu2 %v1179_v34 }
 0x18e   : > { %v1169_v42 = vpop.xlane.xlu1 %1168  ;;  %v1163_v43 = vpop.xlane.xlu0 %1162 }
 0x18f   : > { %v1219_v44 = vmul.f32 %v6711_v41, %v1163_v43  ;;  %v1175_v45 = vpop.xlane.xlu2 %1174  ;;  %v1221_v54 = vmul.f32 %v6711_v41, %v1169_v42 }
 0x190   : > { %v1223_v53 = vmul.f32 %v6711_v41, %v1175_v45 }
 0x191   : > { %v6714_v46 = vsub.f32 %v1141_v23, %v1219_v44  ;;  %v6737_v63 = vsub.f32 %v1143_v22, %v1221_v54  ;;  %v6772_v22 = vld [vmem:[#allocation2 + $0x50] sm:$0xff] }
 0x192   : > { %v6729_v59 = vsub.f32 %v1145_v26, %v1223_v53  ;;  %v1191_v25 = vsel %vm1160_vm2, %v6772_v22, 0.0  ;;  %v6779_v26 = vld [vmem:[#allocation2 + $0x68] sm:$0xff] }
 0x193   : > { %v1253_v47 = vmul.f32 %v6714_v46, %v6714_v46  ;;  %v1255_v5 = vmul.f32 %v6737_v63, %v6737_v63 }
 0x194   : > { %v1257_v3 = vmul.f32 %v6729_v59, %v6729_v59 }
 0x195   : > { %v1270_v48 = vsel %vm1160_vm2, %v1253_v47, 0.0  ;;  %v1276_v9 = vsel %vm1160_vm2, %v1255_v5, 0.0 }
 0x196   : > { %v1172_v49 = vpop.xlane.xlu1 %1171  ;;  %1271 = vadd.xlane.f32.xlu0 %v1270_v48  ;;  %v1166_v50 = vpop.xlane.xlu0 %1165  ;;  %v1282_v7 = vsel %vm1160_vm2, %v1257_v3, 0.0 }
 0x197   : > { %v1222_v51 = vmul.f32 %v6711_v41, %v1172_v49  ;;  %v1220_v52 = vmul.f32 %v6711_v41, %v1166_v50  ;;  %v1178_v58 = vpop.xlane.xlu2 %1177 }
 0x198   : > { %v1224_v2 = vmul.f32 %v6711_v41, %v1178_v58 }
 0x199   : > { %v6725_v56 = vsub.f32 %v1144_v27, %v1222_v51  ;;  %v6727_v57 = vsub.f32 %v1142_v28, %v1220_v52  ;;  %v1200_v27 = vsel %vm1160_vm2, %v6779_v26, 0.0  ;;  %v1203_v28 = vsel %vm1160_vm2, %v6783_v20, 0.0 }
 0x19a   : > { %v6748_v6 = vsub.f32 %v1146_v29, %v1224_v2 }
 0x19b   : > { %v1256_v60 = vmul.f32 %v6725_v56, %v6725_v56  ;;  %v1254_v62 = vmul.f32 %v6727_v57, %v6727_v57 }
 0x19c   : > { %v1258_v12 = vmul.f32 %v6748_v6, %v6748_v6 }
 0x19d   : > { %v1279_v0 = vsel %vm1160_vm2, %v1256_v60, 0.0  ;;  %v1273_v1 = vsel %vm1160_vm2, %v1254_v62, 0.0 }
 0x19e   : > { %1280 = vadd.xlane.f32.xlu2 %v1279_v0  ;;  %1183 = vadd.xlane.f32.xlu0 %v1182_v61  ;;  %v1285_v17 = vsel %vm1160_vm2, %v1258_v12, 0.0 }
 0x19f   : > { %1274 = vadd.xlane.f32.xlu1 %v1273_v1  ;;  %v1181_v10 = vpop.xlane.xlu2 %1180 }
 0x1a0   : > { %v1225_v11 = vmul.f32 %v6711_v41, %v1181_v10 }
 0x1a2   : > { %v6761_v15 = vsub.f32 %v1147_v33, %v1225_v11  ;;  %v5697_v33 = vld [vmem:[%s6585_s16] sm:$0xff]  ;;  %s6345_s16 = smov 112  }
 0x1a3   : > { %1645 = vmatpush.bf16.msra.mxu0 %v5697_v33  ;;  %v6847_v33 = vld [vmem:[#allocation2 + $0x78] sm:$0xff] }
 0x1a4   : > { %v1259_v19 = vmul.f32 %v6761_v15, %v6761_v15 }
 0x1a6   : > { %1283 = vadd.xlane.f32.xlu2 %v1282_v7  ;;  %1186 = vadd.xlane.f32.xlu0 %v1185_v8  ;;  %v1288_v23 = vsel %vm1160_vm2, %v1259_v19, 0.0 }
 0x1a7   : > { %1277 = vadd.xlane.f32.xlu1 %v1276_v9 }
 0x1ae   : > { %1195 = vadd.xlane.f32.xlu2 %v1194_v16  ;;  %1286 = vadd.xlane.f32.xlu0 %v1285_v17 }
 0x1af   : > { %1189 = vadd.xlane.f32.xlu1 %v1188_v18 }
 0x1b6   : > { %1289 = vadd.xlane.f32.xlu0 %v1288_v23  ;;  %1198 = vadd.xlane.f32.xlu2 %v1197_v24 }
 0x1b7   : > { %1192 = vadd.xlane.f32.xlu1 %v1191_v25 }
 0x1be   : > { %1201 = vadd.xlane.f32.xlu0 %v1200_v27 }
 0x1c6   : > { %1204 = vadd.xlane.f32.xlu0 %v1203_v28 }
 0x209   : > { %v1272_v29 = vpop.xlane.xlu0 %1271 }
 0x20a   : > { %v1321_v31 = vmul.f32 %v1272_v29, %v6711_v41 }
 0x20c   : > { %v1338_v32 = vadd.f32 1e-05, %v1321_v31 }
 0x20e   : > { %5870 = vrsqrt.f32 %v1338_v32  ;;  %vm1361_vm5 = vweird.f32 %v1338_v32 }
 0x211   : > { %v1281_v34 = vpop.xlane.xlu2 %1280  ;;  %v1184_v35 = vpop.xlane.xlu0 %1183 }
 0x212   : > { %v1324_v36 = vmul.f32 %v1281_v34, %v6711_v41  ;;  %v1275_v37 = vpop.xlane.xlu1 %1274  ;;  %v1226_v38 = vmul.f32 %v6711_v41, %v1184_v35 }
 0x213   : > { %v1322_v39 = vmul.f32 %v1275_v37, %v6711_v41 }
 0x214   : > { %v5871_v40 = vpop.eup %5870  ;;  %v6793_v42 = vadd.f32 1e-05, %v1324_v36  ;;  %v6796_v43 = vsub.f32 %v6723_v55, %v1226_v38  ;;  %v6858_v36 = vld [vmem:[%s9162_s24] ss:$0 sm:$0xff] }
 0x215   : > { %v1356_v44 = vmul.f32 %v5871_v40, %v1338_v32  ;;  %v1339_v45 = vadd.f32 1e-05, %v1322_v39  ;;  %vm1362_vm4 = vweird.f32 %v5871_v40 }
 0x216   : > { %5872 = vrsqrt.f32 %v6793_v42  ;;  %v1260_v47 = vmul.f32 %v6796_v43, %v6796_v43  ;;  %vm6819_vm8 = vmor %vm1361_vm5, %vm1362_vm4  ;;  %vm1391_vm12 = vweird.f32 %v6793_v42 }
 0x217   : > { %v1357_v48 = vmul.f32 %v5871_v40, %v1356_v44  ;;  %5874 = vrsqrt.f32 %v1339_v45  ;;  %vm1371_vm6 = vweird.f32 %v1339_v45 }
 0x218   : > { %v1291_v49 = vsel %vm1160_vm2, %v1260_v47, 0.0 }
 0x219   : > { %v1358_v50 = vmul.f32 0.5, %v1357_v48  ;;  %v1284_v51 = vpop.xlane.xlu2 %1283  ;;  %1292 = vadd.xlane.f32.xlu1 %v1291_v49  ;;  %v1187_v52 = vpop.xlane.xlu0 %1186 }
 0x21a   : > { %v1278_v53 = vpop.xlane.xlu1 %1277  ;;  %v1227_v54 = vmul.f32 %v6711_v41, %v1187_v52  ;;  %v1325_v0 = vmul.f32 %v1284_v51, %v6711_v41 }
 0x21b   : > { %v1359_v55 = vsub.f32 1.5, %v1358_v50  ;;  %v1323_v58 = vmul.f32 %v1278_v53, %v6711_v41  ;;  %v6881_v53 = vld [vmem:[%s9163_s7] ss:$0 sm:$0xff] }
 0x21c   : > { %v6804_v60 = vpop.eup %5872  ;;  %v6807_v61 = vsub.f32 %v6744_v4, %v1227_v54  ;;  %v6817_v4 = vadd.f32 1e-05, %v1325_v0 }
 0x21d   : > { %v5875_v62 = vpop.eup %5874  ;;  %v6810_v1 = vadd.f32 1e-05, %v1323_v58  ;;  %v1360_v3 = vmul.f32 %v5871_v40, %v1359_v55  ;;  %v1386_v5 = vmul.f32 %v6804_v60, %v6793_v42  ;;  %vm1392_vm13 = vweird.f32 %v6804_v60 }
 0x21e   : > { %v1366_v2 = vmul.f32 %v5875_v62, %v1339_v45  ;;  %v1261_v8 = vmul.f32 %v6807_v61, %v6807_v61  ;;  %vm1372_vm7 = vweird.f32 %v5875_v62  ;;  %vm6914_vm15 = vmor %vm1391_vm12, %vm1392_vm13  ;;  %vm1401_vm3 = vweird.f32 %v6817_v4 }
 0x21f   : > { %5876 = vrsqrt.f32 %v6810_v1  ;;  %v1364_v23 = vsel %vm6819_vm8, %v5871_v40, %v1360_v3  ;;  %v1387_v24 = vmul.f32 %v6804_v60, %v1386_v5  ;;  %vm6839_vm9 = vmor %vm1371_vm6, %vm1372_vm7  ;;  %vm1381_vm10 = vweird.f32 %v6810_v1 }
 0x220   : > { %v1367_v7 = vmul.f32 %v5875_v62, %v1366_v2  ;;  %v1294_v18 = vsel %vm1160_vm2, %v1261_v8, 0.0  ;;  %5878 = vrsqrt.f32 %v6817_v4  ;;  %v1525_v35 = vmul.f32 %v1364_v23, %v6714_v46 }
 0x221   : > { %v1196_v9 = vpop.xlane.xlu2 %1195  ;;  %v1287_v10 = vpop.xlane.xlu0 %1286  ;;  %1295 = vadd.xlane.f32.xlu1 %v1294_v18  ;;  %v1388_v37 = vmul.f32 0.5, %v1387_v24  ;;  %v1206_v46 = vsel %vm1160_vm2, %v6847_v33, 0.0 }
 0x222   : > { %v1368_v12 = vmul.f32 0.5, %v1367_v7  ;;  %v1230_v16 = vmul.f32 %v6711_v41, %v1196_v9  ;;  %v1190_v17 = vpop.xlane.xlu1 %1189  ;;  %v1326_v19 = vmul.f32 %v1287_v10, %v6711_v41  ;;  %v1545_v52 = vmul.f32 %v6858_v36, %v1525_v35  ;;  %v6898_v7 = vld [vmem:[#allocation2 + $0x80] sm:$0xff] }
 0x223   : > { %v1228_v25 = vmul.f32 %v6711_v41, %v1190_v17  ;;  %v1389_v55 = vsub.f32 1.5, %v1388_v37  ;;  %v1209_v18 = vsel %vm1160_vm2, %v6898_v7, 0.0 }
 0x224   : > { %v1369_v27 = vsub.f32 1.5, %v1368_v12  ;;  %v6831_v28 = vsub.f32 %v6757_v13, %v1230_v16  ;;  %v6833_v29 = vadd.f32 1e-05, %v1326_v19  ;;  %v1565_v42 = vadd.f32 %v6881_v53, %v1545_v52 }
 0x225   : > { %v6835_v30 = vpop.eup %5876  ;;  %v6845_v32 = vsub.f32 %v6759_v14, %v1228_v25  ;;  %v1390_v11 = vmul.f32 %v6804_v60, %v1389_v55 }
 0x226   : > { %v1370_v34 = vmul.f32 %v5875_v62, %v1369_v27  ;;  %v1376_v13 = vmul.f32 %v6835_v30, %v6810_v1  ;;  %5880 = vrsqrt.f32 %v6833_v29  ;;  %v1264_v14 = vmul.f32 %v6831_v28, %v6831_v28  ;;  %v6883_v54 = vpop.eup %5878 }
 0x227   : > { %v1262_v40 = vmul.f32 %v6845_v32, %v6845_v32  ;;  %vm1382_vm11 = vweird.f32 %v6835_v30  ;;  %vm1411_vm0 = vweird.f32 %v6833_v29  ;;  %vm1402_vm4 = vweird.f32 %v6883_v54 }
 0x228   : > { %v1374_v38 = vsel %vm6839_vm9, %v5875_v62, %v1370_v34  ;;  %v1377_v39 = vmul.f32 %v6835_v30, %v1376_v13  ;;  %v1303_v44 = vsel %vm1160_vm2, %v1264_v14, 0.0  ;;  %vm6903_vm14 = vmor %vm1381_vm10, %vm1382_vm11 }
 0x229   : > { %v6870_v45 = vpop.xlane.xlu0 %1289  ;;  %v1526_v47 = vmul.f32 %v1374_v38, %v6727_v57  ;;  %v1199_v48 = vpop.xlane.xlu2 %1198  ;;  %1304 = vadd.xlane.f32.xlu0 %v1303_v44  ;;  %v1297_v50 = vsel %vm1160_vm2, %v1262_v40, 0.0  ;;  %1207 = vadd.xlane.f32.xlu1 %v1206_v46  ;;  %vm1403_vm6 = vmor %vm1401_vm3, %vm1402_vm4 }
 0x22a   : > { %v1378_v49 = vmul.f32 0.5, %v1377_v39  ;;  %v1193_v51 = vpop.xlane.xlu1 %1192  ;;  %1298 = vadd.xlane.f32.xlu2 %v1297_v50  ;;  %v1231_v2 = vmul.f32 %v6711_v41, %v1199_v48 }
 0x22b   : > { %v1229_v57 = vmul.f32 %v6711_v41, %v1193_v51  ;;  %v1546_v58 = vmul.f32 %v6858_v36, %v1526_v47 }
 0x22c   : > { %v6888_v62 = vpop.eup %5880  ;;  %v1379_v0 = vsub.f32 1.5, %v1378_v49  ;;  %v6919_v17 = vsub.f32 %v6770_v21, %v1231_v2  ;;  %v1394_v21 = vsel %vm6914_vm15, %v6804_v60, %v1390_v11 }
 0x22d   : > { %v1406_v3 = vmul.f32 %v6888_v62, %v6833_v29  ;;  %v6896_v5 = vsub.f32 %v6772_v22, %v1229_v57  ;;  %v1566_v10 = vadd.f32 %v6881_v53, %v1546_v58  ;;  %v1396_v22 = vmul.f32 %v6883_v54, %v6817_v4 }
 0x22e   : > { %v1380_v8 = vmul.f32 %v6835_v30, %v1379_v0  ;;  %v1528_v14 = vmul.f32 %v1394_v21, %v6725_v56  ;;  %vm1412_vm1 = vweird.f32 %v6888_v62 }
 0x22f   : > { %v1263_v12 = vmul.f32 %v6896_v5, %v6896_v5  ;;  %v1582_v1 = vpack.c.bf16 %v1566_v10, %v1565_v42  ;;  %v1407_v23 = vmul.f32 %v6888_v62, %v1406_v3  ;;  %v1397_v31 = vmul.f32 %v6883_v54, %v1396_v22  ;;  %vm1413_vm5 = vmor %vm1411_vm0, %vm1412_vm1 }
 0x230   : > { %v1384_v19 = vsel %vm6903_vm14, %v6835_v30, %v1380_v8  ;;  %v1265_v30 = vmul.f32 %v6919_v17, %v6919_v17 }
 0x231   : > { %v1300_v24 = vsel %vm1160_vm2, %v1263_v12, 0.0  ;;  %v1202_v25 = vpop.xlane.xlu0 %1201  ;;  %5540 = vmatmul.msk.bf16.vlgmr.msra.gmra.mxu0 %vm1160_vm2, %v1582_v1  ;;  %1210 = vadd.xlane.f32.xlu1 %v1209_v18  ;;  %v1527_v13 = vmul.f32 %v1384_v19, %v6737_v63  ;;  %v1408_v35 = vmul.f32 0.5, %v1407_v23  ;;  %v1398_v38 = vmul.f32 0.5, %v1397_v31 }
 0x232   : > { %v1232_v27 = vmul.f32 %v6711_v41, %v1202_v25  ;;  %1301 = vadd.xlane.f32.xlu2 %v1300_v24  ;;  %v1306_v60 = vsel %vm1160_vm2, %v1265_v30, 0.0  ;;  %v1548_v63 = vmul.f32 %v6858_v36, %v1528_v14 }
 0x233   : > { %v1547_v40 = vmul.f32 %v6858_v36, %v1527_v13  ;;  %v1399_v47 = vsub.f32 1.5, %v1398_v38 }
 0x234   : > { %v6935_v34 = vsub.f32 %v6779_v26, %v1232_v27  ;;  %v1409_v26 = vsub.f32 1.5, %v1408_v35  ;;  %v1568_v50 = vadd.f32 %v6881_v53, %v1548_v63 }
 0x235   : > { %v1567_v48 = vadd.f32 %v6881_v53, %v1547_v40  ;;  %v1400_v51 = vmul.f32 %v6883_v54, %v1399_v47 }
 0x236   : > { %v1266_v37 = vmul.f32 %v6935_v34, %v6935_v34  ;;  %v1410_v49 = vmul.f32 %v6888_v62, %v1409_v26 }
 0x237   : > { %v1583_v52 = vpack.c.bf16 %v1568_v50, %v1567_v48  ;;  %v1404_v4 = vsel %vm1403_vm6, %v6883_v54, %v1400_v51 }
 0x238   : > { %v1309_v39 = vsel %vm1160_vm2, %v1266_v37, 0.0  ;;  %v1414_v55 = vsel %vm1413_vm5, %v6888_v62, %v1410_v49  ;;  %v1529_v58 = vmul.f32 %v1404_v4, %v6729_v59  ;;  %v1327_v62 = vmul.f32 %v6870_v45, %v6711_v41 }
 0x239   : > { %1310 = vadd.xlane.f32.xlu0 %v1309_v39  ;;  %v1205_v46 = vpop.xlane.xlu0 %1204  ;;  %v1530_v57 = vmul.f32 %v1414_v55, %v6748_v6 }
 0x23a   : > { %v1233_v44 = vmul.f32 %v6711_v41, %v1205_v46  ;;  %1307 = vadd.xlane.f32.xlu2 %v1306_v60  ;;  %v1549_v2 = vmul.f32 %v6858_v36, %v1529_v58  ;;  %v1344_v42 = vadd.f32 1e-05, %v1327_v62 }
 0x23b   : > { %v1550_v0 = vmul.f32 %v6858_v36, %v1530_v57 }
 0x23c   : > { %v6951_v56 = vsub.f32 %v6783_v20, %v1233_v44  ;;  %v1569_v8 = vadd.f32 %v6881_v53, %v1549_v2  ;;  %5882 = vrsqrt.f32 %v1344_v42  ;;  %vm1421_vm7 = vweird.f32 %v1344_v42 }
 0x23d   : > { %v1570_v3 = vadd.f32 %v6881_v53, %v1550_v0 }
 0x23e   : > { %v1267_v29 = vmul.f32 %v6951_v56, %v6951_v56 }
 0x23f   : > { %v1584_v9 = vpack.c.bf16 %v1570_v3, %v1569_v8 }
 0x240   : > { %v1312_v20 = vsel %vm1160_vm2, %v1267_v29, 0.0 }
 0x241   : > { %1313 = vadd.xlane.f32.xlu1 %v1312_v20  ;;  %5541 = vmatmul.msk.bf16.gmra.mxu0 %vm1160_vm2, %v1583_v52 }
 0x242   : > { %v5883_v54 = vpop.eup %5882 }
 0x243   : > { %v1416_v6 = vmul.f32 %v5883_v54, %v1344_v42  ;;  %vm1422_vm8 = vweird.f32 %v5883_v54 }
 0x244   : > { %vm6976_vm9 = vmor %vm1421_vm7, %vm1422_vm8 }
 0x245   : > { %v1417_v59 = vmul.f32 %v5883_v54, %v1416_v6 }
 0x247   : > { %v1418_v12 = vmul.f32 0.5, %v1417_v59 }
 0x249   : > { %v1419_v16 = vsub.f32 1.5, %v1418_v12 }
 0x24b   : > { %v1420_v45 = vmul.f32 %v5883_v54, %v1419_v16 }
 0x24d   : > { %v1424_v31 = vsel %vm6976_vm9, %v5883_v54, %v1420_v45 }
 0x24e   : > { %v1531_v26 = vmul.f32 %v1424_v31, %v6761_v15 }
 0x250   : > { %v1551_v51 = vmul.f32 %v6858_v36, %v1531_v26 }
 0x251   : > { %5542 = vmatmul.msk.bf16.gmra.mxu0 %vm1160_vm2, %v1584_v9 }
 0x252   : > { %v1571_v2 = vadd.f32 %v6881_v53, %v1551_v51 }
 0x28c   : > { %v1293_v10 = vpop.xlane.xlu1 %1292 }
 0x28d   : > { %v1328_v11 = vmul.f32 %v1293_v10, %v6711_v41 }
 0x28f   : > { %v1345_v22 = vadd.f32 1e-05, %v1328_v11 }
 0x291   : > { %5884 = vrsqrt.f32 %v1345_v22  ;;  %vm1431_vm11 = vweird.f32 %v1345_v22 }
 0x294   : > { %v1296_v1 = vpop.xlane.xlu1 %1295 }
 0x295   : > { %v1329_v19 = vmul.f32 %v1296_v1, %v6711_v41 }
 0x297   : > { %v5885_v18 = vpop.eup %5884  ;;  %v1346_v24 = vadd.f32 1e-05, %v1329_v19 }
 0x298   : > { %v1426_v23 = vmul.f32 %v5885_v18, %v1345_v22  ;;  %vm1432_vm10 = vweird.f32 %v5885_v18 }
 0x299   : > { %5886 = vrsqrt.f32 %v1346_v24  ;;  %vm1433_vm12 = vmor %vm1431_vm11, %vm1432_vm10  ;;  %vm1441_vm14 = vweird.f32 %v1346_v24 }
 0x29a   : > { %v1427_v27 = vmul.f32 %v5885_v18, %v1426_v23 }
 0x29c   : > { %v1428_v21 = vmul.f32 0.5, %v1427_v27  ;;  %v1305_v30 = vpop.xlane.xlu0 %1304  ;;  %v1208_v37 = vpop.xlane.xlu1 %1207 }
 0x29d   : > { %v1299_v35 = vpop.xlane.xlu2 %1298  ;;  %v1332_v14 = vmul.f32 %v1305_v30, %v6711_v41  ;;  %v1234_v60 = vmul.f32 %v6711_v41, %v1208_v37 }
 0x29e   : > { %v1429_v13 = vsub.f32 1.5, %v1428_v21  ;;  %v1330_v38 = vmul.f32 %v1299_v35, %v6711_v41 }
 0x29f   : > { %v6985_v40 = vadd.f32 1e-05, %v1332_v14  ;;  %v5887_v46 = vpop.eup %5886  ;;  %v6989_v63 = vsub.f32 %v6847_v33, %v1234_v60 }
 0x2a0   : > { %v1430_v39 = vmul.f32 %v5885_v18, %v1429_v13  ;;  %v1347_v44 = vadd.f32 1e-05, %v1330_v38  ;;  %v1436_v48 = vmul.f32 %v5887_v46, %v1346_v24  ;;  %vm1442_vm13 = vweird.f32 %v5887_v46 }
 0x2a1   : > { %5888 = vrsqrt.f32 %v6985_v40  ;;  %v1268_v49 = vmul.f32 %v6989_v63, %v6989_v63  ;;  %vm7019_vm15 = vmor %vm1441_vm14, %vm1442_vm13  ;;  %vm1471_vm6 = vweird.f32 %v6985_v40 }
 0x2a2   : > { %v1434_v47 = vsel %vm1433_vm12, %v5885_v18, %v1430_v39  ;;  %5890 = vrsqrt.f32 %v1347_v44  ;;  %v1437_v50 = vmul.f32 %v5887_v46, %v1436_v48  ;;  %vm1451_vm0 = vweird.f32 %v1347_v44 }
 0x2a3   : > { %v1532_v29 = vmul.f32 %v1434_v47, %v6796_v43  ;;  %v1315_v15 = vsel %vm1160_vm2, %v1268_v49, 0.0 }
 0x2a4   : > { %v1438_v52 = vmul.f32 0.5, %v1437_v50  ;;  %1316 = vadd.xlane.f32.xlu2 %v1315_v15  ;;  %v1211_v33 = vpop.xlane.xlu1 %1210 }
 0x2a5   : > { %v1302_v20 = vpop.xlane.xlu2 %1301  ;;  %v1552_v55 = vmul.f32 %v6858_v36, %v1532_v29  ;;  %v1235_v57 = vmul.f32 %v6711_v41, %v1211_v33 }
 0x2a6   : > { %v1331_v4 = vmul.f32 %v1302_v20, %v6711_v41  ;;  %v1439_v0 = vsub.f32 1.5, %v1438_v52 }
 0x2a7   : > { %v7000_v58 = vpop.eup %5888  ;;  %v1572_v43 = vadd.f32 %v6881_v53, %v1552_v55  ;;  %v7005_v9 = vsub.f32 %v6898_v7, %v1235_v57  ;;  %v7017_v7 = vld [vmem:[%s9170_s14] ss:$0 sm:$0xff] }
 0x2a8   : > { %v5891_v3 = vpop.eup %5890  ;;  %v1348_v8 = vadd.f32 1e-05, %v1331_v4  ;;  %v1440_v62 = vmul.f32 %v5887_v46, %v1439_v0  ;;  %v1466_v54 = vmul.f32 %v7000_v58, %v6985_v40  ;;  %vm1472_vm7 = vweird.f32 %v7000_v58 }
 0x2a9   : > { %v1446_v42 = vmul.f32 %v5891_v3, %v1347_v44  ;;  %v1585_v6 = vpack.c.bf16 %v1572_v43, %v1571_v2  ;;  %v1269_v10 = vmul.f32 %v7005_v9, %v7005_v9  ;;  %vm1452_vm1 = vweird.f32 %v5891_v3  ;;  %vm7061_vm9 = vmor %vm1471_vm6, %vm1472_vm7 }
 0x2aa   : > { %5892 = vrsqrt.f32 %v1348_v8  ;;  %v1444_v1 = vsel %vm7019_vm15, %v5887_v46, %v1440_v62  ;;  %v1467_v19 = vmul.f32 %v7000_v58, %v1466_v54  ;;  %vm1453_vm3 = vmor %vm1451_vm0, %vm1452_vm1  ;;  %vm1461_vm4 = vweird.f32 %v1348_v8 }
 0x2ab   : > { %v1447_v59 = vmul.f32 %v5891_v3, %v1446_v42  ;;  %5543 = vmatmul.msk.bf16.gmra.mxu0 %vm1160_vm2, %v1585_v6  ;;  %v1318_v12 = vsel %vm1160_vm2, %v1269_v10, 0.0  ;;  %v1533_v13 = vmul.f32 %v1444_v1, %v6807_v61  ;;  %vm1717_vm0 = vcmask 130048  }
 0x2ac   : > { %v1311_v11 = vpop.xlane.xlu0 %1310  ;;  %1319 = vadd.xlane.f32.xlu0 %v1318_v12  ;;  %v1468_v37 = vmul.f32 0.5, %v1467_v19 }
 0x2ad   : > { %v1334_v16 = vmul.f32 %v1311_v11, %v6711_v41  ;;  %v1448_v18 = vmul.f32 0.5, %v1447_v59  ;;  %v1308_v23 = vpop.xlane.xlu2 %1307  ;;  %v1553_v46 = vmul.f32 %v6858_v36, %v1533_v13 }
 0x2ae   : > { %v1333_v45 = vmul.f32 %v1308_v23, %v6711_v41  ;;  %v1647_v25 = vpop.f32.mrf.mxu0  ;;  %v1469_v44 = vsub.f32 1.5, %v1468_v37 }
 0x2af   : > { %v7029_v24 = vadd.f32 1e-05, %v1334_v16  ;;  %v1449_v27 = vsub.f32 1.5, %v1448_v18  ;;  %v1648_v21 = vadd.f32 %v7017_v7, %v1647_v25  ;;  %v1573_v20 = vadd.f32 %v6881_v53, %v1553_v46 }
 0x2b0   : > { %v5893_v31 = vpop.eup %5892  ;;  %v7033_v30 = vadd.f32 1e-05, %v1333_v45  ;;  %v1470_v55 = vmul.f32 %v7000_v58, %v1469_v44 }
 0x2b1   : > { %5894 = vrsqrt.f32 %v7029_v24  ;;  %v1450_v35 = vmul.f32 %v5891_v3, %v1449_v27  ;;  %v1456_v14 = vmul.f32 %v5893_v31, %v1348_v8  ;;  %v7038_v39 = vpack.c.bf16 %v1648_v21, %v1648_v21 }
 0x2b2   : > { %5896 = vrsqrt.f32 %v7033_v30  ;;  %vm1462_vm5 = vweird.f32 %v5893_v31  ;;  %v1474_v40 = vsel %vm7061_vm9, %v7000_v58, %v1470_v55  ;;  %vm1491_vm10 = vweird.f32 %v7029_v24 }
 0x2b3   : > { %v1454_v38 = vsel %vm1453_vm3, %v5891_v3, %v1450_v35  ;;  %v1457_v60 = vmul.f32 %v5893_v31, %v1456_v14  ;;  %vm7051_vm8 = vmor %vm1461_vm4, %vm1462_vm5  ;;  %v1536_v16 = vmul.f32 %v1474_v40, %v6831_v28  ;;  %vm1481_vm12 = vweird.f32 %v7033_v30 }
 0x2b4   : > { %v1534_v26 = vmul.f32 %v1454_v38, %v6845_v32  ;;  %v1713_v32 = vunpack.c.l.b16 %v7038_v39 }
 0x2b5   : > { %v1458_v47 = vmul.f32 0.5, %v1457_v60  ;;  %v1556_v23 = vmul.f32 %v6858_v36, %v1536_v16 }
 0x2b6   : > { %v1649_v61 = vpop.f32.mrf.mxu0  ;;  %v1554_v49 = vmul.f32 %v6858_v36, %v1534_v26  ;;  %v7070_v42 = vpack.c.b16 %v1713_v32, %v1713_v32 }
 0x2b7   : > { %v7042_v48 = vpop.eup %5894  ;;  %v1459_v50 = vsub.f32 1.5, %v1458_v47  ;;  %v1650_v51 = vadd.f32 %v7017_v7, %v1649_v61 }
 0x2b8   : > { %v1486_v29 = vmul.f32 %v7042_v48, %v7029_v24  ;;  %v5897_v15 = vpop.eup %5896  ;;  %v1574_v33 = vadd.f32 %v6881_v53, %v1554_v49  ;;  %vm1492_vm11 = vweird.f32 %v7042_v48 }
 0x2b9   : > { %v1460_v4 = vmul.f32 %v5893_v31, %v1459_v50  ;;  %v1476_v57 = vmul.f32 %v5897_v15, %v7033_v30  ;;  %v7065_v2 = vpack.c.bf16 %v1650_v51, %v1650_v51  ;;  %vm1482_vm13 = vweird.f32 %v5897_v15  ;;  %vm1493_vm14 = vmor %vm1491_vm10, %vm1492_vm11 }
 0x2ba   : > { %v1586_v43 = vpack.c.bf16 %v1574_v33, %v1573_v20  ;;  %v1487_v62 = vmul.f32 %v7042_v48, %v1486_v29  ;;  %vm1483_vm15 = vmor %vm1481_vm12, %vm1482_vm13  ;;  %v1314_v33 = vpop.xlane.xlu1 %1313  ;;  %vm2121_vm12 = vcmask 64512   ;;  %vm2331_vm13 = vcmask 1043456  }
 0x2bb   : > { %v1464_v3 = vsel %vm7051_vm8, %v5893_v31, %v1460_v4  ;;  %v1477_v8 = vmul.f32 %v5897_v15, %v1476_v57  ;;  %v1738_v54 = vunpack.c.l.b16 %v7065_v2  ;;  %v1576_v31 = vadd.f32 %v6881_v53, %v1556_v23 }
 0x2bc   : > { %5544 = vmatmul.msk.bf16.gmra.mxu0 %vm1160_vm2, %v1586_v43  ;;  %1715 = vrot.lane.b32.xlu2 %v7070_v42, %s6342_s23  ;;  %v1535_v59 = vmul.f32 %v1464_v3, %v6896_v5  ;;  %v1488_v22 = vmul.f32 0.5, %v1487_v62  ;;  %v1335_v55 = vmul.f32 %v1314_v33, %v6711_v41 }
 0x2bd   : > { %v7079_v6 = vpack.c.b16 %v1738_v54, %v1738_v54  ;;  %v1478_v11 = vmul.f32 0.5, %v1477_v8 }
 0x2be   : > { %v1652_v10 = vpop.f32.mrf.mxu0  ;;  %v1555_v58 = vmul.f32 %v6858_v36, %v1535_v59  ;;  %v1489_v19 = vsub.f32 1.5, %v1488_v22  ;;  %v1352_v4 = vadd.f32 1e-05, %v1335_v55 }
 0x2bf   : > { %v1653_v12 = vadd.f32 %v7017_v7, %v1652_v10  ;;  %1740 = vrot.lane.b32.xlu1 %v7079_v6, %s6342_s23  ;;  %v1479_v18 = vsub.f32 1.5, %v1478_v11 }
 0x2c0   : > { %v1575_v25 = vadd.f32 %v6881_v53, %v1555_v58  ;;  %v1490_v21 = vmul.f32 %v7042_v48, %v1489_v19  ;;  %5898 = vrsqrt.f32 %v1352_v4  ;;  %vm1501_vm1 = vweird.f32 %v1352_v4 }
 0x2c1   : > { %v7086_v1 = vpack.c.bf16 %v1653_v12, %v1653_v12  ;;  %v1480_v27 = vmul.f32 %v5897_v15, %v1479_v18 }
 0x2c2   : > { %v1587_v30 = vpack.c.bf16 %v1576_v31, %v1575_v25  ;;  %v1494_v37 = vsel %vm1493_vm14, %v7042_v48, %v1490_v21 }
 0x2c3   : > { %v1762_v5 = vunpack.c.l.b16 %v7086_v1  ;;  %v1484_v35 = vsel %vm1483_vm15, %v5897_v15, %v1480_v27  ;;  %v1538_v46 = vmul.f32 %v1494_v37, %v6935_v34 }
 0x2c4   : > { %v1537_v26 = vmul.f32 %v1484_v35, %v6919_v17 }
 0x2c5   : > { %v7094_v45 = vpack.c.b16 %v1762_v5, %v1762_v5  ;;  %v1558_v61 = vmul.f32 %v6858_v36, %v1538_v46 }
 0x2c6   : > { %v1654_v28 = vpop.f32.mrf.mxu0  ;;  %v1557_v48 = vmul.f32 %v6858_v36, %v1537_v26  ;;  %v5899_v57 = vpop.eup %5898 }
 0x2c7   : > { %v1655_v24 = vadd.f32 %v7017_v7, %v1654_v28  ;;  %1764 = vrot.lane.b32.xlu0 %v7094_v45, %s6342_s23  ;;  %v1578_v34 = vadd.f32 %v6881_v53, %v1558_v61  ;;  %v1496_v0 = vmul.f32 %v5899_v57, %v1352_v4  ;;  %vm1502_vm3 = vweird.f32 %v5899_v57 }
 0x2c8   : > { %v1577_v17 = vadd.f32 %v6881_v53, %v1557_v48  ;;  %vm1503_vm4 = vmor %vm1501_vm1, %vm1502_vm3 }
 0x2c9   : > { %v7102_v13 = vpack.c.bf16 %v1655_v24, %v1655_v24  ;;  %v1497_v43 = vmul.f32 %v5899_v57, %v1496_v0 }
 0x2ca   : > { %v1588_v15 = vpack.c.bf16 %v1578_v34, %v1577_v17 }
 0x2cb   : > { %v1786_v14 = vunpack.c.l.b16 %v7102_v13  ;;  %v1498_v54 = vmul.f32 0.5, %v1497_v43 }
 0x2cc   : > { %5545 = vmatmul.msk.bf16.gmra.mxu0 %vm1160_vm2, %v1587_v30 }
 0x2cd   : > { %v7107_v38 = vpack.c.b16 %v1786_v14, %v1786_v14  ;;  %v1499_v40 = vsub.f32 1.5, %v1498_v54 }
 0x2ce   : > { %v1657_v60 = vpop.f32.mrf.mxu0 }
 0x2cf   : > { %v1658_v44 = vadd.f32 %v7017_v7, %v1657_v60  ;;  %1788 = vrot.lane.b32.xlu1 %v7107_v38, %s6342_s23  ;;  %v1500_v58 = vmul.f32 %v5899_v57, %v1499_v40 }
 0x2d1   : > { %v7114_v47 = vpack.c.bf16 %v1658_v44, %v1658_v44  ;;  %v1504_v5 = vsel %vm1503_vm4, %v5899_v57, %v1500_v58 }
 0x2d2   : > { %v1539_v31 = vmul.f32 %v1504_v5, %v6951_v56 }
 0x2d3   : > { %v1810_v49 = vunpack.c.l.b16 %v7114_v47 }
 0x2d5   : > { %v7119_v50 = vpack.c.b16 %v1810_v49, %v1810_v49 }
 0x2d6   : > { %v1659_v29 = vpop.f32.mrf.mxu0 }
 0x2d7   : > { %v1660_v32 = vadd.f32 %v7017_v7, %v1659_v29  ;;  %1812 = vrot.lane.b32.xlu2 %v7119_v50, %s6342_s23 }
 0x2d9   : > { %v7126_v51 = vpack.c.bf16 %v1660_v32, %v1660_v32 }
 0x2db   : > { %v1834_v52 = vunpack.c.l.b16 %v7126_v51 }
 0x2dc   : > { %5546 = vmatmul.msk.bf16.gmra.mxu0 %vm1160_vm2, %v1588_v15 }
 0x2dd   : > { %v7130_v20 = vpack.c.b16 %v1834_v52, %v1834_v52 }
 0x2df   : > { %1836 = vrot.lane.b32.xlu0 %v7130_v20, %s6342_s23 }
 0x317   : > { %v1317_v3 = vpop.xlane.xlu2 %1316 }
 0x318   : > { %v1336_v8 = vmul.f32 %v1317_v3, %v6711_v41 }
 0x31a   : > { %v1353_v62 = vadd.f32 1e-05, %v1336_v8 }
 0x31c   : > { %5900 = vrsqrt.f32 %v1353_v62  ;;  %vm1511_vm6 = vweird.f32 %v1353_v62 }
 0x31f   : > { %v1716_v10 = vpop.permute.xlu2 %1715  ;;  %v1320_v59 = vpop.xlane.xlu0 %1319 }
 0x320   : > { %v1337_v11 = vmul.f32 %v1320_v59, %v6711_v41  ;;  %v1722_v22 = vsel %vm1717_vm0, %v1716_v10, 0 }
 0x321   : > { %1731 = vmatpush.bf16.xpose.msra.mxu1 %v1722_v22 }
 0x322   : > { %v5901_v12 = vpop.eup %5900  ;;  %v1354_v16 = vadd.f32 1e-05, %v1337_v11 }
 0x323   : > { %v1506_v18 = vmul.f32 %v5901_v12, %v1353_v62  ;;  %vm1512_vm5 = vweird.f32 %v5901_v12 }
 0x324   : > { %5902 = vrsqrt.f32 %v1354_v16  ;;  %vm1513_vm7 = vmor %vm1511_vm6, %vm1512_vm5  ;;  %vm1521_vm8 = vweird.f32 %v1354_v16 }
 0x325   : > { %v1507_v19 = vmul.f32 %v5901_v12, %v1506_v18 }
 0x327   : > { %v1508_v23 = vmul.f32 0.5, %v1507_v19 }
 0x328   : > { %v1662_v28 = vpop.f32.mrf.mxu0  ;;  %5549 = vmatmul.msk.bf16.vlgmr.msra.gmra.mxu1 %vm1717_vm0, %v7038_v39  ;;  %v1559_v39 = vmul.f32 %v6858_v36, %v1539_v31 }
 0x329   : > { %v1663_v25 = vadd.f32 %v7017_v7, %v1662_v28  ;;  %v1509_v27 = vsub.f32 1.5, %v1508_v23 }
 0x32a   : > { %v5903_v21 = vpop.eup %5902  ;;  %v1579_v15 = vadd.f32 %v6881_v53, %v1559_v39 }
 0x32b   : > { %v7141_v24 = vpack.c.bf16 %v1663_v25, %v1663_v25  ;;  %v1510_v30 = vmul.f32 %v5901_v12, %v1509_v27  ;;  %v1516_v35 = vmul.f32 %v5903_v21, %v1354_v16  ;;  %vm1522_vm9 = vweird.f32 %v5903_v21 }
 0x32c   : > { %vm1523_vm10 = vmor %vm1521_vm8, %vm1522_vm9 }
 0x32d   : > { %v1858_v37 = vunpack.c.l.b16 %v7141_v24  ;;  %v1514_v14 = vsel %vm1513_vm7, %v5901_v12, %v1510_v30  ;;  %v1517_v60 = vmul.f32 %v5903_v21, %v1516_v35 }
 0x32e   : > { %v1540_v46 = vmul.f32 %v1514_v14, %v6989_v63 }
 0x32f   : > { %v7145_v26 = vpack.c.b16 %v1858_v37, %v1858_v37  ;;  %v1518_v44 = vmul.f32 0.5, %v1517_v60 }
 0x330   : > { %v1664_v48 = vpop.f32.mrf.mxu0  ;;  %v1560_v56 = vmul.f32 %v6858_v36, %v1540_v46 }
 0x331   : > { %v1813_v61 = vpop.permute.xlu2 %1812  ;;  %v1665_v49 = vadd.f32 %v7017_v7, %v1664_v48  ;;  %1860 = vrot.lane.b32.xlu1 %v7145_v26, %s6342_s23  ;;  %v1519_v29 = vsub.f32 1.5, %v1518_v44  ;;  %v1741_v17 = vpop.permute.xlu1 %1740 }
 0x332   : > { %v1818_v34 = vsel %vm1717_vm0, %v1813_v61, 0  ;;  %v1746_v63 = vsel %vm1717_vm0, %v1741_v17, 0  ;;  %v1580_v52 = vadd.f32 %v6881_v53, %v1560_v56 }
 0x333   : > { %v7154_v32 = vpack.c.bf16 %v1665_v49, %v1665_v49  ;;  %v1520_v33 = vmul.f32 %v5903_v21, %v1519_v29  ;;  %1755 = vmatpush.bf16.xpose.msra.mxu2 %v1746_v63 }
 0x334   : > { %v1589_v4 = vpack.c.bf16 %v1580_v52, %v1579_v15 }
 0x335   : > { %v1882_v55 = vunpack.c.l.b16 %v7154_v32  ;;  %v1524_v57 = vsel %vm1523_vm10, %v5903_v21, %v1520_v33 }
 0x336   : > { %5547 = vmatmul.msk.bf16.gmra.mxu0 %vm1160_vm2, %v1589_v4  ;;  %v1541_v3 = vmul.f32 %v1524_v57, %v7005_v9 }
 0x337   : > { %v7160_v0 = vpack.c.b16 %v1882_v55, %v1882_v55 }
 0x338   : > { %v1561_v10 = vmul.f32 %v6858_v36, %v1541_v3 }
 0x339   : > { %v1667_v43 = vpop.f32.mrf.mxu0  ;;  %1884 = vrot.lane.b32.xlu2 %v7160_v0, %s6342_s23  ;;  %v1765_v62 = vpop.permute.xlu0 %1764 }
 0x33a   : > { %v1668_v8 = vadd.f32 %v7017_v7, %v1667_v43  ;;  %5550 = vmatmul.msk.bf16.vlgmr.msra.gmra.mxu2 %vm1717_vm0, %v7065_v2  ;;  %v1770_v54 = vsel %vm1717_vm0, %v1765_v62, 0  ;;  %v1581_v9 = vadd.f32 %v6881_v53, %v1561_v10 }
 0x33b   : > { %1827 = vmatpush.bf16.xpose.msrb.mxu2 %v1818_v34  ;;  %1779 = vmatpush.bf16.xpose.msra.mxu3 %v1770_v54 }
 0x33c   : > { %v7170_v40 = vpack.c.bf16 %v1668_v8, %v1668_v8  ;;  %v1590_v58 = vpack.c.bf16 %v1581_v9, %v1581_v9 }
 0x33e   : > { %v1906_v59 = vunpack.c.l.b16 %v7170_v40 }
 0x340   : > { %v7174_v11 = vpack.c.b16 %v1906_v59, %v1906_v59 }
 0x341   : > { %v1669_v22 = vpop.f32.mrf.mxu0  ;;  %v1789_v12 = vpop.permute.xlu1 %1788 }
 0x342   : > { %v1670_v16 = vadd.f32 %v7017_v7, %v1669_v22  ;;  %1908 = vrot.lane.b32.xlu0 %v7174_v11, %s6342_s23  ;;  %v1794_v2 = vsel %vm1717_vm0, %v1789_v12, 0  ;;  %5551 = vmatmul.msk.bf16.vlgmr.msra.gmra.mxu3 %vm1717_vm0, %v7086_v1 }
 0x343   : > { %1803 = vmatpush.bf16.xpose.msrb.mxu1 %v1794_v2 }
 0x344   : > { %v7183_v36 = vpack.c.bf16 %v1670_v16, %v1670_v16 }
 0x346   : > { %v1930_v18 = vunpack.c.l.b16 %v7183_v36  ;;  %5548 = vmatmul.msk.bf16.gmra.mxu0 %vm1160_vm2, %v1590_v58 }
 0x348   : > { %v7187_v19 = vpack.c.b16 %v1930_v18, %v1930_v18 }
 0x349   : > { %v1672_v53 = vpop.f32.mrf.mxu0 }
 0x34a   : > { %v1673_v5 = vadd.f32 %v7017_v7, %v1672_v53  ;;  %1932 = vrot.lane.b32.xlu1 %v7187_v19, %s6342_s23  ;;  %5552 = vmatmul.msk.bf16.vlgmr.msrb.gmra.mxu1 %vm1717_vm0, %v7102_v13 }
 0x34b   : > { %5553 = vmatmul.msk.bf16.vlgmr.msrb.gmra.mxu2 %vm1717_vm0, %v7114_v47 }
 0x34c   : > { %v1705_v1 = vpack.c.bf16 %v1673_v5, %v1673_v5 }
 0x34e   : > { %v1954_v23 = vunpack.c.l.b16 %v1705_v1 }
 0x350   : > { %v7196_v28 = vpack.c.b16 %v1954_v23, %v1954_v23 }
 0x351   : > { %v1674_v25 = vpop.f32.mrf.mxu0  ;;  %v1837_v27 = vpop.permute.xlu0 %1836 }
 0x352   : > { %v1675_v21 = vadd.f32 %v7017_v7, %v1674_v25  ;;  %1956 = vrot.lane.b32.xlu2 %v7196_v28, %s6342_s23  ;;  %v1842_v31 = vsel %vm1717_vm0, %v1837_v27, 0 }
 0x353   : > { %1851 = vmatpush.bf16.xpose.msrb.mxu3 %v1842_v31 }
 0x354   : > { %v7202_v30 = vpack.c.bf16 %v1675_v21, %v1675_v21 }
 0x356   : > { %v1978_v13 = vunpack.c.l.b16 %v7202_v30 }
 0x358   : > { %v7205_v35 = vpack.c.b16 %v1978_v13, %v1978_v13 }
 0x359   : > { %v1677_v47 = vpop.f32.mrf.mxu0 }
 0x35a   : > { %v1678_v37 = vadd.f32 %v7017_v7, %v1677_v47  ;;  %1980 = vrot.lane.b32.xlu0 %v7205_v35, %s6342_s23  ;;  %5554 = vmatmul.msk.bf16.vlgmr.msrb.gmra.mxu3 %vm1717_vm0, %v7126_v51 }
 0x35c   : > { %v7212_v14 = vpack.c.bf16 %v1678_v37, %v1678_v37 }
 0x35e   : > { %v2002_v60 = vunpack.c.l.b16 %v7212_v14 }
 0x360   : > { %v7215_v46 = vpack.c.b16 %v2002_v60, %v2002_v60 }
 0x361   : > { %v1679_v39 = vpop.f32.mrf.mxu0 }
 0x362   : > { %v1680_v44 = vadd.f32 %v7017_v7, %v1679_v39  ;;  %2004 = vrot.lane.b32.xlu1 %v7215_v46, %s6342_s23 }
 0x364   : > { %v1708_v48 = vpack.c.bf16 %v1680_v44, %v1680_v44  ;;  %v6346_v44 = vmov -1e+30  }
 0x366   : > { %v2026_v61 = vunpack.c.l.b16 %v1708_v48 }
 0x368   : > { %v7220_v49 = vpack.c.b16 %v2026_v61, %v2026_v61 }
 0x36a   : > { %2028 = vrot.lane.b32.xlu2 %v7220_v49, %s6342_s23 }
 0x393   : > { %v1885_v51 = vpop.permute.xlu2 %1884 }
 0x394   : > { %v1890_v56 = vsel %vm1717_vm0, %v1885_v51, 0 }
 0x395   : > { %1899 = vmatpush.bf16.xpose.msra.mxu2 %v1890_v56 }
 0x39c   : > { %5556 = vmatmul.msk.bf16.vlgmr.msra.gmra.mxu2 %vm1717_vm0, %v7154_v32 }
 0x3a3   : > { %v1861_v29 = vpop.permute.xlu1 %1860 }
 0x3a4   : > { %v1866_v17 = vsel %vm1717_vm0, %v1861_v29, 0 }
 0x3a5   : > { %1875 = vmatpush.bf16.xpose.msra.mxu1 %v1866_v17  ;;  %v7228_v34 = vpop.f32.mrf.mxu1 }
 0x3ac   : > { %v1957_v63 = vpop.permute.xlu2 %1956  ;;  %5555 = vmatmul.msk.bf16.vlgmr.msra.gmra.mxu1 %vm1717_vm0, %v7141_v24 }
 0x3ad   : > { %v1962_v15 = vsel %vm1717_vm0, %v1957_v63, 0  ;;  %v1735_v52 = vpop.f32.mrf.mxu1 }
 0x3ae   : > { %1971 = vmatpush.bf16.xpose.msrb.mxu2 %v1962_v15 }
 0x3b3   : > { %v1682_v33 = vpop.f32.mrf.mxu0 }
 0x3b4   : > { %v1909_v55 = vpop.permute.xlu0 %1908  ;;  %v1683_v4 = vadd.f32 %v7017_v7, %v1682_v33 }
 0x3b5   : > { %v1914_v32 = vsel %vm1717_vm0, %v1909_v55, 0  ;;  %5559 = vmatmul.msk.bf16.vlgmr.msrb.gmra.mxu2 %vm1717_vm0, %v1705_v1 }
 0x3b6   : > { %1923 = vmatpush.bf16.xpose.msra.mxu3 %v1914_v32  ;;  %v7236_v57 = vpack.c.bf16 %v1683_v4, %v1683_v4 }
 0x3b8   : > { %v2050_v43 = vunpack.c.l.b16 %v7236_v57 }
 0x3ba   : > { %v7239_v3 = vpack.c.b16 %v2050_v43, %v2050_v43 }
 0x3bb   : > { %v1684_v8 = vpop.f32.mrf.mxu0 }
 0x3bc   : > { %v1933_v24 = vpop.permute.xlu1 %1932  ;;  %v1685_v54 = vadd.f32 %v7017_v7, %v1684_v8  ;;  %2052 = vrot.lane.b32.xlu0 %v7239_v3, %s6342_s23 }
 0x3bd   : > { %v1938_v62 = vsel %vm1717_vm0, %v1933_v24, 0  ;;  %5557 = vmatmul.msk.bf16.vlgmr.msra.gmra.mxu3 %vm1717_vm0, %v7170_v40  ;;  %v1757_v10 = vpop.f32.mrf.mxu2 }
 0x3be   : > { %1947 = vmatpush.bf16.xpose.msrb.mxu1 %v1938_v62  ;;  %v7247_v59 = vpack.c.bf16 %v1685_v54, %v1685_v54 }
 0x3c0   : > { %v2074_v22 = vunpack.c.l.b16 %v7247_v59 }
 0x3c2   : > { %v7250_v12 = vpack.c.b16 %v2074_v22, %v2074_v22 }
 0x3c3   : > { %v1687_v16 = vpop.f32.mrf.mxu0 }
 0x3c4   : > { %v2029_v9 = vpop.permute.xlu2 %2028  ;;  %v1688_v58 = vadd.f32 %v7017_v7, %v1687_v16  ;;  %2348 = vrot.lane.b32.xlu0 %v7079_v6, %s6343_s28  ;;  %2076 = vrot.lane.b32.xlu1 %v7250_v12, %s6342_s23 }
 0x3c5   : > { %v2034_v2 = vsel %vm1717_vm0, %v2029_v9, 0  ;;  %5558 = vmatmul.msk.bf16.vlgmr.msrb.gmra.mxu1 %vm1717_vm0, %v7183_v36  ;;  %v1759_v40 = vpop.f32.mrf.mxu2  ;;  %v7260_v18 = vpop.f32.mrf.mxu3 }
 0x3c6   : > { %2043 = vmatpush.bf16.xpose.msra.mxu2 %v2034_v2  ;;  %v7262_v53 = vpack.c.bf16 %v1688_v58, %v1688_v58 }
 0x3c7   : > { %v1805_v5 = vpop.f32.mrf.mxu1 }
 0x3c8   : > { %v2098_v1 = vunpack.c.l.b16 %v7262_v53 }
 0x3ca   : > { %v7265_v7 = vpack.c.b16 %v2098_v1, %v2098_v1 }
 0x3cb   : > { %v1689_v23 = vpop.f32.mrf.mxu0 }
 0x3cc   : > { %v1981_v36 = vpop.permute.xlu0 %1980  ;;  %2516 = vrot.lane.b32.xlu0 %v7187_v19, %s6343_s28  ;;  %2432 = vrot.lane.b32.xlu1 %v7130_v20, %s6343_s28 }
 0x3cd   : > { %v1986_v25 = vsel %vm1717_vm0, %v1981_v36, 0  ;;  %5562 = vmatmul.msk.bf16.vlgmr.msra.gmra.mxu2 %vm1717_vm0, %v1708_v48  ;;  %2100 = vrot.lane.b32.xlu2 %v7265_v7, %s6342_s23  ;;  %v1783_v21 = vpop.f32.mrf.mxu3  ;;  %s9198_s23 = sld [smem:[#allocation32_spill]] (!%p5668_p5) }
 0x3ce   : > { %v1829_v27 = vpop.f32.mrf.mxu2  ;;  %1995 = vmatpush.bf16.xpose.msrb.mxu3 %v1986_v25 }
 0x3cf   : > { %v1807_v31 = vpop.f32.mrf.mxu1 }
 0x3d4   : > { %v2005_v13 = vpop.permute.xlu1 %2004  ;;  %2558 = vrot.lane.b32.xlu0 %v7205_v35, %s6343_s28  ;;  %2411 = vrot.lane.b32.xlu1 %v7119_v50, %s6343_s28 }
 0x3d5   : > { %v2010_v47 = vsel %vm1717_vm0, %v2005_v13, 0  ;;  %2326 = vrot.lane.b32.xlu2 %v7070_v42, %s6343_s28  ;;  %5560 = vmatmul.msk.bf16.vlgmr.msrb.gmra.mxu3 %vm1717_vm0, %v7202_v30 }
 0x3d6   : > { %v1831_v37 = vpop.f32.mrf.mxu2  ;;  %2019 = vmatpush.bf16.xpose.msra.mxu1 %v2010_v47 }
 0x3dc   : > { %2686 = vrot.lane.b32.xlu0 %v7070_v42, %s6344_s9  ;;  %2537 = vrot.lane.b32.xlu1 %v7196_v28, %s6343_s28 }
 0x3dd   : > { %v7286_v60 = vpop.f32.mrf.mxu3  ;;  %5561 = vmatmul.msk.bf16.vlgmr.msra.gmra.mxu1 %vm1717_vm0, %v7212_v14  ;;  %2369 = vrot.lane.b32.xlu2 %v7094_v45, %s6343_s28  ;;  %v1691_v14 = vlaneseq }
 0x3df   : > { %v1692_v39 = vand.u32 127, %v1691_v14 }
 0x3e1   : > { %vm1693_vm11 = vcmp.lt.s32.totalorder %v1692_v39, 2 }
 0x3e2   : > { %v7306_v48 = vsel %vm1693_vm11, 0.0, %v6346_v44 }
 0x3e3   : > { %v7312_v61 = vadd.f32 %v7228_v34, %v7306_v48  ;;  %v7315_v51 = vadd.f32 %v1757_v10, %v7306_v48  ;;  %v7324_v17 = vadd.f32 %v1805_v5, %v7306_v48  ;;  %v7327_v34 = vadd.f32 %v1829_v27, %v7306_v48 }
 0x3e4   : > { %2684 = vrot.lane.b32.xlu0 %v7070_v42, %s6345_s16  ;;  %2642 = vrot.lane.b32.xlu1 %v7250_v12, %s6343_s28 }
 0x3e5   : > { %v1855_v30 = vpop.f32.mrf.mxu3  ;;  %2390 = vrot.lane.b32.xlu2 %v7107_v38, %s6343_s28  ;;  %v2122_v56 = vsel %vm2121_vm12, %v7312_v61, -inf  ;;  %v2125_v29 = vsel %vm2121_vm12, %v7315_v51, -inf  ;;  %v2131_v63 = vsel %vm2121_vm12, %v7324_v17, -inf  ;;  %v2134_v15 = vsel %vm2121_vm12, %v7327_v34, -inf }
 0x3ed   : > { %2453 = vrot.lane.b32.xlu2 %v7145_v26, %s6343_s28 }
 0x3f5   : > { %2495 = vrot.lane.b32.xlu2 %v7174_v11, %s6343_s28 }
 0x3fd   : > { %2474 = vrot.lane.b32.xlu2 %v7160_v0, %s6343_s28 }
 0x405   : > { %2579 = vrot.lane.b32.xlu2 %v7215_v46, %s6343_s28 }
 0x40d   : > { %2600 = vrot.lane.b32.xlu2 %v7220_v49, %s6343_s28 }
 0x40e   : > { %2123 = vmax.xlane.f32.xlu0 %v2122_v56  ;;  %2126 = vmax.xlane.f32.xlu1 %v2125_v29 }
 0x415   : > { %2621 = vrot.lane.b32.xlu2 %v7239_v3, %s6343_s28 }
 0x416   : > { %2132 = vmax.xlane.f32.xlu0 %v2131_v63  ;;  %2135 = vmax.xlane.f32.xlu1 %v2134_v15  ;;  %v7378_v63 = vadd.f32 %v7260_v18, %v7306_v48 }
 0x418   : > { %v2128_v15 = vsel %vm2121_vm12, %v7378_v63, -inf }
 0x41d   : > { %2709 = vrot.lane.b32.xlu2 %v7079_v6, %s6344_s9 }
 0x41f   : > { %v1901_v52 = vpop.f32.mrf.mxu2 }
 0x420   : > { %v7338_v33 = vadd.f32 %v1901_v52, %v7306_v48 }
 0x422   : > { %v2143_v55 = vsel %vm2121_vm12, %v7338_v33, -inf }
 0x423   : > { %2144 = vmax.xlane.f32.xlu1 %v2143_v55 }
 0x425   : > { %2663 = vrot.lane.b32.xlu2 %v7265_v7, %s6343_s28 }
 0x427   : > { %v1903_v4 = vpop.f32.mrf.mxu2  ;;  %v2101_v32 = vpop.permute.xlu2 %2100 }
 0x428   : > { %v2106_v43 = vsel %vm1717_vm0, %v2101_v32, 0 }
 0x429   : > { %v1877_v24 = vpop.f32.mrf.mxu1  ;;  %2115 = vmatpush.bf16.xpose.msrb.mxu2 %v2106_v43 }
 0x42a   : > { %v7346_v8 = vadd.f32 %v1877_v24, %v7306_v48  ;;  %v7390_v24 = vadd.f32 %v7286_v60, %v7306_v48 }
 0x42c   : > { %v2140_v62 = vsel %vm2121_vm12, %v7346_v8, -inf }
 0x42d   : > { %2141 = vmax.xlane.f32.xlu0 %v2140_v62  ;;  %v2137_v62 = vsel %vm2121_vm12, %v7390_v24, -inf }
 0x42e   : > { %v2053_v54 = vpop.permute.xlu0 %2052 }
 0x42f   : > { %v2327_v10 = vpop.permute.xlu2 %2326  ;;  %v2058_v22 = vsel %vm1717_vm0, %v2053_v54, 0 }
 0x430   : > { %v2333_v9 = vsel %vm2331_vm13, %v2327_v10, 0  ;;  %5565 = vmatmul.msk.bf16.vlgmr.msrb.gmra.mxu2 %vm1717_vm0, %v7262_v53  ;;  %2067 = vmatpush.bf16.xpose.msra.mxu3 %v2058_v22 }
 0x431   : > { %v1879_v16 = vpop.f32.mrf.mxu1 }
 0x436   : > { %v2349_v2 = vpop.permute.xlu0 %2348  ;;  %v2077_v58 = vpop.permute.xlu1 %2076 }
 0x437   : > { %v2354_v40 = vsel %vm2331_vm13, %v2349_v2, 0  ;;  %5563 = vmatmul.msk.bf16.vlgmr.msra.gmra.mxu3 %vm1717_vm0, %v7236_v57  ;;  %v2082_v1 = vsel %vm1717_vm0, %v2077_v58, 0  ;;  %v2370_v23 = vpop.permute.xlu2 %2369 }
 0x438   : > { %2342 = vmatpush.bf16.msrb.mxu3 %v2333_v9  ;;  %v1973_v5 = vpop.f32.mrf.mxu2  ;;  %v2375_v25 = vsel %vm2331_vm13, %v2370_v23, 0  ;;  %2091 = vmatpush.bf16.xpose.msrb.mxu1 %v2082_v1 }
 0x439   : > { %v7359_v36 = vadd.f32 %v1973_v5, %v7306_v48  ;;  %2384 = vmatpush.bf16.msra.mxu2 %v2375_v25 }
 0x43b   : > { %v2152_v53 = vsel %vm2121_vm12, %v7359_v36, -inf }
 0x43c   : > { %2153 = vmax.xlane.f32.xlu1 %v2152_v53 }
 0x43e   : > { %v2433_v27 = vpop.permute.xlu1 %2432 }
 0x43f   : > { %v2438_v31 = vsel %vm2331_vm13, %v2433_v27, 0  ;;  %v2391_v57 = vpop.permute.xlu2 %2390  ;;  %5564 = vmatmul.msk.bf16.vlgmr.msrb.gmra.mxu1 %vm1717_vm0, %v7247_v59 }
 0x440   : > { %2363 = vmatpush.bf16.msra.mxu1 %v2354_v40  ;;  %v1925_v21 = vpop.f32.mrf.mxu3  ;;  %v1975_v13 = vpop.f32.mrf.mxu2  ;;  %v2396_v47 = vsel %vm2331_vm13, %v2391_v57, 0  ;;  %2447 = vmatpush.bf16.msrb.mxu2 %v2438_v31 }
 0x441   : > { %2405 = vmatpush.bf16.msra.mxu3 %v2396_v47  ;;  %v7399_v9 = vadd.f32 %v1925_v21, %v7306_v48  ;;  %v7418_v31 = vpop.permute.xlu0 %2516 }
 0x442   : > { %v1949_v37 = vpop.f32.mrf.mxu1 }
 0x443   : > { %v7369_v30 = vadd.f32 %v1949_v37, %v7306_v48  ;;  %v2146_v58 = vsel %vm2121_vm12, %v7399_v9, -inf }
 0x445   : > { %v2149_v14 = vsel %vm2121_vm12, %v7369_v30, -inf }
 0x446   : > { %2150 = vmax.xlane.f32.xlu0 %v2149_v14  ;;  %v2412_v39 = vpop.permute.xlu1 %2411 }
 0x447   : > { %v2417_v56 = vsel %vm2331_vm13, %v2412_v39, 0  ;;  %v7374_v29 = vpop.permute.xlu2 %2453 }
 0x448   : > { %v1927_v44 = vpop.f32.mrf.mxu3  ;;  %2426 = vmatpush.bf16.msrb.mxu1 %v2417_v56 }
 0x449   : > { %v7420_v57 = vpop.permute.xlu0 %2558 }
 0x44a   : > { %v1951_v59 = vpop.f32.mrf.mxu1 }
 0x44e   : > { %2129 = vmax.xlane.f32.xlu2 %v2128_v15  ;;  %v2538_v52 = vpop.permute.xlu1 %2537 }
 0x44f   : > { %v7382_v4 = vpop.permute.xlu2 %2495  ;;  %v2543_v43 = vsel %vm2331_vm13, %v2538_v52, 0 }
 0x450   : > { %v2045_v55 = vpop.f32.mrf.mxu2  ;;  %2552 = vmatpush.bf16.msrb.mxu0 %v2543_v43 }
 0x451   : > { %v7385_v32 = vadd.f32 %v2045_v55, %v7306_v48  ;;  %v7422_v13 = vpop.permute.xlu0 %2686 }
 0x453   : > { %v2161_v18 = vsel %vm2121_vm12, %v7385_v32, -inf }
 0x454   : > { %2162 = vmax.xlane.f32.xlu1 %v2161_v18 }
 0x456   : > { %2138 = vmax.xlane.f32.xlu2 %v2137_v62  ;;  %v7434_v15 = vpop.permute.xlu1 %2642 }
 0x457   : > { %v7396_v10 = vpop.permute.xlu2 %2474 }
 0x458   : > { %v2047_v54 = vpop.f32.mrf.mxu2  ;;  %v1997_v22 = vpop.f32.mrf.mxu3 }
 0x459   : > { %v7402_v16 = vadd.f32 %v1997_v22, %v7306_v48  ;;  %v7424_v47 = vpop.permute.xlu0 %2684 }
 0x45a   : > { %v2021_v60 = vpop.f32.mrf.mxu1 }
 0x45b   : > { %v2155_v2 = vsel %vm2121_vm12, %v7402_v16, -inf  ;;  %v7409_v40 = vadd.f32 %v2021_v60, %v7306_v48 }
 0x45c   : > { %2156 = vmax.xlane.f32.xlu0 %v2155_v2 }
 0x45d   : > { %v2158_v25 = vsel %vm2121_vm12, %v7409_v40, -inf }
 0x45e   : > { %2147 = vmax.xlane.f32.xlu2 %v2146_v58 }
 0x45f   : > { %v7411_v5 = vpop.permute.xlu2 %2579 }
 0x460   : > { %v1999_v1 = vpop.f32.mrf.mxu3 }
 0x462   : > { %v2023_v23 = vpop.f32.mrf.mxu1 }
 0x464   : > { %2159 = vmax.xlane.f32.xlu0 %v2158_v25 }
 0x467   : > { %v7415_v53 = vpop.permute.xlu2 %2600 }
 0x46f   : > { %v2622_v27 = vpop.permute.xlu2 %2621 }
 0x470   : > { %v2627_v21 = vsel %vm2331_vm13, %v2622_v27, 0 }
 0x471   : > { %2636 = vmatpush.bf16.msra.mxu0 %v2627_v21 }
 0x477   : > { %v7426_v37 = vpop.permute.xlu2 %2709 }
 0x47f   : > { %v7436_v52 = vpop.permute.xlu2 %2663 }
 0x481   : > { %v2124_v39 = vpop.xlane.xlu0 %2123 }
 0x482   : > { %v2173_v59 = vsub.f32 %v7312_v61, %v2124_v39  ;;  %v2127_v61 = vpop.xlane.xlu1 %2126 }
 0x484   : > { %v2190_v43 = vmul.f32 1.442695, %v2173_v59 }
 0x486   : > { %5904 = vpow2.f32 %v2190_v43 }
 0x489   : > { %v2133_v58 = vpop.xlane.xlu0 %2132 }
 0x48a   : > { %v2176_v21 = vsub.f32 %v7324_v17, %v2133_v58 }
 0x48c   : > { %v7449_v27 = vpop.eup %5904  ;;  %v2196_v59 = vmul.f32 1.442695, %v2176_v21 }
 0x4b3   : > { %v2117_v14 = vpop.f32.mrf.mxu2 }
 0x4b4   : > { %v7429_v44 = vadd.f32 %v2117_v14, %v7306_v48 }
 0x4b6   : > { %v2170_v56 = vsel %vm2121_vm12, %v7429_v44, -inf }
 0x4b7   : > { %2171 = vmax.xlane.f32.xlu1 %v2170_v56  ;;  %v2224_v56 = vsel %vm2121_vm12, %v7449_v27, 0.0 }
 0x4ba   : > { %v2069_v55 = vpop.f32.mrf.mxu3 }
 0x4bb   : > { %v7439_v18 = vadd.f32 %v2069_v55, %v7306_v48  ;;  %v2119_v62 = vpop.f32.mrf.mxu2  ;;  %v2136_v55 = vpop.xlane.xlu1 %2135 }
 0x4bc   : > { %v2093_v54 = vpop.f32.mrf.mxu1  ;;  %v2177_v62 = vsub.f32 %v7327_v34, %v2136_v55  ;;  %v2174_v55 = vsub.f32 %v7315_v51, %v2127_v61 }
 0x4bd   : > { %v2164_v22 = vsel %vm2121_vm12, %v7439_v18, -inf  ;;  %v7444_v60 = vadd.f32 %v2093_v54, %v7306_v48 }
 0x4be   : > { %2165 = vmax.xlane.f32.xlu0 %v2164_v22  ;;  %v2198_v17 = vmul.f32 1.442695, %v2177_v62 }
 0x4bf   : > { %v2167_v2 = vsel %vm2121_vm12, %v7444_v60, -inf }
 0x4c0   : > { %2168 = vmax.xlane.f32.xlu2 %v2167_v2 }
 0x4c1   : > { %v2130_v1 = vpop.xlane.xlu2 %2129 }
 0x4c2   : > { %v2071_v23 = vpop.f32.mrf.mxu3  ;;  %v2175_v25 = vsub.f32 %v7378_v63, %v2130_v1 }
 0x4c4   : > { %v2194_v14 = vmul.f32 1.442695, %v2175_v25  ;;  %v2095_v39 = vpop.f32.mrf.mxu1  ;;  %v2142_v25 = vpop.xlane.xlu0 %2141 }
 0x4c6   : > { %5906 = vpow2.f32 %v2194_v14 }
 0x4c7   : > { %5908 = vpow2.f32 %v2196_v59 }
 0x4c8   : > { %2225 = vadd.xlane.f32.xlu2 %v2224_v56  ;;  %5910 = vpow2.f32 %v2198_v17  ;;  %v2179_v17 = vsub.f32 %v7346_v8, %v2142_v25 }
 0x4c9   : > { %v2139_v54 = vpop.xlane.xlu2 %2138 }
 0x4ca   : > { %v2178_v2 = vsub.f32 %v7390_v24, %v2139_v54 }
 0x4cc   : > { %v7454_v43 = vpop.eup %5906  ;;  %v2200_v34 = vmul.f32 1.442695, %v2178_v2  ;;  %v2151_v56 = vpop.xlane.xlu0 %2150 }
 0x4cd   : > { %v2230_v63 = vsel %vm2121_vm12, %v7454_v43, 0.0  ;;  %v7461_v22 = vpop.eup %5908  ;;  %v2182_v8 = vsub.f32 %v7369_v30, %v2151_v56 }
 0x4ce   : > { %2231 = vadd.xlane.f32.xlu1 %v2230_v63  ;;  %v2233_v58 = vsel %vm2121_vm12, %v7461_v22, 0.0  ;;  %v7466_v23 = vpop.eup %5910  ;;  %5912 = vpow2.f32 %v2200_v34  ;;  %v2192_v63 = vmul.f32 1.442695, %v2174_v55  ;;  %v2145_v34 = vpop.xlane.xlu1 %2144 }
 0x4cf   : > { %v2236_v14 = vsel %vm2121_vm12, %v7466_v23, 0.0  ;;  %v2180_v51 = vsub.f32 %v7338_v33, %v2145_v34  ;;  %v2208_v33 = vmul.f32 1.442695, %v2182_v8 }
 0x4d1   : > { %v2148_v1 = vpop.xlane.xlu2 %2147 }
 0x4d2   : > { %2707 = vrot.lane.b32.xlu0 %v7079_v6, %s6345_s16  ;;  %v2181_v21 = vsub.f32 %v7399_v9, %v2148_v1 }
 0x4d4   : > { %v2206_v39 = vmul.f32 1.442695, %v2181_v21  ;;  %v7473_v24 = vpop.eup %5912  ;;  %v2157_v9 = vpop.xlane.xlu0 %2156 }
 0x4d5   : > { %v2239_v59 = vsel %vm2121_vm12, %v7473_v24, 0.0 }
 0x4d6   : > { %2234 = vadd.xlane.f32.xlu1 %v2233_v58  ;;  %5914 = vpow2.f32 %v2206_v39  ;;  %v2202_v58 = vmul.f32 1.442695, %v2179_v17  ;;  %v2204_v39 = vmul.f32 1.442695, %v2180_v51  ;;  %v2154_v55 = vpop.xlane.xlu1 %2153 }
 0x4d7   : > { %5916 = vpow2.f32 %v2192_v63  ;;  %v2183_v17 = vsub.f32 %v7359_v36, %v2154_v55 }
 0x4d8   : > { %5918 = vpow2.f32 %v2202_v58  ;;  %v2184_v58 = vsub.f32 %v7402_v16, %v2157_v9 }
 0x4d9   : > { %v2210_v56 = vmul.f32 1.442695, %v2183_v17 }
 0x4dc   : > { %v7478_v62 = vpop.eup %5914  ;;  %v2160_v2 = vpop.xlane.xlu0 %2159 }
 0x4dd   : > { %v2248_v54 = vsel %vm2121_vm12, %v7478_v62, 0.0  ;;  %v7483_v1 = vpop.eup %5916  ;;  %v2185_v21 = vsub.f32 %v7409_v40, %v2160_v2 }
 0x4de   : > { %2237 = vadd.xlane.f32.xlu1 %v2236_v14  ;;  %v2227_v61 = vsel %vm2121_vm12, %v7483_v1, 0.0 }
 0x4df   : > { %v2214_v14 = vmul.f32 1.442695, %v2185_v21  ;;  %v2212_v21 = vmul.f32 1.442695, %v2184_v58  ;;  %v2459_v58 = vsel %vm2331_vm13, %v7374_v29, 0 }
 0x4e0   : > { %2755 = vrot.lane.b32.xlu2 %v7107_v38, %s6344_s9 }
 0x4e1   : > { %5920 = vpow2.f32 %v2214_v14 }
 0x4e2   : > { %5922 = vpow2.f32 %v2204_v39 }
 0x4e3   : > { %5924 = vpow2.f32 %v2208_v33 }
 0x4e4   : > { %5926 = vpow2.f32 %v2210_v56 }
 0x4e5   : > { %5928 = vpow2.f32 %v2212_v21 }
 0x4e6   : > { %2240 = vadd.xlane.f32.xlu1 %v2239_v59  ;;  %v7489_v59 = vpop.eup %5918 }
 0x4e7   : > { %v2242_v25 = vsel %vm2121_vm12, %v7489_v59, 0.0  ;;  %v7494_v40 = vpop.eup %5920 }
 0x4e8   : > { %v7496_v63 = vpop.eup %5922 }
 0x4e9   : > { %v2245_v30 = vsel %vm2121_vm12, %v7496_v63, 0.0  ;;  %v7505_v2 = vpop.eup %5924 }
 0x4ea   : > { %v2251_v34 = vsel %vm2121_vm12, %v7505_v2, 0.0  ;;  %v7510_v51 = vpop.eup %5926 }
 0x4eb   : > { %v2254_v36 = vsel %vm2121_vm12, %v7510_v51, 0.0  ;;  %v7514_v14 = vpop.eup %5928 }
 0x4ec   : > { %v2257_v16 = vsel %vm2121_vm12, %v7514_v14, 0.0 }
 0x4ee   : > { %2249 = vadd.xlane.f32.xlu1 %v2248_v54  ;;  %v2260_v54 = vsel %vm2121_vm12, %v7494_v40, 0.0 }
 0x4fc   : > { %2228 = vadd.xlane.f32.xlu0 %v2227_v61  ;;  %v2163_v61 = vpop.xlane.xlu1 %2162 }
 0x4fd   : > { %v2186_v39 = vsub.f32 %v7385_v32, %v2163_v61 }
 0x4ff   : > { %v2216_v9 = vmul.f32 1.442695, %v2186_v39  ;;  %v2501_v39 = vsel %vm2331_vm13, %v7382_v4, 0 }
 0x501   : > { %5930 = vpow2.f32 %v2216_v9 }
 0x504   : > { %2243 = vadd.xlane.f32.xlu0 %v2242_v25 }
 0x507   : > { %2753 = vrot.lane.b32.xlu1 %v7107_v38, %s6345_s16  ;;  %v7523_v8 = vpop.eup %5930 }
 0x508   : > { %v2263_v25 = vsel %vm2121_vm12, %v7523_v8, 0.0 }
 0x509   : > { %2261 = vadd.xlane.f32.xlu2 %v2260_v54 }
 0x50c   : > { %2246 = vadd.xlane.f32.xlu0 %v2245_v30 }
 0x514   : > { %2252 = vadd.xlane.f32.xlu0 %v2251_v34 }
 0x51c   : > { %2255 = vadd.xlane.f32.xlu0 %v2254_v36 }
 0x521   : > { %2732 = vrot.lane.b32.xlu2 %v7094_v45, %s6344_s9 }
 0x524   : > { %2258 = vadd.xlane.f32.xlu0 %v2257_v16 }
 0x529   : > { %2801 = vrot.lane.b32.xlu2 %v7130_v20, %s6344_s9 }
 0x52a   : > { %v2172_v33 = vpop.xlane.xlu1 %2171 }
 0x531   : > { %2264 = vadd.xlane.f32.xlu1 %v2263_v25  ;;  %2847 = vrot.lane.b32.xlu2 %v7160_v0, %s6344_s9 }
 0x533   : > { %v2169_v32 = vpop.xlane.xlu2 %2168 }
 0x538   : > { %2778 = vrot.lane.b32.xlu0 %v7119_v50, %s6344_s9 }
 0x539   : > { %2845 = vrot.lane.b32.xlu2 %v7160_v0, %s6345_s16 }
 0x53b   : > { %v2226_v55 = vpop.xlane.xlu2 %2225 }
 0x53c   : > { %5932 = vrcp.f32 %v2226_v55 }
 0x541   : > { %v2232_v54 = vpop.xlane.xlu1 %2231  ;;  %2893 = vrot.lane.b32.xlu2 %v7187_v19, %s6344_s9 }
 0x542   : > { %v5933_v17 = vpop.eup %5932  ;;  %5934 = vrcp.f32 %v2232_v54  ;;  %v2522_v54 = vsel %vm2331_vm13, %v7418_v31, 0  ;;  %v2188_v31 = vsub.f32 %v7444_v60, %v2169_v32 }
 0x543   : > { %v2292_v30 = vmul.f32 %v5933_v17, %v7449_v27  ;;  %v2166_v27 = vpop.xlane.xlu0 %2165 }
 0x544   : > { %v2187_v29 = vsub.f32 %v7439_v18, %v2166_v27 }
 0x545   : > { %v2309_v56 = vpack.c.bf16 %v2292_v30, %v2292_v30 }
 0x546   : > { %v2218_v25 = vmul.f32 1.442695, %v2187_v29 }
 0x547   : > { %5566 = vmatmul.msk.bf16.vlgmr.msrb.gmra.mxu3 %vm2121_vm12, %v2309_v56 }
 0x548   : > { %v5935_v34 = vpop.eup %5934  ;;  %2468 = vmatpush.bf16.msrb.mxu3 %v2459_v58 }
 0x549   : > { %v2294_v21 = vmul.f32 %v5935_v34, %v7454_v43  ;;  %v2235_v36 = vpop.xlane.xlu1 %2234  ;;  %2891 = vrot.lane.b32.xlu2 %v7187_v19, %s6345_s16  ;;  %v2585_v34 = vsel %vm2331_vm13, %v7411_v5, 0 }
 0x54a   : > { %5936 = vrcp.f32 %v2235_v36  ;;  %2776 = vrot.lane.b32.xlu1 %v7119_v50, %s6345_s16 }
 0x54b   : > { %v2311_v61 = vpack.c.bf16 %v2294_v21, %v2294_v21  ;;  %5938 = vpow2.f32 %v2218_v25  ;;  %v2220_v21 = vmul.f32 1.442695, %v2188_v31  ;;  %v7567_v36 = vpop.permute.xlu0 %2707 }
 0x54d   : > { %5568 = vmatmul.msk.bf16.vlgmr.msra.gmra.mxu2 %vm2121_vm12, %v2311_v61 }
 0x54e   : > { %2510 = vmatpush.bf16.msra.mxu2 %v2501_v39 }
 0x550   : > { %v5937_v16 = vpop.eup %5936 }
 0x551   : > { %v2295_v43 = vmul.f32 %v5937_v16, %v7461_v22  ;;  %v2238_v9 = vpop.xlane.xlu1 %2237  ;;  %2914 = vrot.lane.b32.xlu2 %v7196_v28, %s6345_s16  ;;  %v7556_v18 = vpop.eup %5938 }
 0x552   : > { %v2266_v17 = vsel %vm2121_vm12, %v7556_v18, 0.0  ;;  %v2756_v16 = vpop.permute.xlu2 %2755 }
 0x553   : > { %v2312_v55 = vpack.c.bf16 %v2295_v43, %v2295_v43 }
 0x557   : > { %5569 = vmatmul.msk.bf16.vlgmr.msra.gmra.mxu3 %vm2121_vm12, %v2312_v55 }
 0x558   : > { %2531 = vmatpush.bf16.msra.mxu3 %v2522_v54  ;;  %v2480_v54 = vsel %vm2331_vm13, %v7396_v10, 0  ;;  %v2606_v10 = vsel %vm2331_vm13, %v7415_v53, 0  ;;  %v2564_v53 = vsel %vm2331_vm13, %v7420_v57, 0 }
 0x559   : > { %v2241_v4 = vpop.xlane.xlu1 %2240  ;;  %2960 = vrot.lane.b32.xlu2 %v7215_v46, %s6345_s16 }
 0x55a   : > { %5940 = vrcp.f32 %v2241_v4 }
 0x560   : > { %v5941_v22 = vpop.eup %5940 }
 0x561   : > { %v2297_v30 = vmul.f32 %v5941_v22, %v7473_v24  ;;  %3008 = vrot.lane.b32.xlu2 %v7239_v3, %s6344_s9  ;;  %v2250_v58 = vpop.xlane.xlu1 %2249  ;;  %v2189_v24 = vsub.f32 %v7429_v44, %v2172_v33  ;;  %v2669_v33 = vsel %vm2331_vm13, %v7436_v52, 0 }
 0x562   : > { %2267 = vadd.xlane.f32.xlu0 %v2266_v17  ;;  %5942 = vrcp.f32 %v2250_v58  ;;  %v2761_v58 = vsel %vm1717_vm0, %v2756_v16, 0  ;;  %v2715_v16 = vsel %vm1717_vm0, %v7426_v37, 0 }
 0x563   : > { %v2314_v56 = vpack.c.bf16 %v2297_v30, %v2297_v30  ;;  %5944 = vpow2.f32 %v2220_v21  ;;  %v2222_v60 = vmul.f32 1.442695, %v2189_v24 }
 0x565   : > { %5571 = vmatmul.msk.bf16.vlgmr.msrb.gmra.mxu2 %vm2121_vm12, %v2314_v56 }
 0x566   : > { %2594 = vmatpush.bf16.msrb.mxu2 %v2585_v34 }
 0x568   : > { %v5943_v61 = vpop.eup %5942 }
 0x569   : > { %3054 = vrot.lane.b32.xlu2 %v7265_v7, %s6344_s9  ;;  %v2300_v27 = vmul.f32 %v5943_v61, %v7478_v62  ;;  %v7573_v5 = vpop.eup %5944 }
 0x56a   : > { %v2269_v29 = vsel %vm2121_vm12, %v7573_v5, 0.0 }
 0x56b   : > { %v2317_v39 = vpack.c.bf16 %v2300_v27, %v2300_v27 }
 0x56f   : > { %v2229_v32 = vpop.xlane.xlu0 %2228 }
 0x570   : > { %5946 = vrcp.f32 %v2229_v32 }
 0x571   : > { %3321 = vrot.lane.b32.xlu2 %v7094_v45, %s6347_s4  ;;  %5948 = vpow2.f32 %v2222_v60  ;;  %v2692_v60 = vsel %vm1717_vm0, %v7422_v13, 0  ;;  %v2648_v13 = vsel %vm2331_vm13, %v7434_v15, 0 }
 0x574   : > { %2270 = vadd.xlane.f32.xlu1 %v2269_v29 }
 0x575   : > { %5574 = vmatmul.msk.bf16.vlgmr.msra.gmra.mxu2 %vm2121_vm12, %v2317_v39 }
 0x576   : > { %v5947_v44 = vpop.eup %5946  ;;  %2730 = vrot.lane.b32.xlu0 %v7094_v45, %s6345_s16  ;;  %2678 = vmatpush.bf16.msra.mxu2 %v2669_v33 }
 0x577   : > { %v2293_v62 = vmul.f32 %v5947_v44, %v7483_v1  ;;  %v2244_v43 = vpop.xlane.xlu0 %2243  ;;  %v7585_v25 = vpop.eup %5948 }
 0x578   : > { %5950 = vrcp.f32 %v2244_v43  ;;  %v2272_v45 = vsel %vm2121_vm12, %v7585_v25, 0.0 }
 0x579   : > { %v2310_v55 = vpack.c.bf16 %v2293_v62, %v2293_v62  ;;  %3426 = vrot.lane.b32.xlu2 %v7160_v0, %s6347_s4  ;;  %5952 = vrcp.f32 %v2238_v9 }
 0x57b   : > { %5567 = vmatmul.msk.bf16.vlgmr.msra.gmra.mxu1 %vm2121_vm12, %v2310_v55 }
 0x57c   : > { %2489 = vmatpush.bf16.msra.mxu1 %v2480_v54  ;;  %2273 = vadd.xlane.f32.xlu1 %v2272_v45  ;;  %v2262_v52 = vpop.xlane.xlu2 %2261 }
 0x57d   : > { %5954 = vrcp.f32 %v2262_v52 }
 0x57e   : > { %v5951_v1 = vpop.eup %5950  ;;  %2799 = vrot.lane.b32.xlu0 %v7130_v20, %s6345_s16 }
 0x57f   : > { %v2298_v4 = vmul.f32 %v5951_v1, %v7489_v59  ;;  %v2247_v0 = vpop.xlane.xlu0 %2246  ;;  %v5953_v17 = vpop.eup %5952 }
 0x580   : > { %v2296_v30 = vmul.f32 %v5953_v17, %v7466_v23 }
 0x581   : > { %v2315_v22 = vpack.c.bf16 %v2298_v4, %v2298_v4  ;;  %3447 = vrot.lane.b32.xlu2 %v7174_v11, %s6347_s4 }
 0x582   : > { %v2313_v34 = vpack.c.bf16 %v2296_v30, %v2296_v30 }
 0x583   : > { %5572 = vmatmul.msk.bf16.vlgmr.msrb.gmra.mxu3 %vm2121_vm12, %v2315_v22  ;;  %v5955_v9 = vpop.eup %5954 }
 0x584   : > { %2615 = vmatpush.bf16.msrb.mxu3 %v2606_v10  ;;  %v2304_v31 = vmul.f32 %v5955_v9, %v7494_v40  ;;  %v2733_v37 = vpop.permute.xlu2 %2732 }
 0x585   : > { %v2738_v62 = vsel %vm1717_vm0, %v2733_v37, 0 }
 0x586   : > { %2822 = vrot.lane.b32.xlu0 %v7145_v26, %s6345_s16  ;;  %v2321_v59 = vpack.c.bf16 %v2304_v31, %v2304_v31 }
 0x587   : > { %v2253_v56 = vpop.xlane.xlu0 %2252 }
 0x588   : > { %5956 = vrcp.f32 %v2253_v56  ;;  %5578 = vmatmul.msk.bf16.vlgmr.msrb.gmra.mxu2 %vm2121_vm12, %v2321_v59 }
 0x589   : > { %2770 = vmatpush.bf16.xpose.msrb.mxu2 %v2761_v58  ;;  %5958 = vrcp.f32 %v2247_v0 }
 0x58b   : > { %5570 = vmatmul.msk.bf16.vlgmr.msrb.gmra.mxu1 %vm2121_vm12, %v2313_v34 }
 0x58c   : > { %2573 = vmatpush.bf16.msrb.mxu1 %v2564_v53 }
 0x58e   : > { %v5957_v23 = vpop.eup %5956  ;;  %2868 = vrot.lane.b32.xlu0 %v7174_v11, %s6345_s16 }
 0x58f   : > { %v2301_v40 = vmul.f32 %v5957_v23, %v7505_v2  ;;  %v2256_v21 = vpop.xlane.xlu0 %2255  ;;  %v5959_v61 = vpop.eup %5958 }
 0x590   : > { %5960 = vrcp.f32 %v2256_v21  ;;  %v2299_v57 = vmul.f32 %v5959_v61, %v7496_v63  ;;  %v7629_v63 = vpop.permute.xlu1 %2753 }
 0x591   : > { %v2318_v24 = vpack.c.bf16 %v2301_v40, %v2301_v40 }
 0x592   : > { %v2316_v27 = vpack.c.bf16 %v2299_v57, %v2299_v57 }
 0x593   : > { %5575 = vmatmul.msk.bf16.vlgmr.msra.gmra.mxu3 %vm2121_vm12, %v2318_v24 }
 0x594   : > { %2701 = vmatpush.bf16.xpose.msra.mxu3 %v2692_v60 }
 0x595   : > { %2824 = vrot.lane.b32.xlu1 %v7145_v26, %s6344_s9 }
 0x596   : > { %v5961_v32 = vpop.eup %5960  ;;  %2916 = vrot.lane.b32.xlu0 %v7196_v28, %s6344_s9 }
 0x597   : > { %v2302_v2 = vmul.f32 %v5961_v32, %v7510_v51  ;;  %v2259_v39 = vpop.xlane.xlu0 %2258 }
 0x598   : > { %5962 = vrcp.f32 %v2259_v39 }
 0x599   : > { %v2319_v29 = vpack.c.bf16 %v2302_v2, %v2302_v2 }
 0x59b   : > { %5573 = vmatmul.msk.bf16.vlgmr.msra.gmra.mxu1 %vm2121_vm12, %v2316_v27  ;;  %5576 = vmatmul.msk.bf16.vlgmr.msrb.gmra.mxu0 %vm2121_vm12, %v2319_v29 }
 0x59c   : > { %2657 = vmatpush.bf16.msra.mxu1 %v2648_v13  ;;  %2724 = vmatpush.bf16.xpose.msrb.mxu0 %v2715_v16 }
 0x59d   : > { %2870 = vrot.lane.b32.xlu1 %v7174_v11, %s6344_s9 }
 0x59e   : > { %2962 = vrot.lane.b32.xlu0 %v7215_v46, %s6344_s9  ;;  %v5963_v51 = vpop.eup %5962 }
 0x59f   : > { %v2303_v15 = vmul.f32 %v5963_v51, %v7514_v14 }
 0x5a1   : > { %v2320_v33 = vpack.c.bf16 %v2303_v15, %v2303_v15 }
 0x5a4   : > { %v2265_v44 = vpop.xlane.xlu1 %2264 }
 0x5a5   : > { %5964 = vrcp.f32 %v2265_v44  ;;  %2939 = vrot.lane.b32.xlu1 %v7205_v35, %s6344_s9 }
 0x5a6   : > { %3031 = vrot.lane.b32.xlu0 %v7250_v12, %s6344_s9 }
 0x5aa   : > { %v2779_v55 = vpop.permute.xlu0 %2778 }
 0x5ab   : > { %5577 = vmatmul.msk.bf16.vlgmr.msrb.gmra.mxu1 %vm2121_vm12, %v2320_v33  ;;  %v5965_v11 = vpop.eup %5964  ;;  %v2784_v54 = vsel %vm1717_vm0, %v2779_v55, 0 }
 0x5ac   : > { %2747 = vmatpush.bf16.xpose.msrb.mxu1 %v2738_v62  ;;  %v2305_v43 = vmul.f32 %v5965_v11, %v7523_v8  ;;  %v2802_v8 = vpop.permute.xlu2 %2801 }
 0x5ad   : > { %2937 = vrot.lane.b32.xlu1 %v7205_v35, %s6345_s16  ;;  %v2807_v9 = vsel %vm1717_vm0, %v2802_v8, 0 }
 0x5ae   : > { %3029 = vrot.lane.b32.xlu0 %v7250_v12, %s6345_s16  ;;  %v2322_v14 = vpack.c.bf16 %v2305_v43, %v2305_v43 }
 0x5b0   : > { %5579 = vmatmul.msk.bf16.vlgmr.msrb.gmra.mxu3 %vm2121_vm12, %v2322_v14 }
 0x5b1   : > { %2793 = vmatpush.bf16.xpose.msrb.mxu3 %v2784_v54 }
 0x5b4   : > { %v2848_v52 = vpop.permute.xlu2 %2847 }
 0x5b5   : > { %2985 = vrot.lane.b32.xlu1 %v7220_v49, %s6344_s9  ;;  %v2853_v32 = vsel %vm1717_vm0, %v2848_v52, 0 }
 0x5b6   : > { %3052 = vrot.lane.b32.xlu0 %v7265_v7, %s6345_s16 }
 0x5bc   : > { %v2777_v1 = vpop.permute.xlu1 %2776  ;;  %v7672_v0 = vpop.permute.xlu2 %2845 }
 0x5bd   : > { %2983 = vrot.lane.b32.xlu1 %v7220_v49, %s6345_s16 }
 0x5be   : > { %3279 = vrot.lane.b32.xlu0 %v7070_v42, %s6347_s4 }
 0x5c0   : > { %5583 = vmatmul.msk.bf16.vlgmr.msra.gmra.mxu3 %vm1717_vm0, %v7424_v47 }
 0x5c4   : > { %v2894_v30 = vpop.permute.xlu2 %2893 }
 0x5c5   : > { %3006 = vrot.lane.b32.xlu1 %v7239_v3, %s6345_s16  ;;  %v2899_v23 = vsel %vm1717_vm0, %v2894_v30, 0  ;;  %s9199_s16 = sld [smem:[#allocation33_spill]] (!%p5668_p5) }
 0x5c6   : > { %3405 = vrot.lane.b32.xlu0 %v7145_v26, %s6347_s4 }
 0x5ca   : > { %v7663_v45 = vpop.f32.mrf.mxu3 }
 0x5cd   : > { %3300 = vrot.lane.b32.xlu1 %v7079_v6, %s6347_s4 }
 0x5d0   : > { %v7667_v4 = vpop.f32.mrf.mxu2  ;;  %5587 = vmatmul.msk.bf16.vlgmr.msrb.gmra.mxu3 %vm1717_vm0, %v2777_v1 }
 0x5d2   : > { %v2346_v42 = vpop.f32.mrf.mxu3 }
 0x5d5   : > { %v2268_v47 = vpop.xlane.xlu0 %2267  ;;  %3342 = vrot.lane.b32.xlu1 %v7107_v38, %s6347_s4 }
 0x5d6   : > { %5966 = vrcp.f32 %v2268_v47 }
 0x5d8   : > { %v2388_v26 = vpop.f32.mrf.mxu2 }
 0x5da   : > { %v7674_v22 = vpop.f32.mrf.mxu3 }
 0x5dc   : > { %v5967_v17 = vpop.eup %5966 }
 0x5dd   : > { %v2306_v6 = vmul.f32 %v5967_v17, %v7556_v18  ;;  %3363 = vrot.lane.b32.xlu1 %v7119_v50, %s6347_s4  ;;  %v2892_v18 = vpop.permute.xlu2 %2891 }
 0x5df   : > { %v2323_v10 = vpack.c.bf16 %v2306_v6, %v2306_v6 }
 0x5e1   : > { %5580 = vmatmul.msk.bf16.vlgmr.msra.gmra.mxu0 %vm2121_vm12, %v2323_v10 }
 0x5e2   : > { %2816 = vmatpush.bf16.xpose.msra.mxu0 %v2807_v9  ;;  %v2409_v38 = vpop.f32.mrf.mxu3 }
 0x5e5   : > { %3384 = vrot.lane.b32.xlu1 %v7130_v20, %s6347_s4  ;;  %v2915_v24 = vpop.permute.xlu2 %2914 }
 0x5e7   : > { %v2271_v31 = vpop.xlane.xlu1 %2270 }
 0x5e8   : > { %v2731_v59 = vpop.permute.xlu0 %2730  ;;  %5968 = vrcp.f32 %v2271_v31  ;;  %v7683_v56 = vpop.f32.mrf.mxu2 }
 0x5ed   : > { %3468 = vrot.lane.b32.xlu1 %v7187_v19, %s6347_s4  ;;  %v2961_v39 = vpop.permute.xlu2 %2960 }
 0x5ee   : > { %v5969_v50 = vpop.eup %5968 }
 0x5ef   : > { %v2307_v58 = vmul.f32 %v5969_v50, %v7573_v5  ;;  %v2274_v34 = vpop.xlane.xlu1 %2273 }
 0x5f0   : > { %v2800_v53 = vpop.permute.xlu0 %2799  ;;  %5970 = vrcp.f32 %v2274_v34  ;;  %v2451_v40 = vpop.f32.mrf.mxu2 }
 0x5f1   : > { %5584 = vmatmul.msk.bf16.vlgmr.msrb.gmra.mxu0 %vm1717_vm0, %v7567_v36  ;;  %v2324_v20 = vpack.c.bf16 %v2307_v58, %v2307_v58 }
 0x5f2   : > { %2908 = vmatpush.bf16.xpose.msrb.mxu0 %v2899_v23 }
 0x5f3   : > { %5581 = vmatmul.msk.bf16.vlgmr.msra.gmra.mxu1 %vm2121_vm12, %v2324_v20 }
 0x5f5   : > { %v3009_v44 = vpop.permute.xlu2 %3008 }
 0x5f6   : > { %v5971_v21 = vpop.eup %5970  ;;  %v3014_v54 = vsel %vm1717_vm0, %v3009_v44, 0 }
 0x5f7   : > { %v2308_v19 = vmul.f32 %v5971_v21, %v7585_v25 }
 0x5f8   : > { %v7693_v61 = vpop.f32.mrf.mxu1  ;;  %v2823_v5 = vpop.permute.xlu0 %2822 }
 0x5f9   : > { %v7695_v60 = vpop.f32.mrf.mxu2  ;;  %v2325_v57 = vpack.c.bf16 %v2308_v19, %v2308_v19 }
 0x5fb   : > { %5582 = vmatmul.msk.bf16.vlgmr.msra.gmra.mxu2 %vm2121_vm12, %v2325_v57 }
 0x5fc   : > { %2862 = vmatpush.bf16.xpose.msra.mxu2 %v2853_v32 }
 0x600   : > { %v2367_v36 = vpop.f32.mrf.mxu1  ;;  %v2869_v2 = vpop.permute.xlu0 %2868 }
 0x601   : > { %v2514_v27 = vpop.f32.mrf.mxu2  ;;  %5588 = vmatmul.msk.bf16.vlgmr.msra.gmra.mxu0 %vm1717_vm0, %v2800_v53 }
 0x603   : > { %5585 = vmatmul.msk.bf16.vlgmr.msrb.gmra.mxu1 %vm1717_vm0, %v2731_v59 }
 0x606   : > { %v7701_v25 = vpop.f32.mrf.mxu3 }
 0x607   : > { %v2825_v29 = vpop.permute.xlu1 %2824 }
 0x608   : > { %v7703_v13 = vpop.f32.mrf.mxu1  ;;  %v2830_v16 = vsel %vm1717_vm0, %v2825_v29, 0  ;;  %v2917_v51 = vpop.permute.xlu0 %2916 }
 0x609   : > { %2839 = vmatpush.bf16.xpose.msra.mxu1 %v2830_v16  ;;  %v2922_v15 = vsel %vm1717_vm0, %v2917_v51, 0 }
 0x60b   : > { %5586 = vmatmul.msk.bf16.vlgmr.msrb.gmra.mxu2 %vm1717_vm0, %v7629_v63  ;;  %v7709_v37 = vpop.f32.mrf.mxu2  ;;  %v3055_v63 = vpop.permute.xlu2 %3054 }
 0x60c   : > { %v3060_v47 = vsel %vm1717_vm0, %v3055_v63, 0 }
 0x60e   : > { %v2472_v33 = vpop.f32.mrf.mxu3 }
 0x60f   : > { %v2871_v62 = vpop.permute.xlu1 %2870 }
 0x610   : > { %v2430_v11 = vpop.f32.mrf.mxu1  ;;  %v2876_v43 = vsel %vm1717_vm0, %v2871_v62, 0  ;;  %v2963_v55 = vpop.permute.xlu0 %2962 }
 0x611   : > { %2931 = vmatpush.bf16.xpose.msrb.mxu1 %v2922_v15  ;;  %5592 = vmatmul.msk.bf16.vlgmr.msrb.gmra.mxu0 %vm1717_vm0, %v2892_v18  ;;  %v2968_v14 = vsel %vm1717_vm0, %v2963_v55, 0 }
 0x612   : > { %2885 = vmatpush.bf16.xpose.msra.mxu3 %v2876_v43 }
 0x613   : > { %5589 = vmatmul.msk.bf16.vlgmr.msra.gmra.mxu1 %vm1717_vm0, %v2823_v5  ;;  %v2598_v8 = vpop.f32.mrf.mxu2  ;;  %v3322_v58 = vpop.permute.xlu2 %3321 }
 0x616   : > { %v7716_v52 = vpop.f32.mrf.mxu3 }
 0x617   : > { %v2940_v1 = vpop.permute.xlu1 %2939 }
 0x618   : > { %v7718_v42 = vpop.f32.mrf.mxu1  ;;  %v2945_v26 = vsel %vm1717_vm0, %v2940_v1, 0  ;;  %v7723_v17 = vpop.f32.mrf.mxu0 }
 0x619   : > { %3023 = vmatpush.bf16.xpose.msra.mxu1 %v3014_v54  ;;  %5591 = vmatmul.msk.bf16.vlgmr.msra.gmra.mxu3 %vm1717_vm0, %v2869_v2  ;;  %v3032_v6 = vpop.permute.xlu0 %3031 }
 0x61a   : > { %2977 = vmatpush.bf16.xpose.msrb.mxu3 %v2968_v14  ;;  %2954 = vmatpush.bf16.xpose.msrb.mxu2 %v2945_v26  ;;  %v3037_v10 = vsel %vm1717_vm0, %v3032_v6, 0 }
 0x61b   : > { %5590 = vmatmul.msk.bf16.vlgmr.msra.gmra.mxu2 %vm1717_vm0, %v7672_v0  ;;  %v3327_v0 = vsel %vm2331_vm13, %v3322_v58, 0  ;;  %v3427_v29 = vpop.permute.xlu2 %3426 }
 0x61c   : > { %v3432_v44 = vsel %vm2331_vm13, %v3427_v29, 0 }
 0x61e   : > { %v2535_v9 = vpop.f32.mrf.mxu3 }
 0x61f   : > { %v2938_v30 = vpop.permute.xlu1 %2937 }
 0x620   : > { %v2493_v38 = vpop.f32.mrf.mxu1  ;;  %v2556_v31 = vpop.f32.mrf.mxu0 }
 0x621   : > { %v3030_v59 = vpop.permute.xlu0 %3029 }
 0x622   : > { %3069 = vmatpush.bf16.xpose.msra.mxu3 %v3060_v47  ;;  %3046 = vmatpush.bf16.xpose.msra.mxu2 %v3037_v10 }
 0x623   : > { %5593 = vmatmul.msk.bf16.vlgmr.msrb.gmra.mxu1 %vm1717_vm0, %v2915_v24 }
 0x627   : > { %v2986_v18 = vpop.permute.xlu1 %2985 }
 0x628   : > { %v7729_v50 = vpop.f32.mrf.mxu1  ;;  %v2991_v34 = vsel %vm1717_vm0, %v2986_v18, 0 }
 0x629   : > { %5595 = vmatmul.msk.bf16.vlgmr.msrb.gmra.mxu3 %vm1717_vm0, %v2961_v39  ;;  %v3053_v53 = vpop.permute.xlu0 %3052  ;;  %3000 = vmatpush.bf16.xpose.msra.mxu0 %v2991_v34 }
 0x62b   : > { %5594 = vmatmul.msk.bf16.vlgmr.msrb.gmra.mxu2 %vm1717_vm0, %v2938_v30 }
 0x62c   : > { %3336 = vmatpush.bf16.msrb.mxu2 %v3327_v0 }
 0x62f   : > { %v2984_v23 = vpop.permute.xlu1 %2983 }
 0x630   : > { %v2577_v40 = vpop.f32.mrf.mxu1  ;;  %5596 = vmatmul.msk.bf16.vlgmr.msra.gmra.mxu0 %vm1717_vm0, %v2984_v23 }
 0x631   : > { %v3280_v20 = vpop.permute.xlu0 %3279 }
 0x632   : > { %v3285_v21 = vsel %vm2331_vm13, %v3280_v20, 0 }
 0x633   : > { %3294 = vmatpush.bf16.msrb.mxu0 %v3285_v21  ;;  %v7737_v24 = vpop.f32.mrf.mxu3 }
 0x637   : > { %v3007_v19 = vpop.permute.xlu1 %3006 }
 0x638   : > { %5597 = vmatmul.msk.bf16.vlgmr.msra.gmra.mxu1 %vm1717_vm0, %v3007_v19 }
 0x639   : > { %5599 = vmatmul.msk.bf16.vlgmr.msra.gmra.mxu3 %vm1717_vm0, %v3053_v53  ;;  %v3406_v5 = vpop.permute.xlu0 %3405 }
 0x63a   : > { %v3411_v57 = vsel %vm2331_vm13, %v3406_v5, 0 }
 0x63b   : > { %v2619_v32 = vpop.f32.mrf.mxu3  ;;  %5598 = vmatmul.msk.bf16.vlgmr.msra.gmra.mxu2 %vm1717_vm0, %v3030_v59 }
 0x63c   : > { %3420 = vmatpush.bf16.msra.mxu2 %v3411_v57 }
 0x63f   : > { %v3301_v36 = vpop.permute.xlu1 %3300 }
 0x640   : > { %v3306_v2 = vsel %vm2331_vm13, %v3301_v36, 0 }
 0x641   : > { %3315 = vmatpush.bf16.msrb.mxu1 %v3306_v2 }
 0x643   : > { %v2703_v27 = vpop.f32.mrf.mxu3 }
 0x644   : > { %v7745_v39 = vadd.f32 %v2703_v27, %v7306_v48 }
 0x646   : > { %v3075_v16 = vsel %vm2121_vm12, %v7745_v39, -inf }
 0x647   : > { %v3343_v51 = vpop.permute.xlu1 %3342  ;;  %3076 = vmax.xlane.f32.xlu1 %v3075_v16 }
 0x648   : > { %v3348_v15 = vsel %vm2331_vm13, %v3343_v51, 0 }
 0x649   : > { %3357 = vmatpush.bf16.msrb.mxu3 %v3348_v15 }
 0x64b   : > { %v2705_v33 = vpop.f32.mrf.mxu3 }
 0x64d   : > { %3441 = vmatpush.bf16.msra.mxu3 %v3432_v44 }
 0x64f   : > { %v3364_v62 = vpop.permute.xlu1 %3363 }
 0x650   : > { %v3369_v11 = vsel %vm2331_vm13, %v3364_v62, 0 }
 0x651   : > { %3378 = vmatpush.bf16.msra.mxu0 %v3369_v11 }
 0x653   : > { %v2795_v43 = vpop.f32.mrf.mxu3 }
 0x654   : > { %v7763_v10 = vadd.f32 %v2795_v43, %v7306_v48 }
 0x656   : > { %v3087_v38 = vsel %vm2121_vm12, %v7763_v10, -inf }
 0x657   : > { %v3385_v55 = vpop.permute.xlu1 %3384 }
 0x658   : > { %v3390_v14 = vsel %vm2331_vm13, %v3385_v55, 0 }
 0x659   : > { %3399 = vmatpush.bf16.msra.mxu1 %v3390_v14 }
 0x65b   : > { %v2797_v54 = vpop.f32.mrf.mxu3 }
 0x65e   : > { %v7753_v8 = vpop.f32.mrf.mxu0 }
 0x666   : > { %v2640_v63 = vpop.f32.mrf.mxu0 }
 0x66e   : > { %v2726_v1 = vpop.f32.mrf.mxu0 }
 0x66f   : > { %v7756_v47 = vadd.f32 %v2726_v1, %v7306_v48 }
 0x670   : > { %v7758_v26 = vpop.f32.mrf.mxu1 }
 0x671   : > { %v3078_v6 = vsel %vm2121_vm12, %v7756_v47, -inf }
 0x672   : > { %3079 = vmax.xlane.f32.xlu2 %v3078_v6 }
 0x676   : > { %v2728_v9 = vpop.f32.mrf.mxu0 }
 0x678   : > { %v2661_v30 = vpop.f32.mrf.mxu1 }
 0x67a   : > { %3088 = vmax.xlane.f32.xlu2 %v3087_v38 }
 0x67e   : > { %v2818_v31 = vpop.f32.mrf.mxu0  ;;  %v7767_v59 = vpop.f32.mrf.mxu2 }
 0x67f   : > { %v7775_v23 = vadd.f32 %v2818_v31, %v7306_v48 }
 0x680   : > { %v2749_v18 = vpop.f32.mrf.mxu1 }
 0x681   : > { %v7770_v58 = vadd.f32 %v2749_v18, %v7306_v48  ;;  %v3090_v20 = vsel %vm2121_vm12, %v7775_v23, -inf }
 0x683   : > { %v3081_v34 = vsel %vm2121_vm12, %v7770_v58, -inf }
 0x684   : > { %3082 = vmax.xlane.f32.xlu0 %v3081_v34 }
 0x686   : > { %v2820_v53 = vpop.f32.mrf.mxu0  ;;  %v2682_v0 = vpop.f32.mrf.mxu2 }
 0x688   : > { %v2751_v40 = vpop.f32.mrf.mxu1 }
 0x689   : > { %v7819_v40 = vpop.permute.xlu1 %3468 }
 0x68c   : > { %3091 = vmax.xlane.f32.xlu0 %v3090_v20 }
 0x68e   : > { %v2910_v21 = vpop.f32.mrf.mxu0  ;;  %v2772_v19 = vpop.f32.mrf.mxu2 }
 0x68f   : > { %v7785_v27 = vadd.f32 %v2772_v19, %v7306_v48  ;;  %v7795_v62 = vadd.f32 %v2910_v21, %v7306_v48 }
 0x690   : > { %v2841_v5 = vpop.f32.mrf.mxu1 }
 0x691   : > { %v7780_v57 = vadd.f32 %v2841_v5, %v7306_v48  ;;  %v3084_v51 = vsel %vm2121_vm12, %v7785_v27, -inf  ;;  %v3102_v54 = vsel %vm2121_vm12, %v7795_v62, -inf }
 0x693   : > { %v3093_v32 = vsel %vm2121_vm12, %v7780_v57, -inf }
 0x694   : > { %3094 = vmax.xlane.f32.xlu1 %v3093_v32 }
 0x696   : > { %v2912_v36 = vpop.f32.mrf.mxu0  ;;  %v2774_v2 = vpop.f32.mrf.mxu2 }
 0x698   : > { %v2843_v29 = vpop.f32.mrf.mxu1 }
 0x69c   : > { %v2887_v16 = vpop.f32.mrf.mxu3  ;;  %3085 = vmax.xlane.f32.xlu1 %v3084_v51 }
 0x69d   : > { %v7790_v15 = vadd.f32 %v2887_v16, %v7306_v48 }
 0x69e   : > { %v2864_v44 = vpop.f32.mrf.mxu2 }
 0x69f   : > { %v3099_v33 = vsel %vm2121_vm12, %v7790_v15, -inf  ;;  %v7798_v11 = vadd.f32 %v2864_v44, %v7306_v48 }
 0x6a0   : > { %3100 = vmax.xlane.f32.xlu0 %v3099_v33  ;;  %v2933_v43 = vpop.f32.mrf.mxu1 }
 0x6a1   : > { %v3096_v55 = vsel %vm2121_vm12, %v7798_v11, -inf  ;;  %v7805_v1 = vadd.f32 %v2933_v43, %v7306_v48 }
 0x6a2   : > { %3097 = vmax.xlane.f32.xlu2 %v3096_v55 }
 0x6a3   : > { %v3105_v30 = vsel %vm2121_vm12, %v7805_v1, -inf }
 0x6a4   : > { %v2889_v14 = vpop.f32.mrf.mxu3  ;;  %3103 = vmax.xlane.f32.xlu1 %v3102_v54 }
 0x6a6   : > { %v2866_v63 = vpop.f32.mrf.mxu2 }
 0x6a8   : > { %v2935_v6 = vpop.f32.mrf.mxu1 }
 0x6ac   : > { %v2979_v9 = vpop.f32.mrf.mxu3  ;;  %3106 = vmax.xlane.f32.xlu1 %v3105_v30  ;;  %v7843_v30 = vpop.permute.xlu2 %3447 }
 0x6ad   : > { %v7810_v38 = vadd.f32 %v2979_v9, %v7306_v48  ;;  %v3002_v31 = vpop.f32.mrf.mxu0 }
 0x6ae   : > { %v2956_v18 = vpop.f32.mrf.mxu2  ;;  %v7822_v20 = vadd.f32 %v3002_v31, %v7306_v48 }
 0x6af   : > { %v3111_v34 = vsel %vm2121_vm12, %v7810_v38, -inf  ;;  %v7815_v53 = vadd.f32 %v2956_v18, %v7306_v48 }
 0x6b0   : > { %3112 = vmax.xlane.f32.xlu0 %v3111_v34  ;;  %v3114_v2 = vsel %vm2121_vm12, %v7822_v20, -inf }
 0x6b1   : > { %v3108_v0 = vsel %vm2121_vm12, %v7815_v53, -inf }
 0x6b2   : > { %3109 = vmax.xlane.f32.xlu2 %v3108_v0 }
 0x6b4   : > { %v2981_v21 = vpop.f32.mrf.mxu3 }
 0x6b5   : > { %v3004_v19 = vpop.f32.mrf.mxu0  ;;  %v3025_v5 = vpop.f32.mrf.mxu1 }
 0x6b6   : > { %v7825_v32 = vadd.f32 %v3025_v5, %v7306_v48  ;;  %v2958_v36 = vpop.f32.mrf.mxu2 }
 0x6b8   : > { %3115 = vmax.xlane.f32.xlu0 %v3114_v2  ;;  %v3117_v29 = vsel %vm2121_vm12, %v7825_v32, -inf }
 0x6b9   : > { %3118 = vmax.xlane.f32.xlu1 %v3117_v29 }
 0x6ba   : > { %v3077_v16 = vpop.xlane.xlu1 %3076 }
 0x6bb   : > { %v3126_v51 = vsub.f32 %v7745_v39, %v3077_v16 }
 0x6bc   : > { %v7832_v44 = vpop.f32.mrf.mxu3 }
 0x6bd   : > { %v3143_v33 = vmul.f32 1.442695, %v3126_v51  ;;  %v3027_v43 = vpop.f32.mrf.mxu1 }
 0x6be   : > { %v3048_v55 = vpop.f32.mrf.mxu2 }
 0x6bf   : > { %5972 = vpow2.f32 %v3143_v33  ;;  %v7835_v14 = vadd.f32 %v3048_v55, %v7306_v48 }
 0x6c1   : > { %v3120_v54 = vsel %vm2121_vm12, %v7835_v14, -inf }
 0x6c2   : > { %3121 = vmax.xlane.f32.xlu0 %v3120_v54 }
 0x6c4   : > { %v3073_v63 = vpop.f32.mrf.mxu3 }
 0x6c5   : > { %v7839_v6 = vpop.eup %5972 }
 0x6c6   : > { %v3050_v9 = vpop.f32.mrf.mxu2  ;;  %v3177_v39 = vsel %vm2121_vm12, %v7839_v6, 0.0 }
 0x6c7   : > { %3178 = vadd.xlane.f32.xlu2 %v3177_v39 }
 0x6e5   : > { %v3080_v31 = vpop.xlane.xlu2 %3079 }
 0x6e6   : > { %v3127_v18 = vsub.f32 %v7756_v47, %v3080_v31 }
 0x6e8   : > { %v3145_v34 = vmul.f32 1.442695, %v3127_v18 }
 0x6ea   : > { %5974 = vpow2.f32 %v3145_v34 }
 0x6ed   : > { %v3089_v0 = vpop.xlane.xlu2 %3088 }
 0x6ee   : > { %v3130_v21 = vsub.f32 %v7763_v10, %v3089_v0 }
 0x6f0   : > { %v7847_v19 = vpop.eup %5974  ;;  %v3151_v5 = vmul.f32 1.442695, %v3130_v21 }
 0x6f1   : > { %v3180_v36 = vsel %vm2121_vm12, %v7847_v19, 0.0 }
 0x6f2   : > { %5976 = vpow2.f32 %v3151_v5  ;;  %3181 = vadd.xlane.f32.xlu0 %v3180_v36 }
 0x6f7   : > { %v3083_v29 = vpop.xlane.xlu0 %3082 }
 0x6f8   : > { %v7851_v2 = vpop.eup %5976  ;;  %v3128_v16 = vsub.f32 %v7770_v58, %v3083_v29 }
 0x6f9   : > { %v3189_v47 = vsel %vm2121_vm12, %v7851_v2, 0.0 }
 0x6fa   : > { %3190 = vadd.xlane.f32.xlu0 %v3189_v47  ;;  %v3147_v51 = vmul.f32 1.442695, %v3128_v16 }
 0x6fc   : > { %5978 = vpow2.f32 %v3147_v51 }
 0x6ff   : > { %v3092_v10 = vpop.xlane.xlu0 %3091 }
 0x700   : > { %v3131_v33 = vsub.f32 %v7775_v23, %v3092_v10 }
 0x702   : > { %v7857_v43 = vpop.eup %5978  ;;  %v3153_v55 = vmul.f32 1.442695, %v3131_v33 }
 0x703   : > { %v3183_v54 = vsel %vm2121_vm12, %v7857_v43, 0.0 }
 0x704   : > { %5980 = vpow2.f32 %v3153_v55  ;;  %3184 = vadd.xlane.f32.xlu2 %v3183_v54 }
 0x707   : > { %v3095_v63 = vpop.xlane.xlu1 %3094 }
 0x708   : > { %v3132_v58 = vsub.f32 %v7780_v57, %v3095_v63 }
 0x70a   : > { %v7862_v9 = vpop.eup %5980  ;;  %v3155_v39 = vmul.f32 1.442695, %v3132_v58 }
 0x70b   : > { %v3192_v31 = vsel %vm2121_vm12, %v7862_v9, 0.0 }
 0x70c   : > { %5982 = vpow2.f32 %v3155_v39  ;;  %3193 = vadd.xlane.f32.xlu2 %v3192_v31 }
 0x70e   : > { %3510 = vrot.lane.b32.xlu0 %v7205_v35, %s6347_s4 }
 0x70f   : > { %v3086_v23 = vpop.xlane.xlu1 %3085 }
 0x710   : > { %v3129_v18 = vsub.f32 %v7785_v27, %v3086_v23 }
 0x712   : > { %v7869_v34 = vpop.eup %5982  ;;  %v3149_v0 = vmul.f32 1.442695, %v3129_v18 }
 0x713   : > { %v3101_v21 = vpop.xlane.xlu0 %3100  ;;  %v3195_v5 = vsel %vm2121_vm12, %v7869_v34, 0.0 }
 0x714   : > { %v3134_v57 = vsub.f32 %v7790_v15, %v3101_v21  ;;  %5984 = vpow2.f32 %v3149_v0  ;;  %3196 = vadd.xlane.f32.xlu2 %v3195_v5 }
 0x715   : > { %v3098_v47 = vpop.xlane.xlu2 %3097 }
 0x716   : > { %v3159_v36 = vmul.f32 1.442695, %v3134_v57  ;;  %v3133_v15 = vsub.f32 %v7798_v11, %v3098_v47 }
 0x717   : > { %v3104_v29 = vpop.xlane.xlu1 %3103 }
 0x718   : > { %5986 = vpow2.f32 %v3159_v36  ;;  %v3135_v16 = vsub.f32 %v7795_v62, %v3104_v29  ;;  %v3157_v54 = vmul.f32 1.442695, %v3133_v15 }
 0x71a   : > { %v7875_v35 = vpop.eup %5984  ;;  %v3161_v27 = vmul.f32 1.442695, %v3135_v16 }
 0x71b   : > { %v3186_v51 = vsel %vm2121_vm12, %v7875_v35, 0.0 }
 0x71c   : > { %3187 = vadd.xlane.f32.xlu2 %v3186_v51  ;;  %5988 = vpow2.f32 %v3161_v27 }
 0x71e   : > { %v7879_v10 = vpop.eup %5986 }
 0x71f   : > { %v3201_v33 = vsel %vm2121_vm12, %v7879_v10, 0.0  ;;  %v3107_v55 = vpop.xlane.xlu1 %3106 }
 0x720   : > { %3202 = vadd.xlane.f32.xlu1 %v3201_v33  ;;  %v3136_v62 = vsub.f32 %v7805_v1, %v3107_v55 }
 0x722   : > { %v3163_v63 = vmul.f32 1.442695, %v3136_v62  ;;  %v7885_v39 = vpop.eup %5988 }
 0x723   : > { %v3113_v58 = vpop.xlane.xlu0 %3112  ;;  %v3204_v11 = vsel %vm2121_vm12, %v7885_v39, 0.0 }
 0x724   : > { %v3138_v31 = vsub.f32 %v7810_v38, %v3113_v58  ;;  %5990 = vpow2.f32 %v3163_v63 }
 0x725   : > { %5992 = vpow2.f32 %v3157_v54  ;;  %v3110_v0 = vpop.xlane.xlu2 %3109 }
 0x726   : > { %v3167_v23 = vmul.f32 1.442695, %v3138_v31  ;;  %v3137_v38 = vsub.f32 %v7815_v53, %v3110_v0 }
 0x728   : > { %3205 = vadd.xlane.f32.xlu1 %v3204_v11  ;;  %5994 = vpow2.f32 %v3167_v23  ;;  %v3165_v47 = vmul.f32 1.442695, %v3137_v38  ;;  %v3453_v23 = vsel %vm2331_vm13, %v7843_v30, 0 }
 0x72a   : > { %v7890_v18 = vpop.eup %5990 }
 0x72b   : > { %v3116_v21 = vpop.xlane.xlu0 %3115  ;;  %v7892_v1 = vpop.eup %5992  ;;  %v3207_v5 = vsel %vm2121_vm12, %v7890_v18, 0.0 }
 0x72c   : > { %v3139_v57 = vsub.f32 %v7822_v20, %v3116_v21  ;;  %3208 = vadd.xlane.f32.xlu2 %v3207_v5  ;;  %v3198_v29 = vsel %vm2121_vm12, %v7892_v1, 0.0 }
 0x72e   : > { %v3169_v36 = vmul.f32 1.442695, %v3139_v57  ;;  %v7900_v16 = vpop.eup %5994 }
 0x72f   : > { %v3213_v27 = vsel %vm2121_vm12, %v7900_v16, 0.0 }
 0x730   : > { %5996 = vpow2.f32 %v3169_v36  ;;  %3199 = vadd.xlane.f32.xlu1 %v3198_v29 }
 0x731   : > { %5998 = vpow2.f32 %v3165_v47 }
 0x734   : > { %3214 = vadd.xlane.f32.xlu2 %v3213_v27 }
 0x735   : > { %v3122_v51 = vpop.xlane.xlu0 %3121 }
 0x736   : > { %v7904_v20 = vpop.eup %5996  ;;  %v3141_v15 = vsub.f32 %v7835_v14, %v3122_v51 }
 0x737   : > { %v3216_v53 = vsel %vm2121_vm12, %v7904_v20, 0.0  ;;  %v7909_v62 = vpop.eup %5998 }
 0x738   : > { %3217 = vadd.xlane.f32.xlu0 %v3216_v53  ;;  %v3173_v33 = vmul.f32 1.442695, %v3141_v15  ;;  %v3210_v54 = vsel %vm2121_vm12, %v7909_v62, 0.0 }
 0x73a   : > { %v3179_v55 = vpop.xlane.xlu2 %3178 }
 0x73b   : > { %6000 = vrcp.f32 %v3179_v55 }
 0x73c   : > { %6002 = vpow2.f32 %v3173_v33 }
 0x740   : > { %3211 = vadd.xlane.f32.xlu0 %v3210_v54 }
 0x741   : > { %v6001_v63 = vpop.eup %6000 }
 0x742   : > { %v3245_v58 = vmul.f32 %v6001_v63, %v7839_v6  ;;  %v7914_v31 = vpop.eup %6002  ;;  %v3119_v6 = vpop.xlane.xlu1 %3118 }
 0x743   : > { %v3222_v11 = vsel %vm2121_vm12, %v7914_v31, 0.0  ;;  %v3140_v0 = vsub.f32 %v7825_v32, %v3119_v6  ;;  %v3474_v32 = vsel %vm2331_vm13, %v7819_v40, 0 }
 0x744   : > { %v3262_v14 = vpack.c.bf16 %v3245_v58, %v3245_v58 }
 0x745   : > { %v3171_v21 = vmul.f32 1.442695, %v3140_v0 }
 0x746   : > { %5600 = vmatmul.msk.bf16.vlgmr.msrb.gmra.mxu0 %vm2121_vm12, %v3262_v14 }
 0x747   : > { %3462 = vmatpush.bf16.msrb.mxu0 %v3453_v23 }
 0x748   : > { %3223 = vadd.xlane.f32.xlu0 %v3222_v11 }
 0x749   : > { %3489 = vrot.lane.b32.xlu1 %v7196_v28, %s6347_s4 }
 0x74c   : > { %3531 = vrot.lane.b32.xlu2 %v7215_v46, %s6347_s4  ;;  %v7933_v46 = vadd.f32 %v7832_v44, %v7306_v48 }
 0x74e   : > { %v3123_v38 = vsel %vm2121_vm12, %v7933_v46, -inf }
 0x75c   : > { %3573 = vrot.lane.b32.xlu0 %v7239_v3, %s6347_s4 }
 0x764   : > { %3615 = vrot.lane.b32.xlu0 %v7265_v7, %s6347_s4 }
 0x765   : > { %v3182_v30 = vpop.xlane.xlu0 %3181 }
 0x766   : > { %6004 = vrcp.f32 %v3182_v30 }
 0x767   : > { %6006 = vpow2.f32 %v3171_v21 }
 0x76c   : > { %v6005_v57 = vpop.eup %6004 }
 0x76d   : > { %v3246_v5 = vmul.f32 %v6005_v57, %v7847_v19  ;;  %v3191_v28 = vpop.xlane.xlu0 %3190  ;;  %v7938_v7 = vpop.eup %6006 }
 0x76e   : > { %6008 = vrcp.f32 %v3191_v28  ;;  %v3219_v48 = vsel %vm2121_vm12, %v7938_v7, 0.0 }
 0x76f   : > { %v3263_v3 = vpack.c.bf16 %v3246_v5, %v3246_v5 }
 0x771   : > { %5601 = vmatmul.msk.bf16.vlgmr.msrb.gmra.mxu1 %vm2121_vm12, %v3263_v3 }
 0x772   : > { %3483 = vmatpush.bf16.msrb.mxu1 %v3474_v32 }
 0x773   : > { %3124 = vmax.xlane.f32.xlu1 %v3123_v38 }
 0x774   : > { %v6009_v19 = vpop.eup %6008 }
 0x775   : > { %v3249_v36 = vmul.f32 %v6009_v19, %v7851_v2  ;;  %3220 = vadd.xlane.f32.xlu2 %v3219_v48 }
 0x777   : > { %v3266_v44 = vpack.c.bf16 %v3249_v36, %v3249_v36  ;;  %v3185_v29 = vpop.xlane.xlu2 %3184 }
 0x778   : > { %6010 = vrcp.f32 %v3185_v29 }
 0x779   : > { %5604 = vmatmul.msk.bf16.vlgmr.msra.gmra.mxu0 %vm2121_vm12, %v3266_v44 }
 0x77e   : > { %v6011_v40 = vpop.eup %6010 }
 0x77f   : > { %v3247_v47 = vmul.f32 %v6011_v40, %v7857_v43  ;;  %v3194_v27 = vpop.xlane.xlu2 %3193 }
 0x780   : > { %6012 = vrcp.f32 %v3194_v27  ;;  %v3511_v23 = vpop.permute.xlu0 %3510 }
 0x781   : > { %v3264_v51 = vpack.c.bf16 %v3247_v47, %v3247_v47 }
 0x783   : > { %5602 = vmatmul.msk.bf16.vlgmr.msrb.gmra.mxu2 %vm2121_vm12, %v3264_v51 }
 0x786   : > { %v6013_v15 = vpop.eup %6012 }
 0x787   : > { %v3250_v2 = vmul.f32 %v6013_v15, %v7862_v9  ;;  %v3197_v53 = vpop.xlane.xlu2 %3196 }
 0x788   : > { %6014 = vrcp.f32 %v3197_v53 }
 0x789   : > { %v3267_v33 = vpack.c.bf16 %v3250_v2, %v3250_v2 }
 0x78b   : > { %5605 = vmatmul.msk.bf16.vlgmr.msra.gmra.mxu1 %vm2121_vm12, %v3267_v33 }
 0x78c   : > { %3552 = vrot.lane.b32.xlu1 %v7220_v49, %s6347_s4 }
 0x78e   : > { %v6015_v55 = vpop.eup %6014 }
 0x78f   : > { %v3251_v54 = vmul.f32 %v6015_v55, %v7869_v34  ;;  %v3188_v43 = vpop.xlane.xlu2 %3187  ;;  %v3516_v34 = vsel %vm2331_vm13, %v3511_v23, 0 }
 0x790   : > { %6016 = vrcp.f32 %v3188_v43 }
 0x791   : > { %v3268_v63 = vpack.c.bf16 %v3251_v54, %v3251_v54 }
 0x793   : > { %v3203_v58 = vpop.xlane.xlu1 %3202  ;;  %5606 = vmatmul.msk.bf16.vlgmr.msra.gmra.mxu2 %vm2121_vm12, %v3268_v63 }
 0x794   : > { %6018 = vrcp.f32 %v3203_v58  ;;  %3594 = vrot.lane.b32.xlu1 %v7250_v12, %s6347_s4 }
 0x796   : > { %v6017_v9 = vpop.eup %6016 }
 0x797   : > { %v3248_v14 = vmul.f32 %v6017_v9, %v7875_v35 }
 0x799   : > { %v3265_v11 = vpack.c.bf16 %v3248_v14, %v3248_v14 }
 0x79a   : > { %v6019_v49 = vpop.eup %6018 }
 0x79b   : > { %v3253_v6 = vmul.f32 %v6019_v49, %v7879_v10  ;;  %v3206_v0 = vpop.xlane.xlu1 %3205  ;;  %5603 = vmatmul.msk.bf16.vlgmr.msrb.gmra.mxu3 %vm2121_vm12, %v3265_v11 }
 0x79c   : > { %6020 = vrcp.f32 %v3206_v0  ;;  %3525 = vmatpush.bf16.msrb.mxu3 %v3516_v34 }
 0x79d   : > { %v3270_v30 = vpack.c.bf16 %v3253_v6, %v3253_v6 }
 0x79f   : > { %5608 = vmatmul.msk.bf16.vlgmr.msrb.gmra.mxu0 %vm2121_vm12, %v3270_v30  ;;  %v3209_v21 = vpop.xlane.xlu2 %3208 }
 0x7a2   : > { %v6021_v12 = vpop.eup %6020 }
 0x7a3   : > { %v3254_v57 = vmul.f32 %v6021_v12, %v7885_v39  ;;  %v3200_v35 = vpop.xlane.xlu1 %3199 }
 0x7a4   : > { %6022 = vrcp.f32 %v3200_v35 }
 0x7a5   : > { %v3271_v5 = vpack.c.bf16 %v3254_v57, %v3254_v57 }
 0x7a7   : > { %5609 = vmatmul.msk.bf16.vlgmr.msrb.gmra.mxu1 %vm2121_vm12, %v3271_v5  ;;  %v3215_v10 = vpop.xlane.xlu2 %3214 }
 0x7a8   : > { %6024 = vrcp.f32 %v3215_v10 }
 0x7a9   : > { %6026 = vrcp.f32 %v3209_v21 }
 0x7aa   : > { %v6023_v28 = vpop.eup %6022 }
 0x7ab   : > { %v3252_v3 = vmul.f32 %v6023_v28, %v7892_v1  ;;  %v3218_v32 = vpop.xlane.xlu0 %3217 }
 0x7ad   : > { %v3269_v38 = vpack.c.bf16 %v3252_v3, %v3252_v3 }
 0x7ae   : > { %v6025_v19 = vpop.eup %6024 }
 0x7af   : > { %5607 = vmatmul.msk.bf16.vlgmr.msra.gmra.mxu3 %vm2121_vm12, %v3269_v38  ;;  %v3257_v36 = vmul.f32 %v6025_v19, %v7900_v16  ;;  %v3532_v48 = vpop.permute.xlu2 %3531  ;;  %v6027_v40 = vpop.eup %6026 }
 0x7b0   : > { %v3537_v39 = vsel %vm2331_vm13, %v3532_v48, 0  ;;  %v3255_v1 = vmul.f32 %v6027_v40, %v7890_v18 }
 0x7b1   : > { %v3274_v44 = vpack.c.bf16 %v3257_v36, %v3257_v36  ;;  %3546 = vmatpush.bf16.msra.mxu0 %v3537_v39 }
 0x7b2   : > { %v3272_v2 = vpack.c.bf16 %v3255_v1, %v3255_v1 }
 0x7b3   : > { %v3212_v29 = vpop.xlane.xlu0 %3211 }
 0x7b4   : > { %6028 = vrcp.f32 %v3212_v29  ;;  %5612 = vmatmul.msk.bf16.vlgmr.msra.gmra.mxu0 %vm2121_vm12, %v3274_v44 }
 0x7ba   : > { %v6029_v47 = vpop.eup %6028 }
 0x7bb   : > { %v3256_v27 = vmul.f32 %v6029_v47, %v7909_v62  ;;  %v3490_v51 = vpop.permute.xlu1 %3489  ;;  %v3224_v33 = vpop.xlane.xlu0 %3223 }
 0x7bc   : > { %v3495_v15 = vsel %vm2331_vm13, %v3490_v51, 0 }
 0x7bd   : > { %v3273_v16 = vpack.c.bf16 %v3256_v27, %v3256_v27  ;;  %3504 = vmatpush.bf16.msrb.mxu2 %v3495_v15 }
 0x7bf   : > { %5611 = vmatmul.msk.bf16.vlgmr.msrb.gmra.mxu3 %vm2121_vm12, %v3273_v16 }
 0x7c0   : > { %5610 = vmatmul.msk.bf16.vlgmr.msrb.gmra.mxu2 %vm2121_vm12, %v3272_v2  ;;  %v5700_v2 = vld [vmem:[%s6590_s12 + $0x8] sm:$0xff] }
 0x7c3   : > { %v7973_v53 = vpop.f32.mrf.mxu0 }
 0x7cb   : > { %v3298_v55 = vpop.f32.mrf.mxu0 }
 0x7ce   : > { %v3574_v54 = vpop.permute.xlu0 %3573 }
 0x7cf   : > { %v3579_v43 = vsel %vm2331_vm13, %v3574_v54, 0 }
 0x7d0   : > { %3588 = vmatpush.bf16.msra.mxu2 %v3579_v43 }
 0x7d6   : > { %v3616_v18 = vpop.permute.xlu0 %3615 }
 0x7d7   : > { %v3621_v62 = vsel %vm2331_vm13, %v3616_v18, 0 }
 0x7d8   : > { %3630 = vmatpush.bf16.msrb.mxu0 %v3621_v62 }
 0x7dc   : > { %3783 = vmatpush.bf16.msra.mxu0 %v5700_v2 }
 0x7e6   : > { %v3125_v63 = vpop.xlane.xlu1 %3124 }
 0x7e7   : > { %v3142_v58 = vsub.f32 %v7933_v46, %v3125_v63 }
 0x7e8   : > { %v3221_v14 = vpop.xlane.xlu2 %3220 }
 0x7e9   : > { %v3175_v9 = vmul.f32 1.442695, %v3142_v58  ;;  %6030 = vrcp.f32 %v3221_v14 }
 0x7eb   : > { %6032 = vpow2.f32 %v3175_v9 }
 0x7ec   : > { %6034 = vrcp.f32 %v3218_v32 }
 0x7ed   : > { %6036 = vrcp.f32 %v3224_v33 }
 0x7ee   : > { %v7978_v23 = vpop.f32.mrf.mxu1 }
 0x7ef   : > { %v5850_v49 = vpack.i.bf16 %v7978_v23, %v7973_v53  ;;  %v6031_v11 = vpop.eup %6030  ;;  %v5699_v53 = vld [vmem:[%s6590_s12] sm:$0xff]  ;;  %s9200_s12 = sld [smem:[#allocation35_spill]] (!%p5668_p5) }
 0x7f0   : > { %v3259_v0 = vmul.f32 %v6031_v11, %v7938_v7  ;;  %3784 = vmatpush.bf16.msra.mxu0 %v5699_v53 }
 0x7f1   : > { %v7982_v6 = vpop.eup %6032 }
 0x7f2   : > { %v3225_v34 = vsel %vm2121_vm12, %v7982_v6, 0.0  ;;  %v3276_v30 = vpack.c.bf16 %v3259_v0, %v3259_v0  ;;  %v6035_v12 = vpop.eup %6034 }
 0x7f3   : > { %3226 = vadd.xlane.f32.xlu1 %v3225_v34  ;;  %v3258_v57 = vmul.f32 %v6035_v12, %v7904_v20  ;;  %v6037_v28 = vpop.eup %6036 }
 0x7f4   : > { %5614 = vmatmul.msk.bf16.vlgmr.msra.gmra.mxu2 %vm2121_vm12, %v3276_v30  ;;  %v3260_v3 = vmul.f32 %v6037_v28, %v7914_v31 }
 0x7f5   : > { %v3275_v7 = vpack.c.bf16 %v3258_v57, %v3258_v57 }
 0x7f6   : > { %v3319_v46 = vpop.f32.mrf.mxu1  ;;  %v3380_v21 = vpop.f32.mrf.mxu0  ;;  %v3277_v36 = vpack.c.bf16 %v3260_v3, %v3260_v3 }
 0x7fe   : > { %v3553_v35 = vpop.permute.xlu1 %3552  ;;  %v3382_v5 = vpop.f32.mrf.mxu0 }
 0x7ff   : > { %v3558_v10 = vsel %vm2331_vm13, %v3553_v35, 0 }
 0x800   : > { %3567 = vmatpush.bf16.msra.mxu1 %v3558_v10 }
 0x803   : > { %5613 = vmatmul.msk.bf16.vlgmr.msra.gmra.mxu1 %vm2121_vm12, %v3275_v7 }
 0x804   : > { %5716 = vmatpush.bf16.msrb.mxu1 %v5700_v2 }
 0x806   : > { %v3595_v32 = vpop.permute.xlu1 %3594  ;;  %v3338_v19 = vpop.f32.mrf.mxu2 }
 0x807   : > { %v3600_v38 = vsel %vm2331_vm13, %v3595_v32, 0 }
 0x808   : > { %3609 = vmatpush.bf16.msra.mxu3 %v3600_v38  ;;  %v3401_v48 = vpop.f32.mrf.mxu1  ;;  %5717 = vmatpush.bf16.msrb.mxu1 %v5699_v53 }
 0x809   : > { %v5820_v20 = vpack.i.bf16 %v3401_v48, %v3380_v21 }
 0x80b   : > { %5615 = vmatmul.msk.bf16.vlgmr.msra.gmra.mxu3 %vm2121_vm12, %v3277_v36  ;;  %5821 = vrot.lane.b32.xlu2 %v5820_v20, %s6348_s18 }
 0x80e   : > { %v3340_v39 = vpop.f32.mrf.mxu2 }
 0x810   : > { %v3403_v44 = vpop.f32.mrf.mxu1 }
 0x816   : > { %v3422_v29 = vpop.f32.mrf.mxu2 }
 0x81c   : > { %v3464_v40 = vpop.f32.mrf.mxu0 }
 0x81e   : > { %v3359_v31 = vpop.f32.mrf.mxu3  ;;  %v3424_v47 = vpop.f32.mrf.mxu2 }
 0x81f   : > { %v5855_v1 = vpack.i.bf16 %v3359_v31, %v3338_v19 }
 0x824   : > { %v3466_v27 = vpop.f32.mrf.mxu0  ;;  %v3485_v51 = vpop.f32.mrf.mxu1 }
 0x825   : > { %v5830_v62 = vpack.i.bf16 %v3485_v51, %v3464_v40 }
 0x826   : > { %v3361_v15 = vpop.f32.mrf.mxu3 }
 0x82c   : > { %v3487_v16 = vpop.f32.mrf.mxu1 }
 0x831   : > { %v3548_v55 = vpop.f32.mrf.mxu0 }
 0x832   : > { %v3443_v33 = vpop.f32.mrf.mxu3 }
 0x833   : > { %v5825_v54 = vpack.i.bf16 %v3443_v33, %v3422_v29 }
 0x835   : > { %5826 = vrot.lane.b32.xlu0 %v5825_v54, %s6348_s18 }
 0x839   : > { %v3550_v18 = vpop.f32.mrf.mxu0 }
 0x83a   : > { %v3445_v43 = vpop.f32.mrf.mxu3 }
 0x83d   : > { %5831 = vrot.lane.b32.xlu0 %v5830_v62, %s6348_s18 }
 0x842   : > { %v3527_v63 = vpop.f32.mrf.mxu3 }
 0x843   : > { %v3506_v58 = vpop.f32.mrf.mxu2 }
 0x844   : > { %v5835_v9 = vpack.i.bf16 %v3527_v63, %v3506_v58 }
 0x846   : > { %5836 = vrot.lane.b32.xlu0 %v5835_v9, %s6348_s18 }
 0x84a   : > { %v3529_v14 = vpop.f32.mrf.mxu3 }
 0x84b   : > { %v3508_v23 = vpop.f32.mrf.mxu2 }
 0x84c   : > { %v6142_v23 = vld [vmem:[#allocation2 + $0x20] sm:$0xff] }
 0x84e   : > { %5851 = vrot.lane.b32.xlu0 %v5850_v49, %s6348_s18 }
 0x865   : > { %v5822_v0 = vpop.permute.xlu2 %5821 }
 0x866   : > { %v3227_v11 = vpop.xlane.xlu1 %3226  ;;  %v5824_v34 = vunpack.i.h.bf16 %v5822_v0  ;;  %v5823_v30 = vunpack.i.l.bf16 %v5822_v0 }
 0x867   : > { %6038 = vrcp.f32 %v3227_v11 }
 0x868   : > { %v3709_v46 = vsel %vm1717_vm0, %v7683_v56, %v5824_v34  ;;  %v3708_v21 = vsel %vm1717_vm0, %v7703_v13, %v5823_v30 }
 0x869   : > { %v3723_v12 = vpack.c.bf16 %v3709_v46, %v3708_v21 }
 0x86b   : > { %5627 = vmatmul.msk.bf16.vlgmr.msrb.gmra.mxu1 %vm1160_vm2, %v3723_v12 }
 0x86d   : > { %v6039_v57 = vpop.eup %6038 }
 0x86e   : > { %v3261_v35 = vmul.f32 %v6039_v57, %v7982_v6 }
 0x870   : > { %v3278_v5 = vpack.c.bf16 %v3261_v35, %v3261_v35 }
 0x872   : > { %5616 = vmatmul.msk.bf16.vlgmr.msrb.gmra.mxu0 %vm2121_vm12, %v3278_v5 }
 0x877   : > { %v3590_v49 = vpop.f32.mrf.mxu2 }
 0x87f   : > { %v3592_v7 = vpop.f32.mrf.mxu2 }
 0x880   : > { %v3569_v10 = vpop.f32.mrf.mxu1 }
 0x881   : > { %v5840_v28 = vpack.i.bf16 %v3569_v10, %v3548_v55 }
 0x883   : > { %5841 = vrot.lane.b32.xlu2 %v5840_v28, %s6348_s18 }
 0x888   : > { %v3571_v3 = vpop.f32.mrf.mxu1 }
 0x88b   : > { %5856 = vrot.lane.b32.xlu2 %v5855_v1, %s6348_s18 }
 0x88e   : > { %v3611_v56 = vpop.f32.mrf.mxu3 }
 0x88f   : > { %v5845_v13 = vpack.i.bf16 %v3611_v56, %v3590_v49  ;;  %v6143_v49 = vld [vmem:[#allocation2 + $0x28] sm:$0xff] }
 0x891   : > { %5846 = vrot.lane.b32.xlu1 %v5845_v13, %s6348_s18 }
 0x896   : > { %v3613_v32 = vpop.f32.mrf.mxu3 }
 0x8a7   : > { %v5827_v38 = vpop.permute.xlu0 %5826 }
 0x8a8   : > { %v5829_v19 = vunpack.i.h.bf16 %v5827_v38  ;;  %v5828_v6 = vunpack.i.l.bf16 %v5827_v38  ;;  %v6145_v38 = vld [vmem:[#allocation2 + $0x38] sm:$0xff] }
 0x8aa   : > { %v3711_v36 = vsel %vm1717_vm0, %v7718_v42, %v5829_v19  ;;  %v3710_v48 = vsel %vm1717_vm0, %v7701_v25, %v5828_v6 }
 0x8ab   : > { %v3724_v20 = vpack.c.bf16 %v3711_v36, %v3710_v48 }
 0x8ad   : > { %5628 = vmatmul.msk.bf16.gmra.mxu1 %vm1160_vm2, %v3724_v20  ;;  %v6146_v20 = vld [vmem:[#allocation2 + $0x40] sm:$0xff] }
 0x8af   : > { %v5832_v39 = vpop.permute.xlu0 %5831 }
 0x8b0   : > { %v5834_v44 = vunpack.i.h.bf16 %v5832_v39  ;;  %v5833_v29 = vunpack.i.l.bf16 %v5832_v39 }
 0x8b2   : > { %v3713_v40 = vsel %vm1717_vm0, %v7716_v52, %v5834_v44  ;;  %v3712_v31 = vsel %vm1717_vm0, %v7695_v60, %v5833_v29 }
 0x8b3   : > { %v3725_v1 = vpack.c.bf16 %v3713_v40, %v3712_v31  ;;  %v6147_v31 = vld [vmem:[#allocation2 + $0x48] sm:$0xff] }
 0x8b8   : > { %v5837_v47 = vpop.permute.xlu0 %5836 }
 0x8b9   : > { %v5839_v16 = vunpack.i.h.bf16 %v5837_v47  ;;  %v5838_v2 = vunpack.i.l.bf16 %v5837_v47 }
 0x8bb   : > { %v3715_v60 = vsel %vm1717_vm0, %v7729_v50, %v5839_v16  ;;  %v3714_v52 = vsel %vm1717_vm0, %v7723_v17, %v5838_v2  ;;  %v8041_v17 = vld [vmem:[%s9177_s20] ss:$0 sm:$0xff] }
 0x8bc   : > { %v3726_v33 = vpack.c.bf16 %v3715_v60, %v3714_v52 }
 0x8bd   : > { %5629 = vmatmul.msk.bf16.gmra.mxu1 %vm1160_vm2, %v3725_v1 }
 0x8c0   : > { %v5852_v42 = vpop.permute.xlu0 %5851 }
 0x8c1   : > { %v5854_v27 = vunpack.i.h.bf16 %v5852_v42  ;;  %v5853_v51 = vunpack.i.l.bf16 %v5852_v42 }
 0x8c3   : > { %v3705_v25 = vsel %vm1717_vm0, %v7693_v61, %v5854_v27  ;;  %v3704_v15 = vsel %vm1717_vm0, %v7663_v45, %v5853_v51  ;;  %v6148_v51 = vld [vmem:[#allocation2 + $0x50] sm:$0xff] }
 0x8c4   : > { %v3721_v53 = vpack.c.bf16 %v3705_v25, %v3704_v15 }
 0x8c6   : > { %5625 = vmatmul.msk.bf16.vlgmr.msra.gmra.mxu0 %vm1160_vm2, %v3721_v53 }
 0x8cd   : > { %5630 = vmatmul.msk.bf16.gmra.mxu1 %vm1160_vm2, %v3726_v33 }
 0x8dd   : > { %v5842_v55 = vpop.permute.xlu2 %5841 }
 0x8de   : > { %v5844_v61 = vunpack.i.h.bf16 %v5842_v55  ;;  %v5843_v54 = vunpack.i.l.bf16 %v5842_v55 }
 0x8e0   : > { %v3717_v45 = vsel %vm1717_vm0, %v7737_v24, %v5844_v61  ;;  %v3716_v43 = vsel %vm1717_vm0, %v7709_v37, %v5843_v54 }
 0x8e1   : > { %v3727_v18 = vpack.c.bf16 %v3717_v45, %v3716_v43  ;;  %v6149_v43 = vld [vmem:[#allocation2 + $0x58] sm:$0xff] }
 0x8e3   : > { %5631 = vmatmul.msk.bf16.gmra.mxu1 %vm1160_vm2, %v3727_v18 }
 0x8e5   : > { %v5857_v62 = vpop.permute.xlu2 %5856 }
 0x8e6   : > { %v5859_v50 = vunpack.i.h.bf16 %v5857_v62  ;;  %v5858_v63 = vunpack.i.l.bf16 %v5857_v62 }
 0x8e8   : > { %v3707_v58 = vsel %vm1717_vm0, %v7674_v22, %v5859_v50  ;;  %v3706_v24 = vsel %vm1717_vm0, %v7667_v4, %v5858_v63  ;;  %v3796_v37 = vpop.f32.mrf.mxu1  ;;  %v6150_v63 = vld [vmem:[#allocation2 + $0x60] sm:$0xff] }
 0x8e9   : > { %v3722_v9 = vpack.c.bf16 %v3707_v58, %v3706_v24  ;;  %v3797_v14 = vadd.f32 %v8041_v17, %v3796_v37 }
 0x8eb   : > { %5626 = vmatmul.msk.bf16.gmra.mxu0 %vm1160_vm2, %v3722_v9  ;;  %v8049_v11 = vadd.f32 %v6142_v23, %v3797_v14 }
 0x8ed   : > { %v3861_v0 = vsel %vm1160_vm2, %v8049_v11, 0.0 }
 0x8ee   : > { %3862 = vadd.xlane.f32.xlu2 %v3861_v0 }
 0x8ef   : > { %v3632_v34 = vpop.f32.mrf.mxu0 }
 0x8f0   : > { %3685 = vrot.lane.b32.xlu0 %v3632_v34, %s6348_s18  ;;  %v3798_v35 = vpop.f32.mrf.mxu1 }
 0x8f1   : > { %v3799_v5 = vadd.f32 %v8041_v17, %v3798_v35 }
 0x8f3   : > { %v8060_v10 = vadd.f32 %v6143_v49, %v3799_v5 }
 0x8f5   : > { %v3864_v7 = vsel %vm1160_vm2, %v8060_v10, 0.0 }
 0x8f7   : > { %v3634_v22 = vpop.f32.mrf.mxu0 }
 0x903   : > { %v5847_v30 = vpop.permute.xlu1 %5846 }
 0x904   : > { %v5849_v46 = vunpack.i.h.bf16 %v5847_v30  ;;  %v5848_v4 = vunpack.i.l.bf16 %v5847_v30 }
 0x906   : > { %v3719_v21 = vsel %vm1717_vm0, %v7758_v26, %v5849_v46  ;;  %v3718_v12 = vsel %vm1717_vm0, %v7753_v8, %v5848_v4  ;;  %v6144_v26 = vld [vmem:[#allocation2 + $0x30] sm:$0xff] }
 0x907   : > { %v3728_v57 = vpack.c.bf16 %v3719_v21, %v3718_v12 }
 0x909   : > { %5632 = vmatmul.msk.bf16.gmra.mxu1 %vm1160_vm2, %v3728_v57 }
 0x91a   : > { %3865 = vadd.xlane.f32.xlu0 %v3864_v7  ;;  %v6151_v7 = vld [vmem:[#allocation2 + $0x68] sm:$0xff] }
 0x92a   : > { %v3801_v28 = vpop.f32.mrf.mxu1 }
 0x92b   : > { %v3802_v3 = vadd.f32 %v8041_v17, %v3801_v28 }
 0x92d   : > { %v8065_v56 = vadd.f32 %v6144_v26, %v3802_v3 }
 0x92f   : > { %v3867_v8 = vsel %vm1160_vm2, %v8065_v56, 0.0 }
 0x930   : > { %3868 = vadd.xlane.f32.xlu1 %v3867_v8 }
 0x932   : > { %v3803_v13 = vpop.f32.mrf.mxu1 }
 0x933   : > { %v3804_v32 = vadd.f32 %v8041_v17, %v3803_v13 }
 0x935   : > { %v8070_v19 = vadd.f32 %v6145_v38, %v3804_v32 }
 0x937   : > { %v3870_v6 = vsel %vm1160_vm2, %v8070_v19, 0.0 }
 0x938   : > { %3871 = vadd.xlane.f32.xlu2 %v3870_v6 }
 0x93a   : > { %v3806_v36 = vpop.f32.mrf.mxu1 }
 0x93b   : > { %v3807_v48 = vadd.f32 %v8041_v17, %v3806_v36 }
 0x93d   : > { %v8075_v39 = vadd.f32 %v6146_v20, %v3807_v48  ;;  %v6152_v48 = vld [vmem:[#allocation2 + $0x70] sm:$0xff] }
 0x93f   : > { %v3873_v44 = vsel %vm1160_vm2, %v8075_v39, 0.0 }
 0x940   : > { %3874 = vadd.xlane.f32.xlu0 %v3873_v44 }
 0x942   : > { %v3808_v29 = vpop.f32.mrf.mxu1 }
 0x943   : > { %v3809_v40 = vadd.f32 %v8041_v17, %v3808_v29  ;;  %v3786_v57 = vpop.f32.mrf.mxu0 }
 0x945   : > { %v8080_v47 = vadd.f32 %v6147_v31, %v3809_v40 }
 0x947   : > { %v3876_v1 = vsel %vm1160_vm2, %v8080_v47, 0.0 }
 0x948   : > { %3877 = vadd.xlane.f32.xlu2 %v3876_v1 }
 0x94a   : > { %v3811_v42 = vpop.f32.mrf.mxu1 }
 0x94b   : > { %v3812_v27 = vadd.f32 %v8041_v17, %v3811_v42  ;;  %v3788_v36 = vpop.f32.mrf.mxu0 }
 0x94d   : > { %v8085_v25 = vadd.f32 %v6148_v51, %v3812_v27  ;;  %v3789_v27 = vadd.f32 %v8041_v17, %v3788_v36 }
 0x94f   : > { %v3879_v15 = vsel %vm1160_vm2, %v8085_v25, 0.0 }
 0x950   : > { %3880 = vadd.xlane.f32.xlu2 %v3879_v15 }
 0x952   : > { %v3813_v55 = vpop.f32.mrf.mxu1 }
 0x953   : > { %v3814_v54 = vadd.f32 %v8041_v17, %v3813_v55 }
 0x955   : > { %v8100_v18 = vadd.f32 %v6149_v43, %v3814_v54  ;;  %v3787_v54 = vadd.f32 %v8041_v17, %v3786_v57  ;;  %v6157_v57 = vld [vmem:[#allocation2 + $0x18] sm:$0xff] }
 0x957   : > { %v3882_v50 = vsel %vm1160_vm2, %v8100_v18, 0.0 }
 0x960   : > { %v3816_v62 = vpop.f32.mrf.mxu1 }
 0x961   : > { %v3863_v16 = vpop.xlane.xlu2 %3862 }
 0x962   : > { %v3686_v2 = vpop.permute.xlu0 %3685  ;;  %v3904_v53 = vmul.f32 %v3863_v16, %v6711_v41 }
 0x963   : > { %v3720_v60 = vsel %vm1717_vm0, %v7767_v59, %v3686_v2  ;;  %v3817_v59 = vadd.f32 %v8041_v17, %v3816_v62  ;;  %v6153_v2 = vld [vmem:[#allocation2 + $0x78] sm:$0xff] }
 0x964   : > { %v3729_v52 = vpack.c.bf16 %v3720_v60, %v3720_v60  ;;  %v8093_v33 = vsub.f32 %v8049_v11, %v3904_v53 }
 0x965   : > { %v8105_v58 = vadd.f32 %v6150_v63, %v3817_v59 }
 0x966   : > { %5633 = vmatmul.msk.bf16.gmra.mxu1 %vm1160_vm2, %v3729_v52  ;;  %v3938_v61 = vmul.f32 %v8093_v33, %v8093_v33  ;;  %v6154_v52 = vld [vmem:[#allocation2 + $0x8] sm:$0xff] }
 0x967   : > { %v3885_v24 = vsel %vm1160_vm2, %v8105_v58, 0.0  ;;  %v8155_v55 = vadd.f32 %v6154_v52, %v3789_v27  ;;  %v5701_v52 = vld [vmem:[%s6611_s17] sm:$0xff] }
 0x968   : > { %v3963_v45 = vsel %vm1160_vm2, %v3938_v61, 0.0  ;;  %v3818_v30 = vpop.f32.mrf.mxu1  ;;  %v3791_v16 = vpop.f32.mrf.mxu0 }
 0x969   : > { %3964 = vadd.xlane.f32.xlu0 %v3963_v45  ;;  %v3819_v21 = vadd.f32 %v8041_v17, %v3818_v30  ;;  %v3792_v62 = vadd.f32 %v8041_v17, %v3791_v16  ;;  %v5702_v16 = vld [vmem:[%s6611_s17 + $0x8] sm:$0xff]  ;;  %s9184_s17 = scalar_lea.vmem [#allocation8], %s6558_s13 }
 0x96a   : > { %5718 = vmatpush.bf16.msrb.mxu2 %v5702_v16  ;;  %4325 = vmatpush.bf16.msrb.mxu0 %v5702_v16  ;;  %s9187_s0 = smov %s9184_s17 }
 0x96b   : > { %v8125_v28 = vadd.f32 %v6151_v7, %v3819_v21 }
 0x96d   : > { %v3888_v32 = vsel %vm1160_vm2, %v8125_v28, 0.0 }
 0x96e   : > { %5719 = vmatpush.bf16.msrb.mxu2 %v5701_v52  ;;  %4326 = vmatpush.bf16.msrb.mxu0 %v5701_v52 }
 0x971   : > { %3883 = vadd.xlane.f32.xlu0 %v3882_v50  ;;  %v3852_v50 = vsel %vm1160_vm2, %v8155_v55, 0.0 }
 0x979   : > { %3886 = vadd.xlane.f32.xlu0 %v3885_v24  ;;  %v6155_v24 = vld [vmem:[#allocation2] sm:$0xff] }
 0x986   : > { %v3821_v49 = vpop.f32.mrf.mxu1 }
 0x987   : > { %v3822_v8 = vadd.f32 %v8041_v17, %v3821_v49 }
 0x989   : > { %v8137_v20 = vadd.f32 %v6152_v48, %v3822_v8 }
 0x98b   : > { %v3891_v42 = vsel %vm1160_vm2, %v8137_v20, 0.0 }
 0x98d   : > { %v3866_v9 = vpop.xlane.xlu0 %3865 }
 0x98e   : > { %v3905_v37 = vmul.f32 %v3866_v9, %v6711_v41  ;;  %v3823_v29 = vpop.f32.mrf.mxu1  ;;  %v8167_v9 = vadd.f32 %v6155_v24, %v3787_v54 }
 0x98f   : > { %v3824_v31 = vadd.f32 %v8041_v17, %v3823_v29 }
 0x990   : > { %v8111_v14 = vsub.f32 %v8060_v10, %v3905_v37 }
 0x991   : > { %v8150_v53 = vadd.f32 %v6153_v2, %v3824_v31 }
 0x992   : > { %v3939_v23 = vmul.f32 %v8111_v14, %v8111_v14 }
 0x993   : > { %v3894_v45 = vsel %vm1160_vm2, %v8150_v53, 0.0 }
 0x994   : > { %v3966_v0 = vsel %vm1160_vm2, %v3939_v23, 0.0  ;;  %v6156_v23 = vld [vmem:[#allocation2 + $0x10] sm:$0xff] }
 0x995   : > { %3967 = vadd.xlane.f32.xlu1 %v3966_v0  ;;  %v8172_v0 = vadd.f32 %v6156_v23, %v3792_v62 }
 0x9a3   : > { %v3869_v34 = vpop.xlane.xlu1 %3868 }
 0x9a4   : > { %v3906_v22 = vmul.f32 %v3869_v34, %v6711_v41  ;;  %v3793_v34 = vpop.f32.mrf.mxu0 }
 0x9a5   : > { %v3794_v30 = vadd.f32 %v8041_v17, %v3793_v34 }
 0x9a6   : > { %v8118_v46 = vsub.f32 %v8065_v56, %v3906_v22 }
 0x9a8   : > { %v3940_v4 = vmul.f32 %v8118_v46, %v8118_v46 }
 0x9aa   : > { %v3969_v12 = vsel %vm1160_vm2, %v3940_v4, 0.0  ;;  %v3849_v4 = vsel %vm1160_vm2, %v8167_v9, 0.0 }
 0x9ab   : > { %v3872_v35 = vpop.xlane.xlu2 %3871  ;;  %3970 = vadd.xlane.f32.xlu1 %v3969_v12  ;;  %v3855_v12 = vsel %vm1160_vm2, %v8172_v0, 0.0 }
 0x9ac   : > { %v3907_v5 = vmul.f32 %v3872_v35, %v6711_v41  ;;  %v8182_v35 = vadd.f32 %v6157_v57, %v3794_v30 }
 0x9ae   : > { %v8128_v3 = vsub.f32 %v8070_v19, %v3907_v5  ;;  %v3858_v5 = vsel %vm1160_vm2, %v8182_v35, 0.0 }
 0x9b0   : > { %v3941_v26 = vmul.f32 %v8128_v3, %v8128_v3 }
 0x9b2   : > { %v3972_v13 = vsel %vm1160_vm2, %v3941_v26, 0.0 }
 0x9b3   : > { %v3875_v38 = vpop.xlane.xlu0 %3874  ;;  %3973 = vadd.xlane.f32.xlu2 %v3972_v13  ;;  %3889 = vadd.xlane.f32.xlu1 %v3888_v32 }
 0x9b4   : > { %v3908_v6 = vmul.f32 %v3875_v38, %v6711_v41 }
 0x9b6   : > { %v8140_v44 = vsub.f32 %v8075_v39, %v3908_v6 }
 0x9b8   : > { %v3942_v40 = vmul.f32 %v8140_v44, %v8140_v44 }
 0x9ba   : > { %v3975_v1 = vsel %vm1160_vm2, %v3942_v40, 0.0  ;;  %v6158_v40 = vld [vmem:[#allocation2 + $0x80] sm:$0xff] }
 0x9bb   : > { %3976 = vadd.xlane.f32.xlu2 %v3975_v1  ;;  %v3878_v51 = vpop.xlane.xlu2 %3877  ;;  %3892 = vadd.xlane.f32.xlu1 %v3891_v42 }
 0x9bc   : > { %v3909_v15 = vmul.f32 %v3878_v51, %v6711_v41 }
 0x9be   : > { %v8153_v60 = vsub.f32 %v8080_v47, %v3909_v15 }
 0x9c0   : > { %v3943_v61 = vmul.f32 %v8153_v60, %v8153_v60 }
 0x9c2   : > { %v3978_v43 = vsel %vm1160_vm2, %v3943_v61, 0.0 }
 0x9c3   : > { %3895 = vadd.xlane.f32.xlu2 %v3894_v45  ;;  %3979 = vadd.xlane.f32.xlu0 %v3978_v43  ;;  %v3881_v59 = vpop.xlane.xlu2 %3880 }
 0x9c4   : > { %v3910_v63 = vmul.f32 %v3881_v59, %v6711_v41  ;;  %3853 = vadd.xlane.f32.xlu1 %v3852_v50 }
 0x9c6   : > { %v8170_v37 = vsub.f32 %v8085_v25, %v3910_v63 }
 0x9c8   : > { %v3944_v22 = vmul.f32 %v8170_v37, %v8170_v37 }
 0x9ca   : > { %v3981_v21 = vsel %vm1160_vm2, %v3944_v22, 0.0 }
 0x9cb   : > { %3850 = vadd.xlane.f32.xlu0 %v3849_v4  ;;  %3982 = vadd.xlane.f32.xlu2 %v3981_v21  ;;  %v8210_v21 = vld [vmem:[%s6600_s2] ss:$0 sm:$0xff] }
 0x9cc   : > { %3856 = vadd.xlane.f32.xlu1 %v3855_v12 }
 0x9d3   : > { %3859 = vadd.xlane.f32.xlu2 %v3858_v5 }
 0x9dc   : > { %v3965_v49 = vpop.xlane.xlu0 %3964 }
 0x9dd   : > { %v4006_v27 = vmul.f32 %v3965_v49, %v6711_v41 }
 0x9df   : > { %v4023_v15 = vadd.f32 1e-05, %v4006_v27 }
 0x9e1   : > { %6040 = vrsqrt.f32 %v4023_v15  ;;  %vm4082_vm15 = vweird.f32 %v4023_v15 }
 0x9e3   : > { %v3826_v7 = vpop.f32.mrf.mxu1 }
 0x9e4   : > { %v3884_v26 = vpop.xlane.xlu0 %3883  ;;  %v3827_v6 = vadd.f32 %v8041_v17, %v3826_v7  ;;  %v8214_v7 = vld [vmem:[%s6606_s27] ss:$0 sm:$0xff] }
 0x9e5   : > { %v3911_v8 = vmul.f32 %v3884_v26, %v6711_v41 }
 0x9e6   : > { %v8195_v31 = vadd.f32 %v6158_v40, %v3827_v6 }
 0x9e7   : > { %v8188_v13 = vsub.f32 %v8100_v18, %v3911_v8  ;;  %v6041_v2 = vpop.eup %6040 }
 0x9e8   : > { %v3897_v17 = vsel %vm1160_vm2, %v8195_v31, 0.0  ;;  %v4077_v61 = vmul.f32 %v6041_v2, %v4023_v15  ;;  %vm4083_vm14 = vweird.f32 %v6041_v2 }
 0x9e9   : > { %v3945_v32 = vmul.f32 %v8188_v13, %v8188_v13  ;;  %vm4084_vm0 = vmor %vm4082_vm15, %vm4083_vm14 }
 0x9ea   : > { %v4078_v54 = vmul.f32 %v6041_v2, %v4077_v61 }
 0x9eb   : > { %v3828_v38 = vpop.f32.mrf.mxu1  ;;  %v3984_v36 = vsel %vm1160_vm2, %v3945_v32, 0.0 }
 0x9ec   : > { %v3887_v48 = vpop.xlane.xlu0 %3886  ;;  %3985 = vadd.xlane.f32.xlu0 %v3984_v36  ;;  %v4079_v59 = vmul.f32 0.5, %v4078_v54 }
 0x9ed   : > { %v3912_v29 = vmul.f32 %v3887_v48, %v6711_v41 }
 0x9ee   : > { %v4080_v50 = vsub.f32 1.5, %v4079_v59 }
 0x9ef   : > { %v8198_v1 = vsub.f32 %v8105_v58, %v3912_v29 }
 0x9f0   : > { %v4081_v24 = vmul.f32 %v6041_v2, %v4080_v50 }
 0x9f1   : > { %v3946_v42 = vmul.f32 %v8198_v1, %v8198_v1 }
 0x9f2   : > { %v4085_v22 = vsel %vm4084_vm0, %v6041_v2, %v4081_v24 }
 0x9f3   : > { %v3987_v51 = vsel %vm1160_vm2, %v3946_v42, 0.0  ;;  %v4210_v12 = vmul.f32 %v4085_v22, %v8093_v33 }
 0x9f4   : > { %3898 = vadd.xlane.f32.xlu0 %v3897_v17  ;;  %3988 = vadd.xlane.f32.xlu1 %v3987_v51 }
 0x9f5   : > { %v4230_v26 = vmul.f32 %v8210_v21, %v4210_v12 }
 0x9f7   : > { %v4250_v36 = vadd.f32 %v8214_v7, %v4230_v26 }
 0xa08   : > { %v3968_v45 = vpop.xlane.xlu1 %3967 }
 0xa09   : > { %v4007_v43 = vmul.f32 %v3968_v45, %v6711_v41 }
 0xa0b   : > { %v4024_v62 = vadd.f32 1e-05, %v4007_v43 }
 0xa0d   : > { %6042 = vrsqrt.f32 %v4024_v62  ;;  %vm4092_vm3 = vweird.f32 %v4024_v62 }
 0xa13   : > { %v6043_v63 = vpop.eup %6042 }
 0xa14   : > { %v4087_v23 = vmul.f32 %v6043_v63, %v4024_v62  ;;  %vm4093_vm1 = vweird.f32 %v6043_v63 }
 0xa15   : > { %vm4094_vm4 = vmor %vm4092_vm3, %vm4093_vm1 }
 0xa16   : > { %v4088_v34 = vmul.f32 %v6043_v63, %v4087_v23 }
 0xa18   : > { %v4089_v30 = vmul.f32 0.5, %v4088_v34 }
 0xa1a   : > { %v4090_v4 = vsub.f32 1.5, %v4089_v30 }
 0xa1c   : > { %v4091_v57 = vmul.f32 %v6043_v63, %v4090_v4 }
 0xa1e   : > { %v4095_v5 = vsel %vm4094_vm4, %v6043_v63, %v4091_v57  ;;  %v3971_v49 = vpop.xlane.xlu1 %3970 }
 0xa1f   : > { %v4211_v8 = vmul.f32 %v4095_v5, %v8111_v14  ;;  %v4008_v32 = vmul.f32 %v3971_v49, %v6711_v41 }
 0xa21   : > { %v4231_v38 = vmul.f32 %v8210_v21, %v4211_v8  ;;  %v4025_v6 = vadd.f32 1e-05, %v4008_v32 }
 0xa23   : > { %v4251_v33 = vadd.f32 %v8214_v7, %v4231_v38  ;;  %6044 = vrsqrt.f32 %v4025_v6  ;;  %vm4102_vm6 = vweird.f32 %v4025_v6 }
 0xa25   : > { %v4265_v48 = vpack.c.bf16 %v4251_v33, %v4250_v36 }
 0xa26   : > { %v3974_v29 = vpop.xlane.xlu2 %3973  ;;  %v3890_v40 = vpop.xlane.xlu1 %3889 }
 0xa27   : > { %v4009_v42 = vmul.f32 %v3974_v29, %v6711_v41  ;;  %v3913_v27 = vmul.f32 %v3890_v40, %v6711_v41  ;;  %5644 = vmatmul.msk.bf16.vlgmr.msrb.gmra.mxu2 %vm1160_vm2, %v4265_v48 }
 0xa29   : > { %v6045_v14 = vpop.eup %6044  ;;  %v4026_v17 = vadd.f32 1e-05, %v4009_v42  ;;  %v8226_v51 = vsub.f32 %v8125_v28, %v3913_v27 }
 0xa2a   : > { %v4097_v15 = vmul.f32 %v6045_v14, %v4025_v6  ;;  %vm4103_vm5 = vweird.f32 %v6045_v14 }
 0xa2b   : > { %6046 = vrsqrt.f32 %v4026_v17  ;;  %v3947_v16 = vmul.f32 %v8226_v51, %v8226_v51  ;;  %vm4104_vm7 = vmor %vm4102_vm6, %vm4103_vm5  ;;  %vm4112_vm9 = vweird.f32 %v4026_v17 }
 0xa2c   : > { %v4098_v2 = vmul.f32 %v6045_v14, %v4097_v15 }
 0xa2d   : > { %v3990_v52 = vsel %vm1160_vm2, %v3947_v16, 0.0 }
 0xa2e   : > { %v4099_v61 = vmul.f32 0.5, %v4098_v2  ;;  %v3977_v54 = vpop.xlane.xlu2 %3976  ;;  %3991 = vadd.xlane.f32.xlu2 %v3990_v52  ;;  %v3893_v45 = vpop.xlane.xlu1 %3892 }
 0xa2f   : > { %v4010_v43 = vmul.f32 %v3977_v54, %v6711_v41  ;;  %v3914_v62 = vmul.f32 %v3893_v45, %v6711_v41 }
 0xa30   : > { %v4100_v59 = vsub.f32 1.5, %v4099_v61 }
 0xa31   : > { %v6047_v50 = vpop.eup %6046  ;;  %v8233_v63 = vadd.f32 1e-05, %v4010_v43  ;;  %v8236_v24 = vsub.f32 %v8137_v20, %v3914_v62 }
 0xa32   : > { %v4101_v23 = vmul.f32 %v6045_v14, %v4100_v59  ;;  %v4107_v34 = vmul.f32 %v6047_v50, %v4026_v17  ;;  %vm4113_vm8 = vweird.f32 %v6047_v50 }
 0xa33   : > { %6048 = vrsqrt.f32 %v8233_v63  ;;  %v3948_v22 = vmul.f32 %v8236_v24, %v8236_v24  ;;  %vm4114_vm10 = vmor %vm4112_vm9, %vm4113_vm8  ;;  %vm4122_vm12 = vweird.f32 %v8233_v63 }
 0xa34   : > { %v4108_v30 = vmul.f32 %v6047_v50, %v4107_v34  ;;  %v4105_v12 = vsel %vm4104_vm7, %v6045_v14, %v4101_v23 }
 0xa35   : > { %v3993_v4 = vsel %vm1160_vm2, %v3948_v22, 0.0  ;;  %v4212_v6 = vmul.f32 %v4105_v12, %v8118_v46 }
 0xa36   : > { %v4109_v57 = vmul.f32 0.5, %v4108_v30  ;;  %v3980_v5 = vpop.xlane.xlu0 %3979  ;;  %v3896_v49 = vpop.xlane.xlu2 %3895  ;;  %3994 = vadd.xlane.f32.xlu0 %v3993_v4 }
 0xa37   : > { %v4011_v26 = vmul.f32 %v3980_v5, %v6711_v41  ;;  %v3915_v8 = vmul.f32 %v3896_v49, %v6711_v41  ;;  %v3854_v32 = vpop.xlane.xlu1 %3853  ;;  %v4232_v17 = vmul.f32 %v8210_v21, %v4212_v6 }
 0xa38   : > { %v4110_v38 = vsub.f32 1.5, %v4109_v57  ;;  %v3901_v36 = vmul.f32 %v3854_v32, %v6711_v41 }
 0xa39   : > { %v6049_v33 = vpop.eup %6048  ;;  %v4028_v48 = vadd.f32 1e-05, %v4011_v26  ;;  %v8247_v29 = vsub.f32 %v8150_v53, %v3915_v8  ;;  %v4252_v30 = vadd.f32 %v8214_v7, %v4232_v17 }
 0xa3a   : > { %v4111_v40 = vmul.f32 %v6047_v50, %v4110_v38  ;;  %v4117_v42 = vmul.f32 %v6049_v33, %v8233_v63  ;;  %v8251_v27 = vsub.f32 %v8155_v55, %v3901_v36  ;;  %vm4123_vm11 = vweird.f32 %v6049_v33 }
 0xa3b   : > { %6050 = vrsqrt.f32 %v4028_v48  ;;  %v3949_v14 = vmul.f32 %v8247_v29, %v8247_v29  ;;  %vm4124_vm13 = vmor %vm4122_vm12, %vm4123_vm11  ;;  %vm4132_vm15 = vweird.f32 %v4028_v48 }
 0xa3c   : > { %v4115_v15 = vsel %vm4114_vm10, %v6047_v50, %v4111_v40  ;;  %v4118_v16 = vmul.f32 %v6049_v33, %v4117_v42  ;;  %v3935_v46 = vmul.f32 %v8251_v27, %v8251_v27 }
 0xa3d   : > { %v4213_v2 = vmul.f32 %v4115_v15, %v8128_v3  ;;  %v3996_v52 = vsel %vm1160_vm2, %v3949_v14, 0.0 }
 0xa3e   : > { %v4119_v61 = vmul.f32 0.5, %v4118_v16  ;;  %v3851_v54 = vpop.xlane.xlu0 %3850  ;;  %v3983_v45 = vpop.xlane.xlu2 %3982  ;;  %3997 = vadd.xlane.f32.xlu1 %v3996_v52  ;;  %v3954_v43 = vsel %vm1160_vm2, %v3935_v46, 0.0 }
 0xa3f   : > { %v3900_v62 = vmul.f32 %v3851_v54, %v6711_v41  ;;  %3955 = vadd.xlane.f32.xlu0 %v3954_v43  ;;  %v3857_v59 = vpop.xlane.xlu1 %3856  ;;  %v4233_v50 = vmul.f32 %v8210_v21, %v4213_v2 }
 0xa40   : > { %v4120_v23 = vsub.f32 1.5, %v4119_v61  ;;  %v3902_v34 = vmul.f32 %v3857_v59, %v6711_v41 }
 0xa41   : > { %v6051_v3 = vpop.eup %6050  ;;  %v8265_v22 = vsub.f32 %v8167_v9, %v3900_v62  ;;  %v4253_v4 = vadd.f32 %v8214_v7, %v4233_v50 }
 0xa42   : > { %v4121_v12 = vmul.f32 %v6049_v33, %v4120_v23  ;;  %v4127_v57 = vmul.f32 %v6051_v3, %v4028_v48  ;;  %v8270_v5 = vsub.f32 %v8172_v0, %v3902_v34  ;;  %vm4133_vm14 = vweird.f32 %v6051_v3 }
 0xa43   : > { %v4266_v49 = vpack.c.bf16 %v4253_v4, %v4252_v30  ;;  %v3934_v26 = vmul.f32 %v8265_v22, %v8265_v22  ;;  %vm4134_vm0 = vmor %vm4132_vm15, %vm4133_vm14 }
 0xa44   : > { %v4128_v8 = vmul.f32 %v6051_v3, %v4127_v57  ;;  %v3936_v32 = vmul.f32 %v8270_v5, %v8270_v5  ;;  %v4125_v36 = vsel %vm4124_vm13, %v6049_v33, %v4121_v12  ;;  %v4012_v33 = vmul.f32 %v3983_v45, %v6711_v41 }
 0xa45   : > { %5645 = vmatmul.msk.bf16.gmra.mxu2 %vm1160_vm2, %v4266_v49  ;;  %v3951_v38 = vsel %vm1160_vm2, %v3934_v26, 0.0  ;;  %v4214_v63 = vmul.f32 %v4125_v36, %v8140_v44 }
 0xa46   : > { %v4129_v6 = vmul.f32 0.5, %v4128_v8  ;;  %v3860_v40 = vpop.xlane.xlu2 %3859  ;;  %3952 = vadd.xlane.f32.xlu2 %v3951_v38  ;;  %v3957_v42 = vsel %vm1160_vm2, %v3936_v32, 0.0  ;;  %v4029_v44 = vadd.f32 1e-05, %v4012_v33 }
 0xa47   : > { %v3903_v14 = vmul.f32 %v3860_v40, %v6711_v41  ;;  %3958 = vadd.xlane.f32.xlu1 %v3957_v42  ;;  %v4234_v54 = vmul.f32 %v8210_v21, %v4214_v63 }
 0xa48   : > { %v4130_v15 = vsub.f32 1.5, %v4129_v6  ;;  %6052 = vrsqrt.f32 %v4029_v44  ;;  %vm4142_vm3 = vweird.f32 %v4029_v44 }
 0xa49   : > { %v8283_v16 = vsub.f32 %v8182_v35, %v3903_v14  ;;  %v4254_v62 = vadd.f32 %v8214_v7, %v4234_v54 }
 0xa4a   : > { %v4131_v46 = vmul.f32 %v6051_v3, %v4130_v15 }
 0xa4b   : > { %v3937_v2 = vmul.f32 %v8283_v16, %v8283_v16 }
 0xa4c   : > { %v4135_v52 = vsel %vm4134_vm0, %v6051_v3, %v4131_v46 }
 0xa4d   : > { %v4215_v17 = vmul.f32 %v4135_v52, %v8153_v60  ;;  %v3960_v61 = vsel %vm1160_vm2, %v3937_v2, 0.0 }
 0xa4e   : > { %3961 = vadd.xlane.f32.xlu2 %v3960_v61  ;;  %v6053_v59 = vpop.eup %6052 }
 0xa4f   : > { %v4235_v43 = vmul.f32 %v8210_v21, %v4215_v17  ;;  %v4137_v50 = vmul.f32 %v6053_v59, %v4029_v44  ;;  %vm4143_vm1 = vweird.f32 %v6053_v59 }
 0xa50   : > { %vm4144_vm4 = vmor %vm4142_vm3, %vm4143_vm1 }
 0xa51   : > { %v4255_v48 = vadd.f32 %v8214_v7, %v4235_v43  ;;  %v4138_v23 = vmul.f32 %v6053_v59, %v4137_v50 }
 0xa53   : > { %v4267_v45 = vpack.c.bf16 %v4255_v48, %v4254_v62  ;;  %v4139_v30 = vmul.f32 0.5, %v4138_v23 }
 0xa55   : > { %5646 = vmatmul.msk.bf16.gmra.mxu2 %vm1160_vm2, %v4267_v45  ;;  %v4140_v4 = vsub.f32 1.5, %v4139_v30 }
 0xa57   : > { %v4141_v8 = vmul.f32 %v6053_v59, %v4140_v4 }
 0xa59   : > { %v4145_v40 = vsel %vm4144_vm4, %v6053_v59, %v4141_v8 }
 0xa5a   : > { %v4216_v15 = vmul.f32 %v4145_v40, %v8170_v37 }
 0xa5c   : > { %v4236_v2 = vmul.f32 %v8210_v21, %v4216_v15 }
 0xa5e   : > { %v4256_v17 = vadd.f32 %v8214_v7, %v4236_v2 }
 0xa5f   : > { %v3986_v60 = vpop.xlane.xlu0 %3985 }
 0xa60   : > { %v4013_v34 = vmul.f32 %v3986_v60, %v6711_v41  ;;  %v8313_v60 = vld [vmem:[%s6617_s22] ss:$0 sm:$0xff] }
 0xa62   : > { %v4030_v3 = vadd.f32 1e-05, %v4013_v34 }
 0xa64   : > { %6054 = vrsqrt.f32 %v4030_v3  ;;  %vm4152_vm6 = vweird.f32 %v4030_v3 }
 0xa67   : > { %v3899_v12 = vpop.xlane.xlu0 %3898  ;;  %v3989_v44 = vpop.xlane.xlu1 %3988 }
 0xa68   : > { %v3916_v57 = vmul.f32 %v3899_v12, %v6711_v41  ;;  %v4014_v37 = vmul.f32 %v3989_v44, %v6711_v41 }
 0xa6a   : > { %v6055_v49 = vpop.eup %6054  ;;  %v8298_v26 = vsub.f32 %v8195_v31, %v3916_v57  ;;  %v4031_v43 = vadd.f32 1e-05, %v4014_v37 }
 0xa6b   : > { %v4147_v32 = vmul.f32 %v6055_v49, %v4030_v3  ;;  %vm4153_vm5 = vweird.f32 %v6055_v49 }
 0xa6c   : > { %v3950_v38 = vmul.f32 %v8298_v26, %v8298_v26  ;;  %vm4154_vm7 = vmor %vm4152_vm6, %vm4153_vm5  ;;  %6056 = vrsqrt.f32 %v4031_v43  ;;  %vm4162_vm9 = vweird.f32 %v4031_v43 }
 0xa6d   : > { %v4148_v36 = vmul.f32 %v6055_v49, %v4147_v32 }
 0xa6e   : > { %v3999_v6 = vsel %vm1160_vm2, %v3950_v38, 0.0 }
 0xa6f   : > { %v4149_v42 = vmul.f32 0.5, %v4148_v36  ;;  %4000 = vadd.xlane.f32.xlu0 %v3999_v6 }
 0xa71   : > { %v4150_v14 = vsub.f32 1.5, %v4149_v42 }
 0xa72   : > { %v6057_v62 = vpop.eup %6056 }
 0xa73   : > { %v4151_v63 = vmul.f32 %v6055_v49, %v4150_v14  ;;  %v4157_v48 = vmul.f32 %v6057_v62, %v4031_v43  ;;  %vm4163_vm8 = vweird.f32 %v6057_v62 }
 0xa74   : > { %vm4164_vm10 = vmor %vm4162_vm9, %vm4163_vm8 }
 0xa75   : > { %v4155_v46 = vsel %vm4154_vm7, %v6055_v49, %v4151_v63  ;;  %v4158_v45 = vmul.f32 %v6057_v62, %v4157_v48 }
 0xa76   : > { %v4217_v33 = vmul.f32 %v4155_v46, %v8188_v13 }
 0xa77   : > { %v4159_v23 = vmul.f32 0.5, %v4158_v45 }
 0xa78   : > { %v4237_v52 = vmul.f32 %v8210_v21, %v4217_v33 }
 0xa79   : > { %v4160_v3 = vsub.f32 1.5, %v4159_v23 }
 0xa7a   : > { %v4257_v61 = vadd.f32 %v8214_v7, %v4237_v52 }
 0xa7b   : > { %v4161_v38 = vmul.f32 %v6057_v62, %v4160_v3 }
 0xa7c   : > { %v4268_v54 = vpack.c.bf16 %v4257_v61, %v4256_v17 }
 0xa7d   : > { %v4165_v15 = vsel %vm4164_vm10, %v6057_v62, %v4161_v38 }
 0xa7e   : > { %5647 = vmatmul.msk.bf16.gmra.mxu2 %vm1160_vm2, %v4268_v54  ;;  %v4218_v44 = vmul.f32 %v4165_v15, %v8198_v1 }
 0xaa1   : > { %v3992_v13 = vpop.xlane.xlu2 %3991 }
 0xaa2   : > { %v4015_v59 = vmul.f32 %v3992_v13, %v6711_v41 }
 0xaa4   : > { %v4032_v50 = vadd.f32 1e-05, %v4015_v59  ;;  %v4238_v59 = vmul.f32 %v8210_v21, %v4218_v44 }
 0xaa6   : > { %6058 = vrsqrt.f32 %v4032_v50  ;;  %vm4172_vm12 = vweird.f32 %v4032_v50 }
 0xaa9   : > { %v3995_v34 = vpop.xlane.xlu0 %3994 }
 0xaaa   : > { %v4016_v30 = vmul.f32 %v3995_v34, %v6711_v41  ;;  %v4338_v4 = vpop.f32.mrf.mxu2 }
 0xaab   : > { %v8317_v12 = vadd.f32 %v8313_v60, %v4338_v4 }
 0xaac   : > { %v6059_v57 = vpop.eup %6058  ;;  %v8319_v49 = vadd.f32 1e-05, %v4016_v30 }
 0xaad   : > { %v4167_v8 = vmul.f32 %v6059_v57, %v4032_v50  ;;  %v8322_v32 = vmul.f32 0.70710677, %v8317_v12  ;;  %vm4173_vm11 = vweird.f32 %v6059_v57 }
 0xaae   : > { %6060 = vrsqrt.f32 %v8319_v49  ;;  %vm4174_vm13 = vmor %vm4172_vm12, %vm4173_vm11  ;;  %vm4182_vm1 = vweird.f32 %v8319_v49 }
 0xaaf   : > { %v4168_v36 = vmul.f32 %v6059_v57, %v4167_v8  ;;  %v8326_v6 = vand.u32 2147483647, %v8322_v32 }
 0xab1   : > { %v4169_v40 = vmul.f32 0.5, %v4168_v36  ;;  %v4461_v42 = vmul.f32 0.3275911, %v8326_v6  ;;  %v3998_v14 = vpop.xlane.xlu1 %3997  ;;  %v4258_v36 = vadd.f32 %v8214_v7, %v4238_v59 }
 0xab2   : > { %v3956_v63 = vpop.xlane.xlu0 %3955  ;;  %v4017_v46 = vmul.f32 %v3998_v14, %v6711_v41  ;;  %v4340_v17 = vpop.f32.mrf.mxu2 }
 0xab3   : > { %v4170_v33 = vsub.f32 1.5, %v4169_v40  ;;  %v4478_v2 = vadd.f32 1.0, %v4461_v42  ;;  %v4003_v52 = vmul.f32 %v3956_v63, %v6711_v41  ;;  %v8337_v43 = vadd.f32 %v8313_v60, %v4340_v17 }
 0xab4   : > { %v8331_v61 = vpop.eup %6060  ;;  %v8333_v54 = vadd.f32 1e-05, %v4017_v46 }
 0xab5   : > { %v4171_v37 = vmul.f32 %v6059_v57, %v4170_v33  ;;  %6062 = vrcp.f32 %v4478_v2  ;;  %v4177_v48 = vmul.f32 %v8331_v61, %v8319_v49  ;;  %v8341_v13 = vadd.f32 1e-05, %v4003_v52 }
 0xab6   : > { %6064 = vrsqrt.f32 %v8333_v54  ;;  %v8348_v50 = vmul.f32 0.70710677, %v8337_v43  ;;  %v4562_v33 = vand.u32 2147483648, %v4478_v2  ;;  %v4903_v52 = vsub.f32 0.0, %v8326_v6 }
 0xab7   : > { %v4175_v62 = vsel %vm4174_vm13, %v6059_v57, %v4171_v37  ;;  %6066 = vrsqrt.f32 %v8341_v13  ;;  %v4178_v3 = vmul.f32 %v8331_v61, %v4177_v48  ;;  %v4560_v44 = vand.u32 2147483647, %v4478_v2 }
 0xab8   : > { %v4219_v45 = vmul.f32 %v4175_v62, %v8226_v51  ;;  %v8353_v57 = vand.u32 2147483647, %v8348_v50  ;;  %vm4556_vm15 = vweird.f32 %v4478_v2  ;;  %vm4183_vm4 = vweird.f32 %v8331_v61 }
 0xab9   : > { %v3953_v1 = vpop.xlane.xlu2 %3952  ;;  %v4179_v46 = vmul.f32 0.5, %v4178_v3  ;;  %vm4561_vm3 = vcmp.eq.f32.partialorder %v4560_v44, 8.507059e+37  ;;  %vm4052_vm6 = vweird.f32 %v8341_v13  ;;  %vm4192_vm7 = vweird.f32 %v8333_v54  ;;  %vm8413_vm10 = vmor %vm4182_vm1, %vm4183_vm4 }
 0xaba   : > { %v4002_v23 = vmul.f32 %v3953_v1, %v6711_v41  ;;  %v3959_v30 = vpop.xlane.xlu1 %3958  ;;  %v4239_v38 = vmul.f32 %v8210_v21, %v4219_v45  ;;  %v4462_v14 = vmul.f32 0.3275911, %v8353_v57  ;;  %vm4410_vm4 = vcmp.ge.f32.partialorder %v8322_v32, 0.0 }
 0xabb   : > { %v6063_v34 = vpop.eup %6062  ;;  %v4004_v15 = vmul.f32 %v3959_v30, %v6711_v41  ;;  %v4180_v3 = vsub.f32 1.5, %v4179_v46  ;;  %v4563_v30 = vor.u32 1.1754944e-38, %v4562_v33 }
 0xabc   : > { %v4552_v4 = vmul.f32 %v6063_v34, %v4478_v2  ;;  %v8355_v8 = vpop.eup %6064  ;;  %v8357_v51 = vadd.f32 1e-05, %v4002_v23  ;;  %vm4557_vm14 = vweird.f32 %v6063_v34  ;;  %v8372_v48 = vadd.f32 1.0, %v4462_v14 }
 0xabd   : > { %v4187_v42 = vmul.f32 %v8355_v8, %v8333_v54  ;;  %v8365_v63 = vpop.eup %6066  ;;  %v8375_v59 = vadd.f32 1e-05, %v4004_v15  ;;  %v4259_v23 = vadd.f32 %v8214_v7, %v4239_v38  ;;  %vm4558_vm0 = vmor %vm4556_vm15, %vm4557_vm14  ;;  %vm4193_vm9 = vweird.f32 %v8355_v8 }
 0xabe   : > { %v4553_v40 = vsub.f32 1.0, %v4552_v4  ;;  %6068 = vrsqrt.f32 %v8357_v51  ;;  %v4047_v37 = vmul.f32 %v8365_v63, %v8341_v13  ;;  %v4920_v4 = vmul.f32 %v4903_v52, %v8326_v6  ;;  %vm8446_vm13 = vmor %vm4192_vm7, %vm4193_vm9 }
 0xabf   : > { %v4188_v62 = vmul.f32 %v8355_v8, %v4187_v42  ;;  %6070 = vrcp.f32 %v8372_v48  ;;  %v4269_v46 = vpack.c.bf16 %v4259_v23, %v4258_v36  ;;  %vm4053_vm5 = vweird.f32 %v8365_v63 }
 0xac0   : > { %v4554_v17 = vmul.f32 %v6063_v34, %v4553_v40  ;;  %v4048_v1 = vmul.f32 %v8365_v63, %v4047_v37  ;;  %6072 = vrsqrt.f32 %v8375_v59  ;;  %v8390_v6 = vmul.f32 %v8331_v61, %v4180_v3  ;;  %vm8401_vm8 = vmor %vm4052_vm6, %vm4053_vm5 }
 0xac1   : > { %v3962_v42 = vpop.xlane.xlu2 %3961  ;;  %v4189_v38 = vmul.f32 0.5, %v4188_v62  ;;  %5648 = vmatmul.msk.bf16.gmra.mxu2 %vm1160_vm2, %v4269_v46  ;;  %v4904_v46 = vsub.f32 0.0, %v8353_v57  ;;  %vm4571_vm14 = vweird.f32 %v8372_v48  ;;  %vm4042_vm15 = vweird.f32 %v8357_v51 }
 0xac2   : > { %v4555_v45 = vadd.f32 %v6063_v34, %v4554_v17  ;;  %v4049_v40 = vmul.f32 0.5, %v4048_v1  ;;  %v4005_v44 = vmul.f32 %v3962_v42, %v6711_v41  ;;  %v4185_v49 = vsel %vm8413_vm10, %v8331_v61, %v8390_v6 }
 0xac3   : > { %v4190_v23 = vsub.f32 1.5, %v4189_v38  ;;  %v4575_v38 = vand.u32 2147483647, %v8372_v48  ;;  %vm4411_vm5 = vcmp.ge.f32.partialorder %v8348_v50, 0.0  ;;  %vm4062_vm6 = vweird.f32 %v8375_v59 }
 0xac4   : > { %v4559_v2 = vsel %vm4558_vm0, %v6063_v34, %v4555_v45  ;;  %v8381_v14 = vpop.eup %6068  ;;  %v4050_v17 = vsub.f32 1.5, %v4049_v40  ;;  %v8392_v34 = vmul.f32 1.442695, %v4920_v4 }
 0xac5   : > { %v8384_v15 = vsel %vm4561_vm3, %v4563_v30, %v4559_v2  ;;  %v4037_v52 = vmul.f32 %v8381_v14, %v8357_v51  ;;  %v6071_v45 = vpop.eup %6070  ;;  %v8407_v30 = vadd.f32 1e-05, %v4005_v44  ;;  %vm4043_vm11 = vweird.f32 %v8381_v14 }
 0xac6   : > { %v4750_v33 = vmul.f32 1.0614054, %v8384_v15  ;;  %v4051_v37 = vmul.f32 %v8365_v63, %v4050_v17  ;;  %v4567_v40 = vmul.f32 %v6071_v45, %v8372_v48  ;;  %v8431_v17 = vpop.eup %6072  ;;  %vm4572_vm12 = vweird.f32 %v6071_v45  ;;  %vm4044_vm1 = vmor %vm4042_vm15, %vm4043_vm11 }
 0xac7   : > { %v4038_v3 = vmul.f32 %v8381_v14, %v4037_v52  ;;  %6074 = vrsqrt.f32 %v8407_v30  ;;  %vm4576_vm0 = vcmp.eq.f32.partialorder %v4575_v38, 8.507059e+37  ;;  %vm4573_vm3 = vmor %vm4571_vm14, %vm4572_vm12  ;;  %vm4063_vm7 = vweird.f32 %v8431_v17 }
 0xac8   : > { %v4767_v36 = vadd.f32 -1.4531521, %v4750_v33  ;;  %v4343_v62 = vpop.f32.mrf.mxu2  ;;  %v4055_v2 = vsel %vm8401_vm8, %v8365_v63, %v4051_v37  ;;  %v4568_v44 = vsub.f32 1.0, %v4567_v40  ;;  %v4577_v63 = vand.u32 2147483648, %v8372_v48  ;;  %vm8542_vm9 = vmor %vm4062_vm6, %vm4063_vm7 }
 0xac9   : > { %v8423_v42 = vadd.f32 %v8313_v60, %v4343_v62  ;;  %v4039_v33 = vmul.f32 0.5, %v4038_v3  ;;  %v4191_v37 = vmul.f32 %v8355_v8, %v4190_v23  ;;  %v4057_v23 = vmul.f32 %v8431_v17, %v8375_v59 }
 0xaca   : > { %v4784_v4 = vmul.f32 %v4767_v36, %v8384_v15  ;;  %v4207_v36 = vmul.f32 %v4055_v2, %v8251_v27  ;;  %v4569_v6 = vmul.f32 %v6071_v45, %v4568_v44  ;;  %v4578_v51 = vor.u32 1.1754944e-38, %v4577_v63 }
 0xacb   : > { %v4040_v62 = vsub.f32 1.5, %v4039_v33  ;;  %v8440_v1 = vmul.f32 0.70710677, %v8423_v42  ;;  %v4195_v48 = vsel %vm8446_vm13, %v8355_v8, %v4191_v37  ;;  %v4058_v8 = vmul.f32 %v8431_v17, %v4057_v23 }
 0xacc   : > { %v4801_v52 = vadd.f32 1.4214138, %v4784_v4  ;;  %v4570_v4 = vadd.f32 %v6071_v45, %v4569_v6  ;;  %v4227_v40 = vmul.f32 %v8210_v21, %v4207_v36  ;;  %6076 = vpow2.f32 %v8392_v34 }
 0xacd   : > { %v4041_v27 = vmul.f32 %v8381_v14, %v4040_v62  ;;  %v8456_v2 = vand.u32 2147483647, %v8440_v1  ;;  %vm4072_vm8 = vweird.f32 %v8407_v30  ;;  %vm4412_vm6 = vcmp.ge.f32.partialorder %v8440_v1, 0.0 }
 0xace   : > { %v4818_v61 = vmul.f32 %v4801_v52, %v8384_v15  ;;  %v8464_v52 = vpop.eup %6074  ;;  %v4574_v44 = vsel %vm4573_vm3, %v6071_v45, %v4570_v4  ;;  %v4220_v45 = vmul.f32 %v4185_v49, %v8236_v24  ;;  %v4247_v23 = vadd.f32 %v8214_v7, %v4227_v40 }
 0xacf   : > { %v4045_v33 = vsel %vm4044_vm1, %v8381_v14, %v4041_v27  ;;  %v8470_v36 = vsel %vm4576_vm0, %v4578_v51, %v4574_v44  ;;  %v4221_v14 = vmul.f32 %v4195_v48, %v8247_v29  ;;  %v4921_v27 = vmul.f32 %v4904_v46, %v8353_v57 }
 0xad0   : > { %v4835_v13 = vadd.f32 -0.28449672, %v4818_v61  ;;  %v4345_v54 = vpop.f32.mrf.mxu2  ;;  %v4206_v62 = vmul.f32 %v4045_v33, %v8265_v22  ;;  %v4463_v61 = vmul.f32 0.3275911, %v8456_v2  ;;  %v4751_v63 = vmul.f32 1.0614054, %v8470_v36 }
 0xad1   : > { %v8474_v37 = vadd.f32 %v8313_v60, %v4345_v54  ;;  %v4067_v22 = vmul.f32 %v8464_v52, %v8407_v30  ;;  %v4059_v54 = vmul.f32 0.5, %v4058_v8  ;;  %v4241_v34 = vmul.f32 %v8210_v21, %v4221_v14  ;;  %v5704_v8 = vld [vmem:[%s9184_s17 + $0x8] sm:$0xff] }
 0xad2   : > { %v4852_v38 = vmul.f32 %v4835_v13, %v8384_v15  ;;  %v4226_v6 = vmul.f32 %v8210_v21, %v4206_v62  ;;  %v8483_v13 = vadd.f32 1.0, %v4463_v61  ;;  %v4768_v4 = vadd.f32 -1.4531521, %v4751_v63  ;;  %5720 = vmatpush.bf16.msrb.mxu3 %v5704_v8  ;;  %5114 = vmatpush.bf16.msra.mxu0 %v5704_v8 }
 0xad3   : > { %v8491_v24 = vmul.f32 0.70710677, %v8474_v37  ;;  %v4068_v46 = vmul.f32 %v8464_v52, %v4067_v22  ;;  %v4943_v51 = vmul.f32 1.442695, %v4921_v27  ;;  %v4240_v33 = vmul.f32 %v8210_v21, %v4220_v45 }
 0xad4   : > { %v4869_v3 = vadd.f32 0.2548296, %v4852_v38  ;;  %v4246_v29 = vadd.f32 %v8214_v7, %v4226_v6  ;;  %6078 = vrcp.f32 %v8483_v13  ;;  %v4785_v57 = vmul.f32 %v4768_v4, %v8470_v36  ;;  %v6077_v6 = vpop.eup %6076 }
 0xad5   : > { %v8499_v38 = vmul.f32 0.5, %v8317_v12  ;;  %v6349_v44 = vmov -1.0   ;;  %v8508_v14 = vmul.f32 0.5, %v8337_v43  ;;  %v4060_v12 = vsub.f32 1.5, %v4059_v54 }
 0xad6   : > { %v4263_v49 = vpack.c.bf16 %v4247_v23, %v4246_v29  ;;  %v4886_v48 = vmul.f32 %v4869_v3, %v8384_v15  ;;  %v4427_v62 = vsel %vm4410_vm4, 1.0, %v6349_v44  ;;  %v4802_v61 = vadd.f32 1.4214138, %v4785_v57 }
 0xad7   : > { %v8513_v15 = vsel %vm4411_vm5, 1.0, %v6349_v44  ;;  %v8516_v63 = vand.u32 2147483647, %v8491_v24  ;;  %v4069_v22 = vmul.f32 0.5, %v4068_v46  ;;  %v4261_v45 = vadd.f32 %v8214_v7, %v4241_v34 }
 0xad8   : > { %v4348_v40 = vpop.f32.mrf.mxu2  ;;  %5642 = vmatmul.msk.bf16.vlgmr.msrb.gmra.mxu0 %vm1160_vm2, %v4263_v49  ;;  %v4819_v32 = vmul.f32 %v4802_v61, %v8470_v36  ;;  %v4971_v3 = vmul.f32 %v6077_v6, %v4886_v48  ;;  %6080 = vpow2.f32 %v4943_v51  ;;  %v4260_v27 = vadd.f32 %v8214_v7, %v4240_v33 }
 0xad9   : > { %v4464_v50 = vmul.f32 0.3275911, %v8516_v63  ;;  %v8526_v29 = vadd.f32 %v8313_v60, %v4348_v40  ;;  %v4061_v54 = vmul.f32 %v8431_v17, %v4060_v12  ;;  %v4905_v57 = vsub.f32 0.0, %v8456_v2 }
 0xada   : > { %v6079_v43 = vpop.eup %6078  ;;  %v4836_v23 = vadd.f32 -0.28449672, %v4819_v32  ;;  %v4270_v46 = vpack.c.bf16 %v4261_v45, %v4260_v27  ;;  %v4070_v48 = vsub.f32 1.5, %v4069_v22  ;;  %v4988_v61 = vsub.f32 1.0, %v4971_v3  ;;  %v5703_v27 = vld [vmem:[%s9187_s0] sm:$0xff] }
 0xadb   : > { %v4582_v4 = vmul.f32 %v6079_v43, %v8483_v13  ;;  %v8530_v49 = vadd.f32 1.0, %v4464_v50  ;;  %v4590_v8 = vand.u32 2147483647, %v8483_v13  ;;  %v4592_v40 = vand.u32 2147483648, %v8483_v13  ;;  %5721 = vmatpush.bf16.msrb.mxu3 %v5703_v27  ;;  %5115 = vmatpush.bf16.msra.mxu0 %v5703_v27 }
 0xadc   : > { %v4853_v34 = vmul.f32 %v4836_v23, %v8470_v36  ;;  %5649 = vmatmul.msk.bf16.gmra.mxu2 %vm1160_vm2, %v4270_v46  ;;  %vm4587_vm10 = vweird.f32 %v6079_v43  ;;  %v8547_v22 = vmul.f32 0.70710677, %v8526_v29  ;;  %v4065_v3 = vsel %vm8542_vm9, %v8431_v17, %v4061_v54 }
 0xadd   : > { %v4583_v51 = vsub.f32 1.0, %v4582_v4  ;;  %6082 = vrcp.f32 %v8530_v49  ;;  %vm4073_vm11 = vweird.f32 %v8464_v52  ;;  %v4922_v50 = vmul.f32 %v4905_v57, %v8456_v2 }
 0xade   : > { %v4870_v12 = vadd.f32 0.2548296, %v4853_v34  ;;  %v6081_v45 = vpop.eup %6080  ;;  %v4071_v4 = vmul.f32 %v8464_v52, %v4070_v48  ;;  %vm4586_vm12 = vweird.f32 %v8483_v13  ;;  %v4593_v17 = vor.u32 1.1754944e-38, %v4592_v40  ;;  %vm8573_vm15 = vmor %vm4072_vm8, %vm4073_vm11 }
 0xadf   : > { %v4584_v32 = vmul.f32 %v6079_v43, %v4583_v51  ;;  %v5005_v51 = vmul.f32 %v4988_v61, %v4427_v62  ;;  %vm4588_vm13 = vmor %vm4586_vm12, %vm4587_vm10  ;;  %v8563_v54 = vand.u32 2147483647, %v8547_v22  ;;  %vm4591_vm14 = vcmp.eq.f32.partialorder %v4590_v8, 8.507059e+37 }
 0xae0   : > { %v4350_v33 = vpop.f32.mrf.mxu2  ;;  %v4887_v23 = vmul.f32 %v4870_v12, %v8470_v36  ;;  %v4208_v36 = vmul.f32 %v4065_v3, %v8270_v5  ;;  %v4945_v61 = vmul.f32 1.442695, %v4922_v50  ;;  %v4075_v5 = vsel %vm8573_vm15, %v8464_v52, %v4071_v4 }
 0xae1   : > { %v8555_v59 = vadd.f32 %v8313_v60, %v4350_v33  ;;  %v4585_v46 = vadd.f32 %v6079_v43, %v4584_v32  ;;  %v4465_v40 = vmul.f32 0.3275911, %v8563_v54  ;;  %v5022_v8 = vadd.f32 1.0, %v5005_v51 }
 0xae2   : > { %v4001_v34 = vpop.xlane.xlu0 %4000  ;;  %v4972_v57 = vmul.f32 %v6081_v45, %v4887_v23  ;;  %v4906_v32 = vsub.f32 0.0, %v8516_v63  ;;  %v4209_v52 = vmul.f32 %v4075_v5, %v8283_v16  ;;  %v4605_v4 = vand.u32 2147483647, %v8530_v49 }
 0xae3   : > { %v8566_v2 = vmul.f32 0.70710677, %v8555_v59  ;;  %v4589_v33 = vsel %vm4588_vm13, %v6079_v43, %v4585_v46  ;;  %v6083_v48 = vpop.eup %6082  ;;  %v4018_v12 = vmul.f32 %v4001_v34, %v6711_v41  ;;  %v8587_v45 = vadd.f32 1.0, %v4465_v40 }
 0xae4   : > { %v8577_v62 = vsel %vm4591_vm14, %v4593_v17, %v4589_v33  ;;  %v4989_v6 = vsub.f32 1.0, %v4972_v57  ;;  %v4597_v30 = vmul.f32 %v6083_v48, %v8530_v49  ;;  %v4607_v46 = vand.u32 2147483648, %v8530_v49 }
 0xae5   : > { %v4752_v43 = vmul.f32 1.0614054, %v8577_v62  ;;  %v8590_v3 = vand.u32 2147483647, %v8566_v2  ;;  %6084 = vrcp.f32 %v8587_v45  ;;  %v8597_v34 = vadd.f32 1e-05, %v4018_v12 }
 0xae6   : > { %v5006_v50 = vmul.f32 %v4989_v6, %v8513_v15  ;;  %v4598_v23 = vsub.f32 1.0, %v4597_v30  ;;  %vm4602_vm0 = vweird.f32 %v6083_v48  ;;  %v5039_v33 = vmul.f32 %v5022_v8, %v8499_v38 }
 0xae7   : > { %v4769_v27 = vadd.f32 -1.4531521, %v4752_v43  ;;  %vm4601_vm1 = vweird.f32 %v8530_v49  ;;  %v4923_v15 = vmul.f32 %v4906_v32, %v8516_v63  ;;  %v4466_v13 = vmul.f32 0.3275911, %v8590_v3 }
 0xae8   : > { %v5023_v51 = vadd.f32 1.0, %v5006_v50  ;;  %v4599_v57 = vmul.f32 %v6083_v48, %v4598_v23  ;;  %v4608_v5 = vor.u32 1.1754944e-38, %v4607_v46  ;;  %vm4603_vm3 = vmor %vm4601_vm1, %vm4602_vm0  ;;  %6086 = vrsqrt.f32 %v8597_v34 }
 0xae9   : > { %v4786_v17 = vmul.f32 %v4769_v27, %v8577_v62  ;;  %v8605_v12 = vadd.f32 1.0, %v4466_v13  ;;  %v4228_v43 = vmul.f32 %v8210_v21, %v4208_v36  ;;  %v4229_v38 = vmul.f32 %v8210_v21, %v4209_v52 }
 0xaea   : > { %v5040_v16 = vmul.f32 %v5023_v51, %v8508_v14  ;;  %v4600_v6 = vadd.f32 %v6083_v48, %v4599_v57  ;;  %vm4606_vm4 = vcmp.eq.f32.partialorder %v4605_v4, 8.507059e+37  ;;  %v4947_v36 = vmul.f32 1.442695, %v4923_v15 }
 0xaeb   : > { %v4803_v40 = vadd.f32 1.4214138, %v4786_v17  ;;  %v6085_v8 = vpop.eup %6084  ;;  %6088 = vrcp.f32 %v8605_v12  ;;  %v4248_v21 = vadd.f32 %v8214_v7, %v4228_v43  ;;  %v4249_v23 = vadd.f32 %v8214_v7, %v4229_v38 }
 0xaec   : > { %v5054_v30 = vpack.c.bf16 %v5040_v16, %v5039_v33  ;;  %v4604_v63 = vsel %vm4603_vm3, %v6083_v48, %v4600_v6  ;;  %v4612_v27 = vmul.f32 %v6085_v8, %v8587_v45  ;;  %6090 = vpow2.f32 %v4945_v61 }
 0xaed   : > { %v4820_v49 = vmul.f32 %v4803_v40, %v8577_v62  ;;  %v8611_v32 = vsel %vm4606_vm4, %v4608_v5, %v4604_v63  ;;  %vm4617_vm5 = vweird.f32 %v6085_v8  ;;  %v4620_v51 = vand.u32 2147483647, %v8587_v45 }
 0xaee   : > { %v4753_v50 = vmul.f32 1.0614054, %v8611_v32  ;;  %5661 = vmatmul.msk.bf16.vlgmr.msrb.gmra.mxu3 %vm1160_vm2, %v5054_v30  ;;  %v4613_v52 = vsub.f32 1.0, %v4612_v27  ;;  %v8620_v4 = vpop.eup %6086  ;;  %v4622_v17 = vand.u32 2147483648, %v8587_v45  ;;  %v4264_v57 = vpack.c.bf16 %v4249_v23, %v4248_v21 }
 0xaef   : > { %v4837_v14 = vadd.f32 -0.28449672, %v4820_v49  ;;  %v4197_v7 = vmul.f32 %v8620_v4, %v8597_v34  ;;  %6092 = vpow2.f32 %v4947_v36  ;;  %vm4616_vm7 = vweird.f32 %v8587_v45 }
 0xaf0   : > { %v4770_v46 = vadd.f32 -1.4531521, %v4753_v50  ;;  %v4614_v13 = vmul.f32 %v6085_v8, %v4613_v52  ;;  %5643 = vmatmul.msk.bf16.gmra.mxu0 %vm1160_vm2, %v4264_v57  ;;  %vm4618_vm8 = vmor %vm4616_vm7, %vm4617_vm5  ;;  %vm4621_vm9 = vcmp.eq.f32.partialorder %v4620_v51, 8.507059e+37  ;;  %v4623_v43 = vor.u32 1.1754944e-38, %v4622_v17 }
 0xaf1   : > { %v4854_v48 = vmul.f32 %v4837_v14, %v8577_v62  ;;  %v6089_v16 = vpop.eup %6088  ;;  %v4907_v38 = vsub.f32 0.0, %v8563_v54  ;;  %v4198_v30 = vmul.f32 %v8620_v4, %v4197_v7  ;;  %v4635_v50 = vand.u32 2147483647, %v8605_v12 }
 0xaf2   : > { %v4787_v15 = vmul.f32 %v4770_v46, %v8611_v32  ;;  %v4615_v6 = vadd.f32 %v6085_v8, %v4614_v13  ;;  %v4627_v5 = vmul.f32 %v6089_v16, %v8605_v12  ;;  %v6091_v49 = vpop.eup %6090  ;;  %vm4632_vm10 = vweird.f32 %v6089_v16 }
 0xaf3   : > { %v4871_v33 = vadd.f32 0.2548296, %v4854_v48  ;;  %v4637_v27 = vand.u32 2147483648, %v8605_v12  ;;  %v4199_v36 = vmul.f32 0.5, %v4198_v30  ;;  %v4924_v51 = vmul.f32 %v4907_v38, %v8563_v54 }
 0xaf4   : > { %v4804_v40 = vadd.f32 1.4214138, %v4787_v15  ;;  %v4619_v45 = vsel %vm4618_vm8, %v6085_v8, %v4615_v6  ;;  %v4628_v14 = vsub.f32 1.0, %v4627_v5  ;;  %v4908_v17 = vsub.f32 0.0, %v8590_v3 }
 0xaf5   : > { %v4888_v61 = vmul.f32 %v4871_v33, %v8577_v62  ;;  %v8637_v62 = vsel %vm4621_vm9, %v4623_v43, %v4619_v45  ;;  %v6093_v52 = vpop.eup %6092  ;;  %v4200_v8 = vsub.f32 1.5, %v4199_v36  ;;  %vm4203_vm11 = vweird.f32 %v8620_v4 }
 0xaf6   : > { %v4821_v63 = vmul.f32 %v4804_v40, %v8611_v32  ;;  %v4754_v48 = vmul.f32 1.0614054, %v8637_v62  ;;  %v4629_v46 = vmul.f32 %v6089_v16, %v4628_v14  ;;  %vm4631_vm12 = vweird.f32 %v8605_v12 }
 0xaf7   : > { %v4973_v21 = vmul.f32 %v6091_v49, %v4888_v61  ;;  %vm4633_vm13 = vmor %vm4631_vm12, %vm4632_vm10  ;;  %vm4636_vm14 = vcmp.eq.f32.partialorder %v4635_v50, 8.507059e+37  ;;  %v4638_v13 = vor.u32 1.1754944e-38, %v4637_v27  ;;  %v4201_v7 = vmul.f32 %v8620_v4, %v4200_v8 }
 0xaf8   : > { %v4838_v23 = vadd.f32 -0.28449672, %v4821_v63  ;;  %v4771_v33 = vadd.f32 -1.4531521, %v4754_v48  ;;  %v4630_v15 = vadd.f32 %v6089_v16, %v4629_v46  ;;  %vm4202_vm15 = vweird.f32 %v8597_v34 }
 0xaf9   : > { %v4990_v54 = vsub.f32 1.0, %v4973_v21  ;;  %vm4204_vm0 = vmor %vm4202_vm15, %vm4203_vm11  ;;  %v4429_v5 = vsel %vm4412_vm6, 1.0, %v6349_v44  ;;  %vm4413_vm1 = vcmp.ge.f32.partialorder %v8491_v24, 0.0  ;;  %v4949_v63 = vmul.f32 1.442695, %v4924_v51 }
 0xafa   : > { %v4855_v57 = vmul.f32 %v4838_v23, %v8611_v32  ;;  %v4788_v40 = vmul.f32 %v4771_v33, %v8637_v62  ;;  %v4634_v6 = vsel %vm4633_vm13, %v6089_v16, %v4630_v15  ;;  %v4205_v12 = vsel %vm4204_vm0, %v8620_v4, %v4201_v7 }
 0xafb   : > { %v4639_v43 = vsel %vm4636_vm14, %v4638_v13, %v4634_v6  ;;  %v4925_v45 = vmul.f32 %v4908_v17, %v8590_v3  ;;  %v4222_v16 = vmul.f32 %v4205_v12, %v8298_v26  ;;  %v5007_v14 = vmul.f32 %v4990_v54, %v4429_v5 }
 0xafc   : > { %v4872_v61 = vadd.f32 0.2548296, %v4855_v57  ;;  %v4805_v30 = vadd.f32 1.4214138, %v4788_v40  ;;  %v4755_v34 = vmul.f32 1.0614054, %v4639_v43  ;;  %6094 = vpow2.f32 %v4949_v63 }
 0xafd   : > { %v4430_v3 = vsel %vm4413_vm1, 1.0, %v6349_v44  ;;  %v4951_v46 = vmul.f32 1.442695, %v4925_v45  ;;  %v5024_v8 = vadd.f32 1.0, %v5007_v14  ;;  %v4378_v13 = vmul.f32 0.5, %v8423_v42 }
 0xafe   : > { %v4889_v38 = vmul.f32 %v4872_v61, %v8611_v32  ;;  %v4822_v4 = vmul.f32 %v4805_v30, %v8637_v62  ;;  %v4772_v27 = vadd.f32 -1.4531521, %v4755_v34  ;;  %v6159_v32 = vld [vmem:[%s6600_s2] ss:$0 sm:$0xff]  ;;  %v4379_v54 = vmul.f32 0.5, %v8474_v37 }
 0xaff   : > { %v4242_v21 = vmul.f32 %v6159_v32, %v4222_v16  ;;  %6096 = vpow2.f32 %v4951_v46  ;;  %v5041_v30 = vmul.f32 %v5024_v8, %v4378_v13  ;;  %vm4414_vm3 = vcmp.ge.f32.partialorder %v8547_v22, 0.0 }
 0xb00   : > { %v4974_v50 = vmul.f32 %v6093_v52, %v4889_v38  ;;  %v4839_v26 = vadd.f32 -0.28449672, %v4822_v4  ;;  %v4789_v48 = vmul.f32 %v4772_v27, %v4639_v43  ;;  %v6160_v52 = vld [vmem:[%s6606_s27] ss:$0 sm:$0xff]  ;;  %vm4415_vm4 = vcmp.ge.f32.partialorder %v8566_v2, 0.0 }
 0xb01   : > { %v4353_v49 = vpop.f32.mrf.mxu2  ;;  %v4262_v17 = vadd.f32 %v6160_v52, %v4242_v21  ;;  %v4431_v21 = vsel %vm4414_vm3, 1.0, %v6349_v44  ;;  %v4380_v13 = vmul.f32 0.5, %v8526_v29 }
 0xb02   : > { %v8659_v1 = vadd.f32 %v8313_v60, %v4353_v49  ;;  %v4991_v23 = vsub.f32 1.0, %v4974_v50  ;;  %v4856_v33 = vmul.f32 %v4839_v26, %v8637_v62  ;;  %v4806_v15 = vadd.f32 1.4214138, %v4789_v48  ;;  %v6095_v63 = vpop.eup %6094 }
 0xb03   : > { %v4271_v7 = vpack.c.bf16 %v4262_v17, %v4262_v17  ;;  %v4432_v17 = vsel %vm4415_vm4, 1.0, %v6349_v44 }
 0xb04   : > { %v8663_v36 = vmul.f32 0.70710677, %v8659_v1  ;;  %v5008_v57 = vmul.f32 %v4991_v23, %v4430_v3  ;;  %v4873_v40 = vadd.f32 0.2548296, %v4856_v33  ;;  %v4823_v6 = vmul.f32 %v4806_v15, %v4639_v43 }
 0xb05   : > { %5650 = vmatmul.msk.bf16.gmra.mxu2 %vm1160_vm2, %v4271_v7 }
 0xb06   : > { %v8670_v51 = vand.u32 2147483647, %v8663_v36  ;;  %v5025_v61 = vadd.f32 1.0, %v5008_v57  ;;  %v4890_v42 = vmul.f32 %v4873_v40, %v8637_v62  ;;  %v4840_v49 = vadd.f32 -0.28449672, %v4823_v6 }
 0xb07   : > { %vm4416_vm13 = vcmp.ge.f32.partialorder %v8663_v36, 0.0 }
 0xb08   : > { %v4467_v24 = vmul.f32 0.3275911, %v8670_v51  ;;  %v5042_v34 = vmul.f32 %v5025_v61, %v4379_v54  ;;  %v4975_v37 = vmul.f32 %v6095_v63, %v4890_v42  ;;  %v4857_v16 = vmul.f32 %v4840_v49, %v4639_v43 }
 0xb09   : > { %v4355_v5 = vpop.f32.mrf.mxu2  ;;  %v4909_v63 = vsub.f32 0.0, %v8670_v51 }
 0xb0a   : > { %v4484_v12 = vadd.f32 1.0, %v4467_v24  ;;  %v8679_v38 = vadd.f32 %v8313_v60, %v4355_v5  ;;  %v5055_v45 = vpack.c.bf16 %v5042_v34, %v5041_v30  ;;  %v4992_v50 = vsub.f32 1.0, %v4975_v37  ;;  %v6097_v60 = vpop.eup %6096 }
 0xb0b   : > { %v4874_v4 = vadd.f32 0.2548296, %v4857_v16  ;;  %v4381_v24 = vmul.f32 0.5, %v8555_v59 }
 0xb0c   : > { %6098 = vrcp.f32 %v4484_v12  ;;  %v8683_v14 = vmul.f32 0.70710677, %v8679_v38  ;;  %5662 = vmatmul.msk.bf16.gmra.mxu3 %vm1160_vm2, %v5055_v45  ;;  %v5009_v23 = vmul.f32 %v4992_v50, %v4431_v21  ;;  %v4650_v8 = vand.u32 2147483647, %v4484_v12 }
 0xb0d   : > { %v4891_v32 = vmul.f32 %v4874_v4, %v4639_v43  ;;  %v4652_v57 = vand.u32 2147483648, %v4484_v12  ;;  %vm4646_vm6 = vweird.f32 %v4484_v12  ;;  %v4926_v50 = vmul.f32 %v4909_v63, %v8670_v51 }
 0xb0e   : > { %v4451_v27 = vand.u32 2147483647, %v8683_v14  ;;  %v5026_v33 = vadd.f32 1.0, %v5009_v23  ;;  %vm4651_vm8 = vcmp.eq.f32.partialorder %v4650_v8, 8.507059e+37  ;;  %vm4417_vm14 = vcmp.ge.f32.partialorder %v8683_v14, 0.0 }
 0xb0f   : > { %v4976_v26 = vmul.f32 %v6097_v60, %v4891_v32  ;;  %v4653_v54 = vor.u32 1.1754944e-38, %v4652_v57  ;;  %v4383_v36 = vmul.f32 0.5, %v8679_v38 }
 0xb10   : > { %v4468_v3 = vmul.f32 0.3275911, %v4451_v27  ;;  %v5043_v61 = vmul.f32 %v5026_v33, %v4380_v13 }
 0xb11   : > { %v4993_v52 = vsub.f32 1.0, %v4976_v26  ;;  %v4910_v26 = vsub.f32 0.0, %v4451_v27 }
 0xb12   : > { %v6099_v62 = vpop.eup %6098  ;;  %v4485_v46 = vadd.f32 1.0, %v4468_v3  ;;  %v4953_v3 = vmul.f32 1.442695, %v4926_v50  ;;  %v8704_v50 = vld [vmem:[%s6617_s22] ss:$0 sm:$0xff] }
 0xb13   : > { %v4642_v48 = vmul.f32 %v6099_v62, %v4484_v12  ;;  %v5010_v15 = vmul.f32 %v4993_v52, %v4432_v17  ;;  %vm4647_vm5 = vweird.f32 %v6099_v62  ;;  %v4927_v8 = vmul.f32 %v4910_v26, %v4451_v27 }
 0xb14   : > { %6100 = vrcp.f32 %v4485_v46  ;;  %vm4648_vm7 = vmor %vm4646_vm6, %vm4647_vm5  ;;  %v4667_v59 = vand.u32 2147483648, %v4485_v46  ;;  %v4665_v16 = vand.u32 2147483647, %v4485_v46  ;;  %vm4661_vm10 = vweird.f32 %v4485_v46 }
 0xb15   : > { %v4643_v22 = vsub.f32 1.0, %v4642_v48  ;;  %v5027_v7 = vadd.f32 1.0, %v5010_v15  ;;  %6102 = vpow2.f32 %v4953_v3 }
 0xb16   : > { %v4668_v32 = vor.u32 1.1754944e-38, %v4667_v59  ;;  %vm4666_vm12 = vcmp.eq.f32.partialorder %v4665_v16, 8.507059e+37 }
 0xb17   : > { %v4644_v43 = vmul.f32 %v6099_v62, %v4643_v22  ;;  %v5044_v40 = vmul.f32 %v5027_v7, %v4381_v24 }
 0xb19   : > { %v4645_v2 = vadd.f32 %v6099_v62, %v4644_v43  ;;  %v5056_v34 = vpack.c.bf16 %v5044_v40, %v5043_v61  ;;  %v4955_v43 = vmul.f32 1.442695, %v4927_v8 }
 0xb1a   : > { %v6101_v5 = vpop.eup %6100 }
 0xb1b   : > { %v4649_v6 = vsel %vm4648_vm7, %v6099_v62, %v4645_v2  ;;  %v4657_v49 = vmul.f32 %v6101_v5, %v4485_v46  ;;  %vm4662_vm9 = vweird.f32 %v6101_v5  ;;  %v6103_v13 = vpop.eup %6102  ;;  %6104 = vpow2.f32 %v4955_v43 }
 0xb1c   : > { %v4654_v30 = vsel %vm4651_vm8, %v4653_v54, %v4649_v6  ;;  %5663 = vmatmul.msk.bf16.gmra.mxu3 %vm1160_vm2, %v5056_v34  ;;  %vm4663_vm11 = vmor %vm4661_vm10, %vm4662_vm9 }
 0xb1d   : > { %v4756_v42 = vmul.f32 1.0614054, %v4654_v30  ;;  %v4658_v29 = vsub.f32 1.0, %v4657_v49 }
 0xb1f   : > { %v4773_v45 = vadd.f32 -1.4531521, %v4756_v42  ;;  %v4659_v12 = vmul.f32 %v6101_v5, %v4658_v29  ;;  %v4434_v42 = vsel %vm4417_vm14, 1.0, %v6349_v44 }
 0xb21   : > { %v4790_v37 = vmul.f32 %v4773_v45, %v4654_v30  ;;  %v4660_v60 = vadd.f32 %v6101_v5, %v4659_v12  ;;  %v6105_v6 = vpop.eup %6104  ;;  %v4382_v45 = vmul.f32 0.5, %v8659_v1 }
 0xb23   : > { %v4807_v4 = vadd.f32 1.4214138, %v4790_v37  ;;  %v4664_v21 = vsel %vm4663_vm11, %v6101_v5, %v4660_v60  ;;  %v4433_v5 = vsel %vm4416_vm13, 1.0, %v6349_v44 }
 0xb24   : > { %v4669_v23 = vsel %vm4666_vm12, %v4668_v32, %v4664_v21 }
 0xb25   : > { %v4824_v62 = vmul.f32 %v4807_v4, %v4654_v30  ;;  %v4757_v52 = vmul.f32 1.0614054, %v4669_v23 }
 0xb27   : > { %v4841_v48 = vadd.f32 -0.28449672, %v4824_v62  ;;  %v4774_v17 = vadd.f32 -1.4531521, %v4757_v52 }
 0xb29   : > { %v4858_v22 = vmul.f32 %v4841_v48, %v4654_v30  ;;  %v4791_v33 = vmul.f32 %v4774_v17, %v4669_v23 }
 0xb2b   : > { %v4875_v57 = vadd.f32 0.2548296, %v4858_v22  ;;  %v4808_v15 = vadd.f32 1.4214138, %v4791_v33 }
 0xb2d   : > { %v4892_v51 = vmul.f32 %v4875_v57, %v4654_v30  ;;  %v4825_v46 = vmul.f32 %v4808_v15, %v4669_v23 }
 0xb2f   : > { %v4977_v24 = vmul.f32 %v6103_v13, %v4892_v51  ;;  %v4842_v7 = vadd.f32 -0.28449672, %v4825_v46 }
 0xb31   : > { %v4859_v2 = vmul.f32 %v4842_v7, %v4669_v23  ;;  %v4994_v54 = vsub.f32 1.0, %v4977_v24 }
 0xb33   : > { %v4876_v61 = vadd.f32 0.2548296, %v4859_v2  ;;  %v5011_v27 = vmul.f32 %v4994_v54, %v4433_v5 }
 0xb35   : > { %v4893_v40 = vmul.f32 %v4876_v61, %v4669_v23  ;;  %v5028_v49 = vadd.f32 1.0, %v5011_v27 }
 0xb37   : > { %v4978_v30 = vmul.f32 %v6105_v6, %v4893_v40  ;;  %v5045_v59 = vmul.f32 %v5028_v49, %v4382_v45 }
 0xb39   : > { %v4995_v34 = vsub.f32 1.0, %v4978_v30 }
 0xb3b   : > { %v5012_v63 = vmul.f32 %v4995_v34, %v4434_v42 }
 0xb3d   : > { %v5029_v29 = vadd.f32 1.0, %v5012_v63 }
 0xb3f   : > { %v5046_v37 = vmul.f32 %v5029_v29, %v4383_v36 }
 0xb41   : > { %v5057_v12 = vpack.c.bf16 %v5046_v37, %v5045_v59 }
 0xb43   : > { %5664 = vmatmul.msk.bf16.gmra.mxu3 %vm1160_vm2, %v5057_v12 }
 0xb44   : > { %v4358_v16 = vpop.f32.mrf.mxu2 }
 0xb45   : > { %v4359_v14 = vadd.f32 %v8704_v50, %v4358_v16 }
 0xb47   : > { %v8707_v4 = vmul.f32 0.70710677, %v4359_v14  ;;  %v8744_v29 = vmul.f32 0.5, %v4359_v14 }
 0xb49   : > { %v4452_v60 = vand.u32 2147483647, %v8707_v4  ;;  %vm4418_vm4 = vcmp.ge.f32.partialorder %v8707_v4, 0.0 }
 0xb4b   : > { %v4469_v32 = vmul.f32 0.3275911, %v4452_v60  ;;  %v4911_v17 = vsub.f32 0.0, %v4452_v60 }
 0xb4c   : > { %v4360_v62 = vpop.f32.mrf.mxu2 }
 0xb4d   : > { %v4486_v1 = vadd.f32 1.0, %v4469_v32  ;;  %v8711_v38 = vadd.f32 %v8704_v50, %v4360_v62  ;;  %v4928_v43 = vmul.f32 %v4911_v17, %v4452_v60 }
 0xb4f   : > { %6106 = vrcp.f32 %v4486_v1  ;;  %v8714_v21 = vmul.f32 0.70710677, %v8711_v38  ;;  %v4682_v15 = vand.u32 2147483648, %v4486_v1  ;;  %v4680_v7 = vand.u32 2147483647, %v4486_v1 }
 0xb50   : > { %vm4676_vm0 = vweird.f32 %v4486_v1  ;;  %v4957_v5 = vmul.f32 1.442695, %v4928_v43 }
 0xb51   : > { %v4453_v23 = vand.u32 2147483647, %v8714_v21  ;;  %v4683_v6 = vor.u32 1.1754944e-38, %v4682_v15  ;;  %vm4681_vm3 = vcmp.eq.f32.partialorder %v4680_v7, 8.507059e+37  ;;  %vm4419_vm11 = vcmp.ge.f32.partialorder %v8714_v21, 0.0 }
 0xb53   : > { %v4470_v48 = vmul.f32 0.3275911, %v4453_v23  ;;  %v4912_v34 = vsub.f32 0.0, %v4453_v23 }
 0xb55   : > { %v4328_v3 = vpop.f32.mrf.mxu0  ;;  %v6107_v22 = vpop.eup %6106  ;;  %v4487_v57 = vadd.f32 1.0, %v4470_v48  ;;  %v4929_v62 = vmul.f32 %v4912_v34, %v4453_v23 }
 0xb56   : > { %v8718_v26 = vadd.f32 %v8704_v50, %v4328_v3  ;;  %v4672_v8 = vmul.f32 %v6107_v22, %v4486_v1  ;;  %vm4677_vm15 = vweird.f32 %v6107_v22 }
 0xb57   : > { %6108 = vrcp.f32 %v4487_v57  ;;  %vm4678_vm1 = vmor %vm4676_vm0, %vm4677_vm15  ;;  %v4695_v37 = vand.u32 2147483647, %v4487_v57  ;;  %v4697_v16 = vand.u32 2147483648, %v4487_v57  ;;  %vm4691_vm5 = vweird.f32 %v4487_v57 }
 0xb58   : > { %v8721_v52 = vmul.f32 0.70710677, %v8718_v26  ;;  %v4673_v51 = vsub.f32 1.0, %v4672_v8 }
 0xb59   : > { %vm8756_vm7 = vcmp.eq.f32.partialorder %v4695_v37, 8.507059e+37  ;;  %v4698_v15 = vor.u32 1.1754944e-38, %v4697_v16 }
 0xb5a   : > { %v8724_v33 = vand.u32 2147483647, %v8721_v52  ;;  %v4674_v24 = vmul.f32 %v6107_v22, %v4673_v51 }
 0xb5c   : > { %v4457_v46 = vmul.f32 0.3275911, %v8724_v33  ;;  %v4675_v61 = vadd.f32 %v6107_v22, %v4674_v24  ;;  %v4899_v51 = vsub.f32 0.0, %v8724_v33 }
 0xb5d   : > { %v4330_v13 = vpop.f32.mrf.mxu0  ;;  %v6109_v27 = vpop.eup %6108 }
 0xb5e   : > { %v8728_v2 = vadd.f32 %v8704_v50, %v4330_v13  ;;  %v8730_v54 = vadd.f32 1.0, %v4457_v46  ;;  %v4679_v30 = vsel %vm4678_vm1, %v6107_v22, %v4675_v61  ;;  %v4687_v45 = vmul.f32 %v6109_v27, %v4487_v57 }
 0xb5f   : > { %v4363_v42 = vpop.f32.mrf.mxu2  ;;  %v8739_v63 = vsel %vm4681_vm3, %v4683_v6, %v4679_v30  ;;  %vm4692_vm6 = vweird.f32 %v6109_v27 }
 0xb60   : > { %v8733_v40 = vmul.f32 0.70710677, %v8728_v2  ;;  %6110 = vrcp.f32 %v8730_v54  ;;  %v8742_v36 = vadd.f32 %v8704_v50, %v4363_v42  ;;  %v4758_v59 = vmul.f32 1.0614054, %v8739_v63  ;;  %vm4693_vm8 = vmor %vm4691_vm5, %vm4692_vm6 }
 0xb61   : > { %v4688_v12 = vsub.f32 1.0, %v4687_v45  ;;  %6112 = vpow2.f32 %v4957_v5  ;;  %v4500_v24 = vand.u32 2147483647, %v8730_v54  ;;  %v4502_v7 = vand.u32 2147483648, %v8730_v54 }
 0xb62   : > { %v8737_v49 = vand.u32 2147483647, %v8733_v40  ;;  %v8749_v60 = vmul.f32 0.70710677, %v8742_v36  ;;  %v4775_v32 = vadd.f32 -1.4531521, %v4758_v59  ;;  %vm4496_vm10 = vweird.f32 %v8730_v54 }
 0xb63   : > { %v4689_v48 = vmul.f32 %v6109_v27, %v4688_v12  ;;  %v4916_v12 = vmul.f32 %v4899_v51, %v8724_v33  ;;  %vm4501_vm13 = vcmp.eq.f32.partialorder %v4500_v24, 8.507059e+37 }
 0xb64   : > { %v4458_v1 = vmul.f32 0.3275911, %v8737_v49  ;;  %v8753_v14 = vand.u32 2147483647, %v8749_v60  ;;  %v4792_v22 = vmul.f32 %v4775_v32, %v8739_v63  ;;  %v4959_v32 = vmul.f32 1.442695, %v4929_v62 }
 0xb65   : > { %v4690_v23 = vadd.f32 %v6109_v27, %v4689_v48 }
 0xb66   : > { %v6111_v3 = vpop.eup %6110  ;;  %v4471_v43 = vmul.f32 0.3275911, %v8753_v14  ;;  %v8763_v46 = vadd.f32 1.0, %v4458_v1  ;;  %v4809_v57 = vadd.f32 1.4214138, %v4792_v22  ;;  %v4503_v22 = vor.u32 1.1754944e-38, %v4502_v7 }
 0xb67   : > { %v4492_v8 = vmul.f32 %v6111_v3, %v8730_v54  ;;  %v4365_v61 = vpop.f32.mrf.mxu2  ;;  %v4694_v6 = vsel %vm4693_vm8, %v6109_v27, %v4690_v23  ;;  %vm4497_vm9 = vweird.f32 %v6111_v3  ;;  %v6113_v34 = vpop.eup %6112  ;;  %v8781_v27 = vsel %vm4418_vm4, 1.0, %v6349_v44 }
 0xb68   : > { %v8767_v5 = vadd.f32 1.0, %v4471_v43  ;;  %v8770_v30 = vadd.f32 %v8704_v50, %v4365_v61  ;;  %v4826_v42 = vmul.f32 %v4809_v57, %v8739_v63  ;;  %v8775_v45 = vsel %vm8756_vm7, %v4698_v15, %v4694_v6  ;;  %vm4498_vm12 = vmor %vm4496_vm10, %vm4497_vm9 }
 0xb69   : > { %v4493_v13 = vsub.f32 1.0, %v4492_v8  ;;  %6114 = vrcp.f32 %v8763_v46  ;;  %v4759_v37 = vmul.f32 1.0614054, %v8775_v45  ;;  %v8794_v8 = vmul.f32 0.5, %v8711_v38 }
 0xb6a   : > { %6116 = vrcp.f32 %v8767_v5  ;;  %v4843_v16 = vadd.f32 -0.28449672, %v4826_v42  ;;  %v8790_v4 = vmul.f32 0.70710677, %v8770_v30  ;;  %v4933_v54 = vmul.f32 1.442695, %v4916_v12 }
 0xb6b   : > { %v4494_v59 = vmul.f32 %v6111_v3, %v4493_v13  ;;  %v4776_v48 = vadd.f32 -1.4531521, %v4759_v37  ;;  %v8805_v43 = vsel %vm4419_vm11, 1.0, %v6349_v44  ;;  %6118 = vpow2.f32 %v4959_v32 }
 0xb6c   : > { %v4860_v17 = vmul.f32 %v4843_v16, %v8739_v63  ;;  %v8800_v21 = vand.u32 2147483647, %v8790_v4  ;;  %v4900_v7 = vsub.f32 0.0, %v8737_v49  ;;  %v4913_v42 = vsub.f32 0.0, %v8753_v14 }
 0xb6d   : > { %v4495_v1 = vadd.f32 %v6111_v3, %v4494_v59  ;;  %v4793_v62 = vmul.f32 %v4776_v48, %v8775_v45  ;;  %6120 = vpow2.f32 %v4933_v54  ;;  %v4710_v48 = vand.u32 2147483647, %v8767_v5 }
 0xb6e   : > { %v4877_v15 = vadd.f32 0.2548296, %v4860_v17  ;;  %v4472_v13 = vmul.f32 0.3275911, %v8800_v21  ;;  %v4930_v54 = vmul.f32 %v4913_v42, %v8753_v14  ;;  %vm4706_vm15 = vweird.f32 %v8767_v5 }
 0xb6f   : > { %v4499_v33 = vsel %vm4498_vm12, %v6111_v3, %v4495_v1  ;;  %v8802_v23 = vpop.eup %6114  ;;  %v4810_v3 = vadd.f32 1.4214138, %v4793_v62  ;;  %vm8829_vm0 = vcmp.eq.f32.partialorder %v4710_v48, 8.507059e+37  ;;  %vm4511_vm4 = vweird.f32 %v8763_v46 }
 0xb70   : > { %v8797_v51 = vsel %vm4501_vm13, %v4503_v22, %v4499_v33  ;;  %v6117_v57 = vpop.eup %6116  ;;  %v4507_v24 = vmul.f32 %v8802_v23, %v8763_v46  ;;  %v4894_v61 = vmul.f32 %v4877_v15, %v8739_v63  ;;  %v8816_v12 = vadd.f32 1.0, %v4472_v13 }
 0xb71   : > { %v4746_v38 = vmul.f32 1.0614054, %v8797_v51  ;;  %v4702_v6 = vmul.f32 %v6117_v57, %v8767_v5  ;;  %v4827_v37 = vmul.f32 %v4810_v3, %v8775_v45  ;;  %v4712_v63 = vand.u32 2147483648, %v8767_v5  ;;  %v6119_v62 = vpop.eup %6118 }
 0xb72   : > { %v4508_v16 = vsub.f32 1.0, %v4507_v24  ;;  %v4979_v32 = vmul.f32 %v6113_v34, %v4894_v61  ;;  %6122 = vrcp.f32 %v8816_v12  ;;  %v8823_v33 = vmul.f32 %v4900_v7, %v8737_v49  ;;  %v4333_v24 = vpop.f32.mrf.mxu0 }
 0xb73   : > { %v4763_v59 = vadd.f32 -1.4531521, %v4746_v38  ;;  %v4703_v1 = vsub.f32 1.0, %v4702_v6  ;;  %v4844_v17 = vadd.f32 -0.28449672, %v4827_v37  ;;  %vm4707_vm14 = vweird.f32 %v6117_v57  ;;  %v8835_v7 = vpop.eup %6120 }
 0xb74   : > { %v4996_v34 = vsub.f32 1.0, %v4979_v32  ;;  %v4509_v13 = vmul.f32 %v8802_v23, %v4508_v16  ;;  %vm4512_vm1 = vweird.f32 %v8802_v23  ;;  %vm4708_vm3 = vmor %vm4706_vm15, %vm4707_vm14  ;;  %v4713_v42 = vor.u32 1.1754944e-38, %v4712_v63 }
 0xb75   : > { %v4780_v22 = vmul.f32 %v4763_v59, %v8797_v51  ;;  %v4704_v15 = vmul.f32 %v6117_v57, %v4703_v1  ;;  %v4861_v3 = vmul.f32 %v4844_v17, %v8775_v45  ;;  %v4515_v16 = vand.u32 2147483647, %v8763_v46  ;;  %vm8849_vm5 = vmor %vm4511_vm4, %vm4512_vm1 }
 0xb76   : > { %v4510_v59 = vadd.f32 %v8802_v23, %v4509_v13  ;;  %v4517_v32 = vand.u32 2147483648, %v8763_v46  ;;  %v5013_v48 = vmul.f32 %v4996_v34, %v8781_v27  ;;  %v4961_v63 = vmul.f32 1.442695, %v4930_v54  ;;  %v8861_v13 = vpop.f32.mrf.mxu3 }
 0xb77   : > { %v4797_v38 = vadd.f32 1.4214138, %v4780_v22  ;;  %v4705_v61 = vadd.f32 %v6117_v57, %v4704_v15  ;;  %v4878_v14 = vadd.f32 0.2548296, %v4861_v3  ;;  %v4725_v54 = vand.u32 2147483647, %v8816_v12 }
 0xb78   : > { %v6123_v1 = vpop.eup %6122  ;;  %v4518_v3 = vor.u32 1.1754944e-38, %v4517_v32  ;;  %vm4516_vm6 = vcmp.eq.f32.partialorder %v4515_v16, 8.507059e+37  ;;  %vm4406_vm7 = vcmp.ge.f32.partialorder %v8721_v52, 0.0  ;;  %vm4721_vm9 = vweird.f32 %v8816_v12 }
 0xb79   : > { %v4814_v49 = vmul.f32 %v4797_v38, %v8797_v51  ;;  %v4709_v5 = vsel %vm4708_vm3, %v6117_v57, %v4705_v61  ;;  %v4895_v22 = vmul.f32 %v4878_v14, %v8775_v45  ;;  %v4717_v46 = vmul.f32 %v6123_v1, %v8816_v12 }
 0xb7a   : > { %v8845_v17 = vsel %vm8829_vm0, %v4713_v42, %v4709_v5  ;;  %v4914_v38 = vsub.f32 0.0, %v8800_v21  ;;  %v4514_v45 = vsel %vm8849_vm5, %v8802_v23, %v4510_v59  ;;  %v5030_v14 = vadd.f32 1.0, %v5013_v48  ;;  %v4335_v48 = vpop.f32.mrf.mxu0 }
 0xb7b   : > { %v4831_v37 = vadd.f32 -0.28449672, %v4814_v49  ;;  %v4760_v57 = vmul.f32 1.0614054, %v8845_v17  ;;  %v4980_v27 = vmul.f32 %v6119_v62, %v4895_v22  ;;  %v4718_v6 = vsub.f32 1.0, %v4717_v46 }
 0xb7c   : > { %v8864_v49 = vadd.f32 %v8704_v50, %v4333_v24  ;;  %v4727_v23 = vand.u32 2147483648, %v8816_v12  ;;  %v8868_v62 = vsel %vm4516_vm6, %v4518_v3, %v4514_v45  ;;  %vm4722_vm8 = vweird.f32 %v6123_v1 }
 0xb7d   : > { %v4848_v34 = vmul.f32 %v4831_v37, %v8797_v51  ;;  %v4777_v61 = vadd.f32 -1.4531521, %v4760_v57  ;;  %v4997_v42 = vsub.f32 1.0, %v4980_v27  ;;  %v4719_v5 = vmul.f32 %v6123_v1, %v4718_v6  ;;  %vm4723_vm11 = vmor %vm4721_vm9, %vm4722_vm8 }
 0xb7e   : > { %v4747_v37 = vmul.f32 1.0614054, %v8868_v62  ;;  %v8875_v24 = vmul.f32 0.70710677, %v8864_v49  ;;  %vm4726_vm10 = vcmp.eq.f32.partialorder %v4725_v54, 8.507059e+37  ;;  %v5047_v46 = vmul.f32 %v5030_v14, %v8744_v29 }
 0xb7f   : > { %v4794_v59 = vmul.f32 %v4777_v61, %v8845_v17  ;;  %v5014_v32 = vmul.f32 %v4997_v42, %v8805_v43  ;;  %v4865_v16 = vadd.f32 0.2548296, %v4848_v34  ;;  %v4720_v15 = vadd.f32 %v6123_v1, %v4719_v5 }
 0xb80   : > { %v4764_v57 = vadd.f32 -1.4531521, %v4747_v37  ;;  %v4728_v27 = vor.u32 1.1754944e-38, %v4727_v23  ;;  %v8879_v3 = vand.u32 2147483647, %v8875_v24  ;;  %v8884_v61 = vadd.f32 %v8704_v50, %v4335_v48 }
 0xb81   : > { %v4811_v22 = vadd.f32 1.4214138, %v4794_v59  ;;  %v5031_v45 = vadd.f32 1.0, %v5014_v32  ;;  %v4724_v34 = vsel %vm4723_vm11, %v6123_v1, %v4720_v15  ;;  %v4882_v54 = vmul.f32 %v4865_v16, %v8797_v51  ;;  %v5129_v32 = vpop.f32.mrf.mxu3 }
 0xb82   : > { %v4781_v12 = vmul.f32 %v4764_v57, %v8868_v62  ;;  %v8888_v42 = vsel %vm4726_vm10, %v4728_v27, %v4724_v34  ;;  %v4459_v29 = vmul.f32 0.3275911, %v8879_v3  ;;  %6124 = vpow2.f32 %v4961_v63 }
 0xb83   : > { %v4828_v43 = vmul.f32 %v4811_v22, %v8845_v17  ;;  %v5048_v6 = vmul.f32 %v5031_v45, %v8794_v8  ;;  %v4761_v23 = vmul.f32 1.0614054, %v8888_v42  ;;  %v4935_v1 = vmul.f32 1.442695, %v8823_v33  ;;  %v8911_v33 = vld [vmem:[%s839_s5] ss:$0 sm:$0xff] }
 0xb84   : > { %v4798_v59 = vadd.f32 1.4214138, %v4781_v12  ;;  %v8893_v37 = vadd.f32 1.0, %v4459_v29  ;;  %v8898_v16 = vmul.f32 0.70710677, %v8884_v61  ;;  %v8901_v22 = vmul.f32 0.5, %v8718_v26 }
 0xb85   : > { %v4845_v14 = vadd.f32 -0.28449672, %v4828_v43  ;;  %v5058_v5 = vpack.c.bf16 %v5048_v6, %v5047_v46  ;;  %v4778_v48 = vadd.f32 -1.4531521, %v4761_v23  ;;  %v4967_v15 = vmul.f32 %v8835_v7, %v4882_v54  ;;  %s9197_s5 = sld [smem:[#allocation34_spill]] (!%p5668_p5) }
 0xb86   : > { %v4815_v51 = vmul.f32 %v4798_v59, %v8868_v62  ;;  %v4931_v63 = vmul.f32 %v4914_v38, %v8800_v21  ;;  %6126 = vrcp.f32 %v8893_v37  ;;  %v4423_v26 = vsel %vm4406_vm7, 1.0, %v6349_v44 }
 0xb87   : > { %v4862_v8 = vmul.f32 %v4845_v14, %v8845_v17  ;;  %5665 = vmatmul.msk.bf16.gmra.mxu3 %vm1160_vm2, %v5058_v5  ;;  %v4795_v46 = vmul.f32 %v4778_v48, %v8888_v42  ;;  %vm4420_vm12 = vcmp.ge.f32.partialorder %v8749_v60, 0.0  ;;  %v8920_v21 = vmul.f32 0.5, %v8728_v2 }
 0xb88   : > { %v4832_v7 = vadd.f32 -0.28449672, %v4815_v51  ;;  %v4368_v45 = vpop.f32.mrf.mxu2  ;;  %vm4407_vm13 = vcmp.ge.f32.partialorder %v8733_v40, 0.0  ;;  %6128 = vpow2.f32 %v4935_v1  ;;  %v8926_v52 = vand.u32 2147483647, %v8898_v16  ;;  %v6125_v34 = vpop.eup %6124 }
 0xb89   : > { %v4879_v57 = vadd.f32 0.2548296, %v4862_v8  ;;  %v4812_v27 = vadd.f32 1.4214138, %v4795_v46  ;;  %v4984_v12 = vsub.f32 1.0, %v4967_v15  ;;  %v5128_v54 = vadd.f32 %v8911_v33, %v8861_v13 }
 0xb8a   : > { %v4849_v43 = vmul.f32 %v4832_v7, %v8868_v62  ;;  %v4963_v6 = vmul.f32 1.442695, %v4931_v63  ;;  %v5130_v2 = vadd.f32 %v8911_v33, %v5129_v32  ;;  %v8932_v29 = vmul.f32 0.5, %v8742_v36 }
 0xb8b   : > { %v4896_v38 = vmul.f32 %v4879_v57, %v8845_v17  ;;  %v4829_v14 = vmul.f32 %v4812_v27, %v8888_v42  ;;  %v4460_v23 = vmul.f32 0.3275911, %v8926_v52  ;;  %v4424_v1 = vsel %vm4407_vm13, 1.0, %v6349_v44 }
 0xb8c   : > { %v4866_v17 = vadd.f32 0.2548296, %v4849_v43  ;;  %v6127_v59 = vpop.eup %6126  ;;  %v5165_v8 = vadd.f32 %v5128_v54, %v8049_v11  ;;  %v5166_v13 = vadd.f32 %v5130_v2, %v8060_v10  ;;  %v4437_v36 = vsel %vm4420_vm12, 1.0, %v6349_v44 }
 0xb8d   : > { %v4981_v5 = vmul.f32 %v6125_v34, %v4896_v38  ;;  %v4846_v32 = vadd.f32 -0.28449672, %v4829_v14  ;;  %v4522_v15 = vmul.f32 %v6127_v59, %v8893_v37  ;;  %v5001_v57 = vmul.f32 %v4984_v12, %v4423_v26 }
 0xb8e   : > { %v4883_v51 = vmul.f32 %v4866_v17, %v8868_v62  ;;  %v6129_v63 = vpop.eup %6128  ;;  %6130 = vpow2.f32 %v4963_v6  ;;  %v8946_v46 = vadd.f32 1.0, %v4460_v23  ;;  %5182 = vst.msk [vmem:[#allocation2 + $0x20] sm:$0xff] %vm1160_vm2, %v5165_v8  ;;  %v8950_v11 = vadd.f32 %v8704_v50, %v4368_v45 }
 0xb8f   : > { %v5132_v48 = vpop.f32.mrf.mxu3  ;;  %v8953_v10 = vmul.f32 0.5, %v8770_v30  ;;  %v4863_v40 = vmul.f32 %v4846_v32, %v8888_v42  ;;  %v4523_v7 = vsub.f32 1.0, %v4522_v15  ;;  %5183 = vst.msk [vmem:[#allocation2 + $0x28] sm:$0xff] %vm1160_vm2, %v5166_v13  ;;  %v4998_v38 = vsub.f32 1.0, %v4981_v5 }
 0xb90   : > { %v4968_v60 = vmul.f32 %v6129_v63, %v4883_v51  ;;  %v4370_v62 = vpop.f32.mrf.mxu2  ;;  %v4530_v26 = vand.u32 2147483647, %v8893_v37  ;;  %v4532_v27 = vand.u32 2147483648, %v8893_v37  ;;  %6132 = vrcp.f32 %v8946_v46 }
 0xb91   : > { %v4880_v43 = vadd.f32 0.2548296, %v4863_v40  ;;  %v4524_v45 = vmul.f32 %v6127_v59, %v4523_v7  ;;  %vm4527_vm14 = vweird.f32 %v6127_v59  ;;  %v5018_v30 = vadd.f32 1.0, %v5001_v57 }
 0xb92   : > { %v4985_v50 = vsub.f32 1.0, %v4968_v60  ;;  %vm4421_vm15 = vcmp.ge.f32.partialorder %v8790_v4, 0.0  ;;  %v4901_v34 = vsub.f32 0.0, %v8879_v3  ;;  %v8963_v12 = vmul.f32 0.70710677, %v8950_v11 }
 0xb93   : > { %v4897_v6 = vmul.f32 %v4880_v43, %v8888_v42  ;;  %v4525_v2 = vadd.f32 %v6127_v59, %v4524_v45  ;;  %vm4526_vm0 = vweird.f32 %v8893_v37  ;;  %v5015_v17 = vmul.f32 %v4998_v38, %v4437_v36 }
 0xb94   : > { %v5002_v54 = vmul.f32 %v4985_v50, %v4424_v1  ;;  %v6131_v14 = vpop.eup %6130  ;;  %vm4528_vm1 = vmor %vm4526_vm0, %vm4527_vm14  ;;  %v4533_v23 = vor.u32 1.1754944e-38, %v4532_v27  ;;  %v8968_v5 = vand.u32 2147483647, %v8963_v12  ;;  %v5133_v8 = vadd.f32 %v8911_v33, %v5132_v48 }
 0xb95   : > { %v4982_v32 = vmul.f32 %v6131_v14, %v4897_v6  ;;  %v4529_v15 = vsel %vm4528_vm1, %v6127_v59, %v4525_v2  ;;  %vm4531_vm3 = vcmp.eq.f32.partialorder %v4530_v26, 8.507059e+37  ;;  %v5035_v42 = vmul.f32 %v5018_v30, %v8901_v22 }
 0xb96   : > { %v5019_v51 = vadd.f32 1.0, %v5002_v54  ;;  %v6133_v63 = vpop.eup %6132  ;;  %v8972_v1 = vsel %vm4531_vm3, %v4533_v23, %v4529_v15  ;;  %v4473_v37 = vmul.f32 0.3275911, %v8968_v5  ;;  %v5167_v36 = vadd.f32 %v5133_v8, %v8065_v56 }
 0xb97   : > { %v5134_v13 = vpop.f32.mrf.mxu3  ;;  %v4999_v57 = vsub.f32 1.0, %v4982_v32  ;;  %v4748_v60 = vmul.f32 1.0614054, %v8972_v1  ;;  %v4537_v48 = vmul.f32 %v6133_v63, %v8946_v46  ;;  %v5032_v7 = vadd.f32 1.0, %v5015_v17 }
 0xb98   : > { %v5036_v40 = vmul.f32 %v5019_v51, %v8920_v21  ;;  %v4438_v59 = vsel %vm4421_vm15, 1.0, %v6349_v44  ;;  %v8982_v62 = vadd.f32 1.0, %v4473_v37  ;;  %5184 = vst.msk [vmem:[#allocation2 + $0x30] sm:$0xff] %vm1160_vm2, %v5167_v36  ;;  %v5135_v22 = vadd.f32 %v8911_v33, %v5134_v13 }
 0xb99   : > { %v5016_v38 = vmul.f32 %v4999_v57, %v4438_v59  ;;  %v4765_v26 = vadd.f32 -1.4531521, %v4748_v60  ;;  %v4538_v27 = vsub.f32 1.0, %v4537_v48  ;;  %v4918_v21 = vmul.f32 %v4901_v34, %v8879_v3 }
 0xb9a   : > { %v5052_v56 = vpack.c.bf16 %v5036_v40, %v5035_v42  ;;  %v4545_v43 = vand.u32 2147483647, %v8946_v46  ;;  %v4547_v50 = vand.u32 2147483648, %v8946_v46  ;;  %6134 = vrcp.f32 %v8982_v62 }
 0xb9b   : > { %v5033_v4 = vadd.f32 1.0, %v5016_v38  ;;  %v4782_v45 = vmul.f32 %v4765_v26, %v8972_v1  ;;  %v4539_v30 = vmul.f32 %v6133_v63, %v4538_v27  ;;  %vm4542_vm4 = vweird.f32 %v6133_v63 }
 0xb9c   : > { %5659 = vmatmul.msk.bf16.vlgmr.msra.gmra.mxu0 %vm1160_vm2, %v5052_v56  ;;  %vm4541_vm5 = vweird.f32 %v8946_v46  ;;  %v5168_v6 = vadd.f32 %v5135_v22, %v8070_v19  ;;  %v5049_v3 = vmul.f32 %v5032_v7, %v8932_v29  ;;  %v4937_v17 = vmul.f32 1.442695, %v4918_v21 }
 0xb9d   : > { %v5050_v34 = vmul.f32 %v5033_v4, %v8953_v10  ;;  %v4799_v2 = vadd.f32 1.4214138, %v4782_v45  ;;  %v4540_v14 = vadd.f32 %v6133_v63, %v4539_v30  ;;  %vm4543_vm6 = vmor %vm4541_vm5, %vm4542_vm4  ;;  %v4548_v23 = vor.u32 1.1754944e-38, %v4547_v50 }
 0xb9e   : > { %5185 = vst.msk [vmem:[#allocation2 + $0x38] sm:$0xff] %vm1160_vm2, %v5168_v6  ;;  %vm4546_vm7 = vcmp.eq.f32.partialorder %v4545_v43, 8.507059e+37  ;;  %v4902_v29 = vsub.f32 0.0, %v8926_v52  ;;  %6136 = vpow2.f32 %v4937_v17  ;;  %v4740_v60 = vand.u32 2147483647, %v8982_v62 }
 0xb9f   : > { %v5137_v54 = vpop.f32.mrf.mxu3  ;;  %v5059_v13 = vpack.c.bf16 %v5050_v34, %v5049_v3  ;;  %v4816_v32 = vmul.f32 %v4799_v2, %v8972_v1  ;;  %v4544_v46 = vsel %vm4543_vm6, %v6133_v63, %v4540_v14  ;;  %vm4736_vm9 = vweird.f32 %v8982_v62 }
 0xba0   : > { %v5138_v8 = vadd.f32 %v8911_v33, %v5137_v54  ;;  %v6135_v19 = vpop.eup %6134  ;;  %v4549_v51 = vsel %vm4546_vm7, %v4548_v23, %v4544_v46  ;;  %v4919_v40 = vmul.f32 %v4902_v29, %v8926_v52  ;;  %vm4741_vm11 = vcmp.eq.f32.partialorder %v4740_v60, 8.507059e+37 }
 0xba1   : > { %v4833_v15 = vadd.f32 -0.28449672, %v4816_v32  ;;  %v4749_v42 = vmul.f32 1.0614054, %v4549_v51  ;;  %v4732_v37 = vmul.f32 %v6135_v19, %v8982_v62  ;;  %5666 = vmatmul.msk.bf16.gmra.mxu3 %vm1160_vm2, %v5059_v13  ;;  %vm4737_vm8 = vweird.f32 %v6135_v19 }
 0xba2   : > { %v5169_v10 = vadd.f32 %v5138_v8, %v8075_v39  ;;  %v4742_v39 = vand.u32 2147483648, %v8982_v62  ;;  %v4939_v52 = vmul.f32 1.442695, %v4919_v40  ;;  %vm4738_vm10 = vmor %vm4736_vm9, %vm4737_vm8  ;;  %v4915_v6 = vsub.f32 0.0, %v8968_v5 }
 0xba3   : > { %v4850_v36 = vmul.f32 %v4833_v15, %v8972_v1  ;;  %v4766_v57 = vadd.f32 -1.4531521, %v4749_v42  ;;  %v4733_v63 = vsub.f32 1.0, %v4732_v37  ;;  %vm4408_vm12 = vcmp.ge.f32.partialorder %v8875_v24, 0.0 }
 0xba4   : > { %5186 = vst.msk [vmem:[#allocation2 + $0x40] sm:$0xff] %vm1160_vm2, %v5169_v10  ;;  %v4743_v43 = vor.u32 1.1754944e-38, %v4742_v39  ;;  %v6137_v50 = vpop.eup %6136  ;;  %6138 = vpow2.f32 %v4939_v52  ;;  %v4425_v32 = vsel %vm4408_vm12, 1.0, %v6349_v44  ;;  %vm4409_vm13 = vcmp.ge.f32.partialorder %v8898_v16, 0.0 }
 0xba5   : > { %v4867_v7 = vadd.f32 0.2548296, %v4850_v36  ;;  %v4783_v59 = vmul.f32 %v4766_v57, %v4549_v51  ;;  %v4734_v22 = vmul.f32 %v6135_v19, %v4733_v63  ;;  %v4375_v57 = vmul.f32 0.5, %v8884_v61 }
 0xba6   : > { %vm4422_vm14 = vcmp.ge.f32.partialorder %v8963_v12, 0.0 }
 0xba7   : > { %v5139_v48 = vpop.f32.mrf.mxu3  ;;  %v4884_v56 = vmul.f32 %v4867_v7, %v8972_v1  ;;  %v4800_v26 = vadd.f32 1.4214138, %v4783_v59  ;;  %v4735_v27 = vadd.f32 %v6135_v19, %v4734_v22 }
 0xba8   : > { %v5140_v38 = vadd.f32 %v8911_v33, %v5139_v48 }
 0xba9   : > { %v4817_v4 = vmul.f32 %v4800_v26, %v4549_v51  ;;  %v4739_v45 = vsel %vm4738_vm10, %v6135_v19, %v4735_v27  ;;  %v4969_v54 = vmul.f32 %v6137_v50, %v4884_v56 }
 0xbaa   : > { %v5170_v21 = vadd.f32 %v5140_v38, %v8080_v47  ;;  %v4744_v30 = vsel %vm4741_vm11, %v4743_v43, %v4739_v45  ;;  %v4932_v47 = vmul.f32 %v4915_v6, %v8968_v5  ;;  %v6139_v13 = vpop.eup %6138  ;;  %v4426_v5 = vsel %vm4409_vm13, 1.0, %v6349_v44 }
 0xbab   : > { %v4834_v62 = vadd.f32 -0.28449672, %v4817_v4  ;;  %v4762_v3 = vmul.f32 1.0614054, %v4744_v30  ;;  %v4986_v2 = vsub.f32 1.0, %v4969_v54  ;;  %v4439_v38 = vsel %vm4422_vm14, 1.0, %v6349_v44 }
 0xbac   : > { %5187 = vst.msk [vmem:[#allocation2 + $0x48] sm:$0xff] %vm1160_vm2, %v5170_v21  ;;  %v4965_v46 = vmul.f32 1.442695, %v4932_v47 }
 0xbad   : > { %v4851_v1 = vmul.f32 %v4834_v62, %v4549_v51  ;;  %v4779_v34 = vadd.f32 -1.4531521, %v4762_v3  ;;  %v5003_v19 = vmul.f32 %v4986_v2, %v4425_v32 }
 0xbae   : > { %6140 = vpow2.f32 %v4965_v46 }
 0xbaf   : > { %v4868_v14 = vadd.f32 0.2548296, %v4851_v1  ;;  %v4796_v17 = vmul.f32 %v4779_v34, %v4744_v30  ;;  %v5020_v24 = vadd.f32 1.0, %v5003_v19 }
 0xbb1   : > { %v4885_v23 = vmul.f32 %v4868_v14, %v4549_v51  ;;  %v4813_v8 = vadd.f32 1.4214138, %v4796_v17  ;;  %v4374_v51 = vmul.f32 0.5, %v8864_v49  ;;  %v4388_v49 = vmul.f32 0.5, %v8950_v11 }
 0xbb3   : > { %v4970_v29 = vmul.f32 %v6139_v13, %v4885_v23  ;;  %v4830_v10 = vmul.f32 %v4813_v8, %v4744_v30  ;;  %v5037_v60 = vmul.f32 %v5020_v24, %v4374_v51 }
 0xbb4   : > { %v6141_v16 = vpop.eup %6140 }
 0xbb5   : > { %v4987_v15 = vsub.f32 1.0, %v4970_v29  ;;  %v4847_v42 = vadd.f32 -0.28449672, %v4830_v10 }
 0xbb7   : > { %v5004_v37 = vmul.f32 %v4987_v15, %v4426_v5  ;;  %v4864_v36 = vmul.f32 %v4847_v42, %v4744_v30 }
 0xbb9   : > { %v5021_v63 = vadd.f32 1.0, %v5004_v37  ;;  %v4881_v40 = vadd.f32 0.2548296, %v4864_v36 }
 0xbbb   : > { %v5038_v39 = vmul.f32 %v5021_v63, %v4375_v57  ;;  %v4898_v48 = vmul.f32 %v4881_v40, %v4744_v30 }
 0xbbd   : > { %v5053_v7 = vpack.c.bf16 %v5038_v39, %v5037_v60  ;;  %v4983_v59 = vmul.f32 %v6141_v16, %v4898_v48 }
 0xbbf   : > { %v5000_v22 = vsub.f32 1.0, %v4983_v59  ;;  %5660 = vmatmul.msk.bf16.gmra.mxu0 %vm1160_vm2, %v5053_v7 }
 0xbc1   : > { %v5017_v56 = vmul.f32 %v5000_v22, %v4439_v38 }
 0xbc3   : > { %v5034_v61 = vadd.f32 1.0, %v5017_v56 }
 0xbc5   : > { %v5051_v21 = vmul.f32 %v5034_v61, %v4388_v49 }
 0xbc6   : > { %v5142_v26 = vpop.f32.mrf.mxu3 }
 0xbc7   : > { %v5143_v27 = vadd.f32 %v8911_v33, %v5142_v26  ;;  %v5060_v43 = vpack.c.bf16 %v5051_v21, %v5051_v21 }
 0xbc9   : > { %v5171_v52 = vadd.f32 %v5143_v27, %v8085_v25  ;;  %5667 = vmatmul.msk.bf16.gmra.mxu3 %vm1160_vm2, %v5060_v43 }
 0xbcb   : > { %5188 = vst.msk [vmem:[#allocation2 + $0x50] sm:$0xff] %vm1160_vm2, %v5171_v52 }
 0xbce   : > { %v5144_v12 = vpop.f32.mrf.mxu3 }
 0xbcf   : > { %v5145_v50 = vadd.f32 %v8911_v33, %v5144_v12 }
 0xbd1   : > { %v5172_v44 = vadd.f32 %v5145_v50, %v8100_v18 }
 0xbd3   : > { %5189 = vst.msk [vmem:[#allocation2 + $0x58] sm:$0xff] %vm1160_vm2, %v5172_v44 }
 0xc0a   : > { %v5147_v4 = vpop.f32.mrf.mxu3 }
 0xc0b   : > { %v5148_v11 = vadd.f32 %v8911_v33, %v5147_v4 }
 0xc0d   : > { %v5173_v45 = vadd.f32 %v5148_v11, %v8105_v58 }
 0xc0f   : > { %5190 = vst.msk [vmem:[#allocation2 + $0x60] sm:$0xff] %vm1160_vm2, %v5173_v45 }
 0xc12   : > { %v5149_v25 = vpop.f32.mrf.mxu3 }
 0xc13   : > { %v5150_v30 = vadd.f32 %v8911_v33, %v5149_v25 }
 0xc15   : > { %v5174_v6 = vadd.f32 %v5150_v30, %v8125_v28 }
 0xc17   : > { %5191 = vst.msk [vmem:[#allocation2 + $0x68] sm:$0xff] %vm1160_vm2, %v5174_v6 }
 0xc19   : > { %v5117_v54 = vpop.f32.mrf.mxu0 }
 0xc1a   : > { %v5118_v62 = vadd.f32 %v8911_v33, %v5117_v54 }
 0xc1c   : > { %v5161_v18 = vadd.f32 %v5118_v62, %v8167_v9 }
 0xc1e   : > { %5178 = vst.msk [vmem:[#allocation2] sm:$0xff] %vm1160_vm2, %v5161_v18 }
 0xc21   : > { %v5119_v3 = vpop.f32.mrf.mxu0 }
 0xc22   : > { %v5120_v1 = vadd.f32 %v8911_v33, %v5119_v3 }
 0xc24   : > { %v5162_v58 = vadd.f32 %v5120_v1, %v8155_v55  ;;  %v5152_v34 = vpop.f32.mrf.mxu3 }
 0xc25   : > { %v5153_v47 = vadd.f32 %v8911_v33, %v5152_v34 }
 0xc26   : > { %5179 = vst.msk [vmem:[#allocation2 + $0x8] sm:$0xff] %vm1160_vm2, %v5162_v58 }
 0xc27   : > { %v5175_v28 = vadd.f32 %v5153_v47, %v8137_v20 }
 0xc29   : > { %5192 = vst.msk [vmem:[#allocation2 + $0x70] sm:$0xff] %vm1160_vm2, %v5175_v28 }
 0xc2c   : > { %v5154_v2 = vpop.f32.mrf.mxu3 }
 0xc2d   : > { %v5155_v14 = vadd.f32 %v8911_v33, %v5154_v2 }
 0xc2f   : > { %v5176_v9 = vadd.f32 %v5155_v14, %v8150_v53 }
 0xc31   : > { %5193 = vst.msk [vmem:[#allocation2 + $0x78] sm:$0xff] %vm1160_vm2, %v5176_v9 }
 0xc3c   : > { %v5122_v17 = vpop.f32.mrf.mxu0 }
 0xc3d   : > { %v5123_v23 = vadd.f32 %v8911_v33, %v5122_v17 }
 0xc3f   : > { %v5163_v55 = vadd.f32 %v5123_v23, %v8172_v0 }
 0xc41   : > { %5180 = vst.msk [vmem:[#allocation2 + $0x10] sm:$0xff] %vm1160_vm2, %v5163_v55 }
 0xc44   : > { %v5124_v8 = vpop.f32.mrf.mxu0 }
 0xc45   : > { %v5125_v13 = vadd.f32 %v8911_v33, %v5124_v8 }
 0xc47   : > { %v5164_v20 = vadd.f32 %v5125_v13, %v8182_v35 }
 0xc49   : > { %5181 = vst.msk [vmem:[#allocation2 + $0x18] sm:$0xff] %vm1160_vm2, %v5164_v20 }
 0xc4c   : > { %v5157_v32 = vpop.f32.mrf.mxu3 }
 0xc4d   : > { %v5158_v46 = vadd.f32 %v8911_v33, %v5157_v32 }
 0xc4f   : > { %v5177_v53 = vadd.f32 %v5158_v46, %v8195_v31 }
 0xc50   : > { %5198 = sbr.rel (%p5668_p5) target bundleno = 3562 (0xdea), region = 141 }
 0xc51   : > { %5194 = vst.msk [vmem:[#allocation2 + $0x80] sm:$0xff] %vm1160_vm2, %v5177_v53 }
 0xc54   : > { %v5159_v19 = vpop.f32.mrf.mxu3 }
 0xc55   : > { %vm5201_vm15 = vcmask 254976   ;;  %v5706_v31 = vld [vmem:[%s9197_s5 + $0x8] sm:$0xff]  ;;  %v5705_v33 = vld [vmem:[%s9197_s5] sm:$0xff]  ;;  %vm5269_vm4 = vcmask 58368  }
 0xc56   : > { %v5202_v0 = vsel %vm5201_vm15, %v5161_v18, 0.0  ;;  %5262 = vmatpush.bf16.msra.mxu0 %v5706_v31  ;;  %v6162_v39 = vld [vmem:[%s9198_s23] ss:$0 sm:$0xff] }
 0xc57   : > { %5203 = vadd.xlane.f32.xlu0 %v5202_v0  ;;  %v6164_v38 = vld [vmem:[%s9200_s12] ss:$0 sm:$0xff] }
 0xc5a   : > { %5263 = vmatpush.bf16.msra.mxu0 %v5705_v33 }
 0xcca   : > { %v5204_v29 = vpop.xlane.xlu0 %5203 }
 0xccb   : > { %v5205_v10 = vmul.f32 %v5204_v29, %v6711_v41 }
 0xccd   : > { %v5206_v35 = vsub.f32 %v5161_v18, %v5205_v10 }
 0xccf   : > { %v5207_v15 = vmul.f32 %v5206_v35, %v5206_v35 }
 0xcd1   : > { %v5208_v42 = vsel %vm5201_vm15, %v5207_v15, 0.0 }
 0xcd2   : > { %5209 = vadd.xlane.f32.xlu0 %v5208_v42 }
 0xd45   : > { %v5210_v5 = vpop.xlane.xlu0 %5209 }
 0xd46   : > { %v5211_v24 = vmul.f32 %v5210_v5, %v6711_v41  ;;  %v6163_v41 = vld [vmem:[%s9199_s16] ss:$0 sm:$0xff] }
 0xd48   : > { %v5212_v37 = vadd.f32 1e-05, %v5211_v24 }
 0xd4a   : > { %6165 = vrsqrt.f32 %v5212_v37  ;;  %vm5219_vm1 = vweird.f32 %v5212_v37 }
 0xd50   : > { %v6166_v36 = vpop.eup %6165 }
 0xd51   : > { %v5214_v51 = vmul.f32 %v6166_v36, %v5212_v37  ;;  %vm5220_vm0 = vweird.f32 %v6166_v36 }
 0xd52   : > { %vm5221_vm3 = vmor %vm5219_vm1, %vm5220_vm0 }
 0xd53   : > { %v5215_v57 = vmul.f32 %v6166_v36, %v5214_v51 }
 0xd55   : > { %v5216_v63 = vmul.f32 0.5, %v5215_v57 }
 0xd57   : > { %v5217_v40 = vsub.f32 1.5, %v5216_v63 }
 0xd59   : > { %v5218_v60 = vmul.f32 %v6166_v36, %v5217_v40 }
 0xd5b   : > { %v5222_v48 = vsel %vm5221_vm3, %v6166_v36, %v5218_v60 }
 0xd5c   : > { %v5223_v16 = vmul.f32 %v5222_v48, %v5206_v35 }
 0xd5e   : > { %v5227_v7 = vmul.f32 %v6162_v39, %v5223_v16 }
 0xd60   : > { %v5231_v59 = vadd.f32 %v6163_v41, %v5227_v7 }
 0xd62   : > { %v5232_v22 = vpack.c.bf16 %v5231_v59, %v5231_v59 }
 0xd64   : > { %5677 = vmatmul.msk.bf16.vlgmr.msra.gmra.mxu0 %vm1160_vm2, %v5232_v22 }
 0xde1   : > { %v5265_v56 = vpop.f32.mrf.mxu0 }
 0xde2   : > { %v5266_v26 = vadd.f32 %v6164_v38, %v5265_v56 }
 0xde4   : > { %5270 = vst.msk [vmem:[#allocation9] sm:$0x3] %vm5269_vm4, %v5266_v26 }
 0xde9   : > { %v5267_v49 = vpop.f32.mrf.mxu0 }
 0xdea PF: > { %p5752_p8 = scmp.eq.s32.totalorder %s6480_s3, 1  ;;  %s6350_s24 = smov [#allocation9]  }
 0xdeb   : > { %s5277_s20 = sshll.u32 %s6350_s24, 4  ;;  %s9201_s13 = sld [smem:[#allocation36_spill]]  ;;  %s5278_s20 = int_to_ptr.vmem [resolvable:$true] %s5277_s20 }
 0xdf1   : > { %s5279_s2 = sshll.u32 %s9201_s13, 4  ;;  %s5280_s2 = int_to_ptr.hbm [resolvable:$true] %s5279_s2 }
 0xdf2   : > { %5733 = dma.vmem_to_hbm [thread:$0]  (%p5752_p8), %s5278_s20, 32, %s5280_s2, [#allocation5]  }
 0xdf3   : > { %6316 = dma.done.wait (%p5752_p8), [#allocation5], 32  }
 0xdf4   : > { %6318 = vsyncadd (%p5752_p8), [#allocation5], 4294967264 }
 0xdf5 PF: > { %s9202_s27 = sld [smem:[#allocation18_spill]]  ;;  %s9204_s2 = smov %s6325_s25 }
 0xdf6   : > { %s9203_s29 = sld [smem:[#allocation19_spill]]  ;;  %s9205_s25 = smov %s6329_s26 }
 0xdfb   : > { %p31_p9 = scmp.ge.s32.totalorder %s9202_s27, 4  }
 0xdfc   : > { %s9206_s26 = smov %s9203_s29 }
 0xdfd   :  { %33 = sbr.rel (!%p31_p9) target bundleno = 22 (0x16), region = 210 }
 0xe02   :  { %5293 = vsyncpa [#allocation4], 1 }
 0xe03   :  { %5295 = vsyncpa [#allocation4 + $0x1], 1 }
 0xe04   :  { %5296 = vsyncpa [#allocation7], 1 }
 0xe05   :  { %5297 = vsyncpa [#allocation5], 1 }
 0xe06   :  { %5299 = vsyncpa [#allocation5 + $0x1], 1 }

</bundles_post_ra>
